<compile_context>
chip_gen: v7x
topology: tpu7x:2x2x1
jax: 0.10.0
libtpu: 0.0.40
codegen_flags: <defaults>
</compile_context>

<pallas_src>
import jax
import jax.numpy as jnp
from jax.experimental import pallas as pl
from jax.experimental.pallas import tpu as pltpu

FEATURE_DIM = 39
NUM_CLASS = 7
D_IN = 173
D_HID = 50
K_FUSED = FEATURE_DIM * D_IN  # 6747


def _round_up(n, m):
    return ((n + m - 1) // m) * m


def _padded_tile_bytes(rows, cols, dtype):
    # VMEM layout pads the last dim to 128 lanes and the second-to-last to the
    # sublane count for the dtype (8 for 32-bit, 16 for bf16, 32 for int8/fp8).
    itemsize = jnp.dtype(dtype).itemsize
    sublane = 8 * (4 // itemsize) if itemsize < 4 else 8
    return _round_up(rows, sublane) * _round_up(cols, 128) * itemsize


def _fused_mlp_kernel(x_ref, w_ref, b_ref, o_ref):
    # x_ref: (TB, 6747); w_ref: (6747, 7); b_ref: (1, 7) f32; o_ref: (TB, 7) f32.
    acc = jnp.dot(x_ref[...], w_ref[...], preferred_element_type=jnp.float32)
    o_ref[...] = (acc + b_ref[...]).astype(o_ref.dtype)


def fuse_params(w1, b1, w11, b11, w2, b2):
    """Collapse fc1 -> fc11 -> squeeze -> (eval-mode dropout) -> fc2 into one affine map."""
    # Weights stored as (in, out); biases as (1, out).
    w_eff = w1 @ w11                                   # (173, 1)
    b_eff = (b1 @ w11 + b11)[0, 0]                     # scalar
    # W_big[f*173 + d, c] = w_eff[d] * w2[f, c]
    w_big = (w2[:, None, :] * w_eff[None, :, :]).reshape(K_FUSED, NUM_CLASS)
    b_big = (b_eff * jnp.sum(w2, axis=0) + b2[0]).reshape(1, NUM_CLASS)
    return w_big, b_big


def mlp_net(x, w1, b1, w11, b11, w2, b2, *, tb=512):
    """Forward pass of MLPNet (eval mode). x: (B, 39, 173), any float dtype."""
    B = x.shape[0]
    assert x.shape[1:] == (FEATURE_DIM, D_IN), x.shape

    # TODO(synk): training-mode dropout (p=0.2) would need pltpu.prng_seed +
    # pltpu.stateful_bernoulli on the squeezed scores; eval mode is identity.
    w_big, b_big = fuse_params(w1, b1, w11, b11, w2, b2)

    x2 = x.reshape(B, K_FUSED)            # contiguous reshape: a view, no HBM pass
    w_big = w_big.astype(x2.dtype)        # tiny array; match x so bf16 x -> bf16 MXU
    b_big = b_big.astype(jnp.float32)

    # Batch tile choice:
    #  * B <= 8: one block whose sublane dim equals the full batch dim (layout-legal,
    #    no padding, no partial blocks).
    #  * B >  8: multiple-of-8 tile; any boundary remainder is handled by Pallas'
    #    masked partial block (OOB reads are row-independent garbage, OOB writes
    #    are dropped), so no wrapper pad/slice pass over x is needed.
    if B <= 8:
        tb = B
    else:
        tb = max(8, min(_round_up(tb, 8), _round_up(B, 8)))

    vmem_cap = 56 * 1024 * 1024  # headroom under v7x's 64 MiB physical VMEM

    def vmem_needed(tb_):
        return (2 * _padded_tile_bytes(tb_, K_FUSED, x2.dtype)             # x, double-buffered
                + 2 * _padded_tile_bytes(K_FUSED, NUM_CLASS, w_big.dtype)  # resident weights
                + 2 * _padded_tile_bytes(1, NUM_CLASS, jnp.float32)        # resident bias
                + 2 * _padded_tile_bytes(tb_, NUM_CLASS, jnp.float32))     # output tile

    while tb > 8 and vmem_needed(tb) + vmem_needed(tb) // 4 > vmem_cap:
        tb = max(8, _round_up(tb // 2, 8))
    vmem_limit = int(min(vmem_cap, vmem_needed(tb) + vmem_needed(tb) // 4 + (1 << 20)))

    grid = (pl.cdiv(B, tb),)

    cost = pl.CostEstimate(
        flops=2 * B * K_FUSED * NUM_CLASS,
        transcendentals=0,
        bytes_accessed=(x2.size * jnp.dtype(x2.dtype).itemsize
                        + w_big.size * jnp.dtype(w_big.dtype).itemsize
                        + b_big.size * 4
                        + B * NUM_CLASS * 4),
    )

    out = pl.pallas_call(
        _fused_mlp_kernel,
        out_shape=jax.ShapeDtypeStruct((B, NUM_CLASS), jnp.float32),
        grid_spec=pltpu.PrefetchScalarGridSpec(
            num_scalar_prefetch=0,
            grid=grid,
            in_specs=[
                pl.BlockSpec((tb, K_FUSED), lambda i: (i, 0)),           # x tile per step
                pl.BlockSpec((K_FUSED, NUM_CLASS), lambda i: (0, 0)),    # weights resident
                pl.BlockSpec((1, NUM_CLASS), lambda i: (0, 0)),          # bias resident
            ],
            out_specs=pl.BlockSpec((tb, NUM_CLASS), lambda i: (i, 0)),
        ),
        compiler_params=pltpu.CompilerParams(
            dimension_semantics=("parallel",),   # lets v7x shard batch tiles over 2 TCs
            vmem_limit_bytes=vmem_limit,
        ),
        cost_estimate=cost,
    )(x2, w_big, b_big)
    return out


def init_params(key):
    # Mimic PyTorch nn.Linear default init: U(-1/sqrt(fan_in), 1/sqrt(fan_in)).
    ks = jax.random.split(key, 6)

    def lin(kw, kb, fan_in, fan_out):
        bound = 1.0 / jnp.sqrt(fan_in)
        w = jax.random.uniform(kw, (fan_in, fan_out), jnp.float32, -bound, bound)
        b = jax.random.uniform(kb, (1, fan_out), jnp.float32, -bound, bound)
        return w, b

    w1, b1 = lin(ks[0], ks[1], D_IN, D_HID)
    w11, b11 = lin(ks[2], ks[3], D_HID, 1)
    w2, b2 = lin(ks[4], ks[5], FEATURE_DIM, NUM_CLASS)
    return w1, b1, w11, b11, w2, b2


def reference(x, w1, b1, w11, b11, w2, b2):
    # Layered (PyTorch-order) reference.
    h1 = x @ w1 + b1[0]
    h2 = (h1 @ w11 + b11[0]).squeeze(-1)
    return h2 @ w2 + b2[0]


if __name__ == "__main__":
    key = jax.random.PRNGKey(0)
    k_x, k_p, k_x2 = jax.random.split(key, 3)
    params = init_params(k_p)

    # Small-batch case (single block, sublane dim == full batch dim).
    B = 2
    x = jax.random.normal(k_x, (B, FEATURE_DIM, D_IN), jnp.float32)
    ref = reference(x, *params)
    out = jax.block_until_ready(mlp_net(x, *params))
    assert out.shape == (B, NUM_CLASS)
    assert jnp.allclose(out, ref, atol=1e-4, rtol=1e-4), float(jnp.max(jnp.abs(out - ref)))

    # Multi-tile grid case (3 grid steps with tb=8).
    B2 = 24
    x_big = jax.random.normal(k_x2, (B2, FEATURE_DIM, D_IN), jnp.float32)
    ref_big = reference(x_big, *params)
    out_big = jax.block_until_ready(mlp_net(x_big, *params, tb=8))
    assert out_big.shape == (B2, NUM_CLASS)
    assert jnp.allclose(out_big, ref_big, atol=1e-4, rtol=1e-4), float(
        jnp.max(jnp.abs(out_big - ref_big)))

    # bf16 input path (halves HBM traffic for large-batch use); looser tolerance.
    out_bf16 = jax.block_until_ready(mlp_net(x.astype(jnp.bfloat16), *params))
    assert out_bf16.shape == (B, NUM_CLASS)
    assert jnp.allclose(out_bf16, ref, atol=5e-2, rtol=5e-2), float(
        jnp.max(jnp.abs(out_bf16 - ref)))

    print("KERNEL_OK")
</pallas_src>

<mosaic_0001>
module attributes {stable_mosaic.version = 11 : i64} {
  func.func @_fused_mlp_kernel(%arg0: i32, %arg1: memref<2x6747xf32, #tpu.memory_space<vmem>>, %arg2: memref<6747x7xf32, #tpu.memory_space<vmem>>, %arg3: memref<1x7xf32, #tpu.memory_space<vmem>>, %arg4: memref<2x7xf32, #tpu.memory_space<vmem>>) attributes {dimension_semantics = [#tpu.dimension_semantics<parallel>], iteration_bounds = array<i64: 1>, scalar_prefetch = 0 : i64, scratch_operands = 0 : i64, tpu.core_type = #tpu.core_type<tc>, window_params = [{transform_indices = @transform_0, window_bounds = array<i64: 2, 6747>}, {pipeline_mode = #tpu.pipeline_mode<synchronous>, transform_indices = @transform_1, window_bounds = array<i64: 6747, 7>}, {pipeline_mode = #tpu.pipeline_mode<synchronous>, transform_indices = @transform_2, window_bounds = array<i64: 1, 7>}, {transform_indices = @transform_3, window_bounds = array<i64: 2, 7>}]} {
    %c0 = arith.constant 0 : index
    %c0_0 = arith.constant 0 : index
    %0 = vector.load %arg1[%c0, %c0_0] : memref<2x6747xf32, #tpu.memory_space<vmem>>, vector<2x6747xf32>
    %c0_1 = arith.constant 0 : index
    %c0_2 = arith.constant 0 : index
    %1 = vector.load %arg2[%c0_1, %c0_2] : memref<6747x7xf32, #tpu.memory_space<vmem>>, vector<6747x7xf32>
    %cst = arith.constant dense<0.000000e+00> : vector<2x7xf32>
    %2 = tpu.matmul %0, %1, %cst {dimension_numbers = #tpu.dot_dimension_numbers<[1], [0], [0], [1], [0, 0, 1, 1], [], []>} : vector<2x6747xf32>, vector<6747x7xf32>, vector<2x7xf32> -> vector<2x7xf32>
    %c0_3 = arith.constant 0 : index
    %c0_4 = arith.constant 0 : index
    %3 = vector.load %arg3[%c0_3, %c0_4] : memref<1x7xf32, #tpu.memory_space<vmem>>, vector<1x7xf32>
    %4 = vector.broadcast %3 : vector<1x7xf32> to vector<2x7xf32>
    %5 = arith.addf %2, %4 : vector<2x7xf32>
    %c0_5 = arith.constant 0 : index
    %c0_6 = arith.constant 0 : index
    %6 = vector.load %arg4[%c0_5, %c0_6] : memref<2x7xf32, #tpu.memory_space<vmem>>, vector<2x7xf32>
    tpu.vector_store %arg4[%c0_5, %c0_6], %5 {strides = array<i32>} : memref<2x7xf32, #tpu.memory_space<vmem>>, vector<2x7xf32>,
    return
  }
  func.func @transform_0(%arg0: i32) -> (i32, i32) {
    %c0_i32 = arith.constant 0 : i32
    %c0_i32_0 = arith.constant 0 : i32
    return %arg0, %c0_i32 : i32, i32
  }
  func.func @transform_1(%arg0: i32) -> (i32, i32) {
    %c0_i32 = arith.constant 0 : i32
    %c0_i32_0 = arith.constant 0 : i32
    %c0_i32_1 = arith.constant 0 : i32
    return %c0_i32, %c0_i32_0 : i32, i32
  }
  func.func @transform_2(%arg0: i32) -> (i32, i32) {
    %c0_i32 = arith.constant 0 : i32
    %c0_i32_0 = arith.constant 0 : i32
    %c0_i32_1 = arith.constant 0 : i32
    return %c0_i32, %c0_i32_0 : i32, i32
  }
  func.func @transform_3(%arg0: i32) -> (i32, i32) {
    %c0_i32 = arith.constant 0 : i32
    %c0_i32_0 = arith.constant 0 : i32
    return %arg0, %c0_i32 : i32, i32
  }
}

</mosaic_0001>

<bundles_post_ra>
// kernel: tpu_custom_call.1
= control target key start
LH: loop header
LB: loop body
LE: loop exit
PB: predicated region body
PF: predicated region fallthrough
CT: control target
= control target key end

     0   :  { %v4935_v43 = vmov 1983009808   ;;  %v898_v45 = vlaneseq  ;;  %s7713_s0 = inlined_call_operand.vmem [shape: f32[2,6747], index: 0, kind: input, shape index: {}]   ;;  %s7714_s1 = inlined_call_operand.vmem [shape: f32[6747,7], index: 1, kind: input, shape index: {}]   ;;  %s7715_s2 = inlined_call_operand.vmem [shape: f32[1,7], index: 2, kind: input, shape index: {}]   ;;  %s7716_s3 = inlined_call_operand.hbm [shape: f32[2,7], index: 3, kind: output, shape index: {}]  }
   0x1   :  { %v45_v0 = vld [vmem:[%s7714_s1 + $0x80] sm:$0xff]  ;;  %v46_v1 = vld [vmem:[%s7714_s1 + $0x88] sm:$0xff]  ;;  %v47_v11 = vld [vmem:[%s7714_s1 + $0x90] sm:$0xff]  ;;  %v896_v44 = vunpack.c.l.s4 %v4935_v43 }
   0x2   :  { %v29_v2 = vld [vmem:[%s7714_s1] sm:$0xff]  ;;  %v4041_v3 = vpack.c.bf16 %v46_v1, %v45_v0  ;;  %v30_v4 = vld [vmem:[%s7714_s1 + $0x8] sm:$0xff]  ;;  %v48_v13 = vld [vmem:[%s7714_s1 + $0x98] sm:$0xff]  ;;  %v899_v60 = vshrl.u32 %v898_v45, 7 }
   0x3   :  { %v77_v5 = vld [vmem:[%s7714_s1 + $0x180] sm:$0xff]  ;;  %v78_v6 = vld [vmem:[%s7714_s1 + $0x188] sm:$0xff]  ;;  %v4043_v7 = vpack.c.bf16 %v30_v4, %v29_v2  ;;  %v31_v14 = vld [vmem:[%s7714_s1 + $0x10] sm:$0xff]  ;;  %v4045_v16 = vpack.c.bf16 %v48_v13, %v47_v11  ;;  %v897_v59 = vunpack.c.0.s8 %v896_v44 }
   0x4   :  { %v4073_v8 = vpack.c.bf16 %v78_v6, %v77_v5  ;;  %v61_v9 = vld [vmem:[%s7714_s1 + $0x100] sm:$0xff]  ;;  %v62_v10 = vld [vmem:[%s7714_s1 + $0x108] sm:$0xff]  ;;  %4042 = vmatprep.subr.bf16.mxu0 %v4041_v3  ;;  %v32_v15 = vld [vmem:[%s7714_s1 + $0x18] sm:$0xff] }
   0x5   :  { %v4075_v12 = vpack.c.bf16 %v62_v10, %v61_v9  ;;  %4044 = vmatpush3.bf16.msra.mxu0 %v4043_v7  ;;  %v4047_v17 = vpack.c.bf16 %v32_v15, %v31_v14  ;;  %v79_v18 = vld [vmem:[%s7714_s1 + $0x190] sm:$0xff]  ;;  %v80_v19 = vld [vmem:[%s7714_s1 + $0x198] sm:$0xff]  ;;  %v49_v23 = vld [vmem:[%s7714_s1 + $0xa0] sm:$0xff]  ;;  %v5105_v10 = vsub.s32 %v897_v59, %v899_v60 }
   0x6   :  { %4074 = vmatprep.subr.bf16.mxu1 %v4073_v8  ;;  %v63_v20 = vld [vmem:[%s7714_s1 + $0x110] sm:$0xff]  ;;  %v4077_v21 = vpack.c.bf16 %v80_v19, %v79_v18  ;;  %v64_v22 = vld [vmem:[%s7714_s1 + $0x118] sm:$0xff]  ;;  %v50_v24 = vld [vmem:[%s7714_s1 + $0xa8] sm:$0xff]  ;;  %4046 = vmatprep.subr.bf16.mxu0 %v4045_v16 }
   0x7   :  { %4076 = vmatpush3.bf16.msra.mxu1 %v4075_v12  ;;  %v4079_v25 = vpack.c.bf16 %v64_v22, %v63_v20  ;;  %v4049_v26 = vpack.c.bf16 %v50_v24, %v49_v23  ;;  %v33_v27 = vld [vmem:[%s7714_s1 + $0x20] sm:$0xff]  ;;  %v34_v28 = vld [vmem:[%s7714_s1 + $0x28] sm:$0xff]  ;;  %v51_v35 = vld [vmem:[%s7714_s1 + $0xb0] sm:$0xff] }
   0x8   :  { %v81_v29 = vld [vmem:[%s7714_s1 + $0x1a0] sm:$0xff]  ;;  %4078 = vmatprep.subr.bf16.mxu1 %v4077_v21  ;;  %v82_v30 = vld [vmem:[%s7714_s1 + $0x1a8] sm:$0xff]  ;;  %v4051_v33 = vpack.c.bf16 %v34_v28, %v33_v27  ;;  %v52_v36 = vld [vmem:[%s7714_s1 + $0xb8] sm:$0xff] }
   0x9   :  { %v65_v31 = vld [vmem:[%s7714_s1 + $0x120] sm:$0xff]  ;;  %v66_v32 = vld [vmem:[%s7714_s1 + $0x128] sm:$0xff]  ;;  %4048 = vmatpush3.bf16.msra.mxu0 %v4047_v17  ;;  %v4081_v34 = vpack.c.bf16 %v82_v30, %v81_v29  ;;  %v35_v37 = vld [vmem:[%s7714_s1 + $0x30] sm:$0xff]  ;;  %v4053_v39 = vpack.c.bf16 %v52_v36, %v51_v35 }
   0xa   :  { %4050 = vmatprep.subr.bf16.mxu0 %v4049_v26  ;;  %v4083_v38 = vpack.c.bf16 %v66_v32, %v65_v31  ;;  %v36_v40 = vld [vmem:[%s7714_s1 + $0x38] sm:$0xff]  ;;  %v83_v41 = vld [vmem:[%s7714_s1 + $0x1b0] sm:$0xff]  ;;  %v53_v49 = vld [vmem:[%s7714_s1 + $0xc0] sm:$0xff] }
   0xb   :  { %4080 = vmatpush3.bf16.msra.mxu1 %v4079_v25  ;;  %v84_v42 = vld [vmem:[%s7714_s1 + $0x1b8] sm:$0xff]  ;;  %v67_v47 = vld [vmem:[%s7714_s1 + $0x130] sm:$0xff]  ;;  %v54_v50 = vld [vmem:[%s7714_s1 + $0xc8] sm:$0xff]  ;;  %v4055_v51 = vpack.c.bf16 %v36_v40, %v35_v37 }
   0xc   :  { %4082 = vmatprep.subr.bf16.mxu1 %v4081_v34  ;;  %v4085_v46 = vpack.c.bf16 %v84_v42, %v83_v41  ;;  %v68_v48 = vld [vmem:[%s7714_s1 + $0x138] sm:$0xff]  ;;  %v85_v52 = vld [vmem:[%s7714_s1 + $0x1c0] sm:$0xff]  ;;  %v86_v53 = vld [vmem:[%s7714_s1 + $0x1c8] sm:$0xff]  ;;  %v4057_v55 = vpack.c.bf16 %v54_v50, %v53_v49 }
   0xd   :  { %4052 = vmatpush3.bf16.msra.mxu0 %v4051_v33  ;;  %v4087_v54 = vpack.c.bf16 %v68_v48, %v67_v47  ;;  %v37_v56 = vld [vmem:[%s7714_s1 + $0x40] sm:$0xff]  ;;  %v38_v57 = vld [vmem:[%s7714_s1 + $0x48] sm:$0xff]  ;;  %v4089_v61 = vpack.c.bf16 %v86_v53, %v85_v52  ;;  %v55_v63 = vld [vmem:[%s7714_s1 + $0xd0] sm:$0xff] }
   0xe   :  { %4054 = vmatprep.subr.bf16.mxu0 %v4053_v39  ;;  %v69_v58 = vld [vmem:[%s7714_s1 + $0x140] sm:$0xff]  ;;  %v70_v62 = vld [vmem:[%s7714_s1 + $0x148] sm:$0xff]  ;;  %v56_v0 = vld [vmem:[%s7714_s1 + $0xd8] sm:$0xff]  ;;  %v4059_v3 = vpack.c.bf16 %v38_v57, %v37_v56 }
   0xf   :  { %4084 = vmatpush3.bf16.msra.mxu1 %v4083_v38  ;;  %v87_v1 = vld [vmem:[%s7714_s1 + $0x1d0] sm:$0xff]  ;;  %v88_v2 = vld [vmem:[%s7714_s1 + $0x1d8] sm:$0xff]  ;;  %v4091_v5 = vpack.c.bf16 %v70_v62, %v69_v58  ;;  %v4061_v6 = vpack.c.bf16 %v56_v0, %v55_v63  ;;  %v57_v12 = vld [vmem:[%s7714_s1 + $0xe0] sm:$0xff] }
  0x10   :  { %4086 = vmatprep.subr.bf16.mxu1 %v4085_v46  ;;  %v39_v4 = vld [vmem:[%s7714_s1 + $0x50] sm:$0xff]  ;;  %v40_v7 = vld [vmem:[%s7714_s1 + $0x58] sm:$0xff]  ;;  %v4093_v11 = vpack.c.bf16 %v88_v2, %v87_v1  ;;  %v58_v13 = vld [vmem:[%s7714_s1 + $0xe8] sm:$0xff] }
  0x11   :  { %4056 = vmatpush3.bf16.msra.mxu0 %v4055_v51  ;;  %v71_v8 = vld [vmem:[%s7714_s1 + $0x150] sm:$0xff]  ;;  %v72_v9 = vld [vmem:[%s7714_s1 + $0x158] sm:$0xff]  ;;  %v89_v14 = vld [vmem:[%s7714_s1 + $0x1e0] sm:$0xff]  ;;  %v4063_v16 = vpack.c.bf16 %v40_v7, %v39_v4  ;;  %v4065_v19 = vpack.c.bf16 %v58_v13, %v57_v12 }
  0x12   :  { %4058 = vmatprep.subr.bf16.mxu0 %v4057_v55  ;;  %v90_v15 = vld [vmem:[%s7714_s1 + $0x1e8] sm:$0xff]  ;;  %v4095_v17 = vpack.c.bf16 %v72_v9, %v71_v8  ;;  %v15_v18 = vld [vmem:[%s7713_s0] sm:$0xff]  ;;  %v59_v27 = vld [vmem:[%s7714_s1 + $0xf0] sm:$0xff] }
  0x13   :  { %4088 = vmatpush3.bf16.msra.mxu1 %v4087_v54  ;;  %v41_v20 = vld [vmem:[%s7714_s1 + $0x60] sm:$0xff]  ;;  %v42_v21 = vld [vmem:[%s7714_s1 + $0x68] sm:$0xff]  ;;  %v901_v23 = vrot.slane %v15_v18, %v5105_v10  ;;  %v894_v24 = vcombine.high %v15_v18, %v15_v18  ;;  %v4097_v25 = vpack.c.bf16 %v90_v15, %v89_v14  ;;  %v60_v28 = vld [vmem:[%s7714_s1 + $0xf8] sm:$0xff] }
  0x14   :  { %4090 = vmatprep.subr.bf16.mxu1 %v4089_v61  ;;  %v73_v22 = vld [vmem:[%s7714_s1 + $0x160] sm:$0xff]  ;;  %v74_v26 = vld [vmem:[%s7714_s1 + $0x168] sm:$0xff]  ;;  %v91_v29 = vld [vmem:[%s7714_s1 + $0x1f0] sm:$0xff]  ;;  %v4067_v33 = vpack.c.bf16 %v42_v21, %v41_v20  ;;  %v4069_v35 = vpack.c.bf16 %v60_v28, %v59_v27 }
  0x15   :  { %4060 = vmatpush3.bf16.msra.mxu0 %v4059_v3  ;;  %v92_v30 = vld [vmem:[%s7714_s1 + $0x1f8] sm:$0xff]  ;;  %v909_v31 = vcombine.high %v901_v23, %v901_v23  ;;  %v908_v32 = vrot.slane %v894_v24, %v5105_v10  ;;  %v4099_v34 = vpack.c.bf16 %v74_v26, %v73_v22  ;;  %v43_v36 = vld [vmem:[%s7714_s1 + $0x70] sm:$0xff]  ;;  %v109_v42 = vld [vmem:[%s7714_s1 + $0x280] sm:$0xff] }
  0x16   :  { %4062 = vmatprep.subr.bf16.mxu0 %v4061_v6  ;;  %v44_v37 = vld [vmem:[%s7714_s1 + $0x78] sm:$0xff]  ;;  %v75_v38 = vld [vmem:[%s7714_s1 + $0x170] sm:$0xff]  ;;  %v4101_v40 = vpack.c.bf16 %v92_v30, %v91_v29  ;;  %v110_v43 = vld [vmem:[%s7714_s1 + $0x288] sm:$0xff] }
  0x17   :  { %4092 = vmatpush3.bf16.msra.mxu1 %v4091_v5  ;;  %v910_v39 = vcombine.high %v908_v32, %v908_v32  ;;  %1245 = vmatprep.mubr.f32.mxu0 %v909_v31  ;;  %v76_v41 = vld [vmem:[%s7714_s1 + $0x178] sm:$0xff]  ;;  %v141_v44 = vld [vmem:[%s7714_s1 + $0x380] sm:$0xff]  ;;  %v142_v45 = vld [vmem:[%s7714_s1 + $0x388] sm:$0xff]  ;;  %v4071_v46 = vpack.c.bf16 %v44_v37, %v43_v36  ;;  %v4105_v48 = vpack.c.bf16 %v110_v43, %v109_v42 }
  0x18   :  { %4094 = vmatprep.subr.bf16.mxu1 %v4093_v11  ;;  %v4103_v47 = vpack.c.bf16 %v76_v41, %v75_v38  ;;  %v93_v49 = vld [vmem:[%s7714_s1 + $0x200] sm:$0xff]  ;;  %v94_v50 = vld [vmem:[%s7714_s1 + $0x208] sm:$0xff]  ;;  %v4137_v52 = vpack.c.bf16 %v142_v45, %v141_v44  ;;  %v111_v54 = vld [vmem:[%s7714_s1 + $0x290] sm:$0xff] }
  0x19   :  { %4064 = vmatpush3.bf16.msra.mxu0 %v4063_v16  ;;  %1315 = vmatprep.mubr.f32.mxu1 %v910_v39  ;;  %v125_v51 = vld [vmem:[%s7714_s1 + $0x300] sm:$0xff]  ;;  %v126_v53 = vld [vmem:[%s7714_s1 + $0x308] sm:$0xff]  ;;  %v112_v55 = vld [vmem:[%s7714_s1 + $0x298] sm:$0xff]  ;;  %v4107_v58 = vpack.c.bf16 %v94_v50, %v93_v49 }
  0x1a   :  { %4066 = vmatprep.subr.bf16.mxu0 %v4065_v19  ;;  %v143_v56 = vld [vmem:[%s7714_s1 + $0x390] sm:$0xff]  ;;  %v144_v57 = vld [vmem:[%s7714_s1 + $0x398] sm:$0xff]  ;;  %v4139_v59 = vpack.c.bf16 %v126_v53, %v125_v51  ;;  %v4109_v60 = vpack.c.bf16 %v112_v55, %v111_v54  ;;  %v113_v2 = vld [vmem:[%s7714_s1 + $0x2a0] sm:$0xff] }
  0x1b   :  { %4096 = vmatpush3.bf16.msra.mxu1 %v4095_v17  ;;  %v95_v61 = vld [vmem:[%s7714_s1 + $0x210] sm:$0xff]  ;;  %v96_v62 = vld [vmem:[%s7714_s1 + $0x218] sm:$0xff]  ;;  %v4141_v0 = vpack.c.bf16 %v144_v57, %v143_v56  ;;  %v114_v3 = vld [vmem:[%s7714_s1 + $0x2a8] sm:$0xff] }
  0x1c   :  { %4098 = vmatprep.subr.bf16.mxu1 %v4097_v25  ;;  %v127_v63 = vld [vmem:[%s7714_s1 + $0x310] sm:$0xff]  ;;  %v128_v1 = vld [vmem:[%s7714_s1 + $0x318] sm:$0xff]  ;;  %v145_v4 = vld [vmem:[%s7714_s1 + $0x3a0] sm:$0xff]  ;;  %v4111_v6 = vpack.c.bf16 %v96_v62, %v95_v61  ;;  %v4113_v8 = vpack.c.bf16 %v114_v3, %v113_v2 }
  0x1d   :  { %4068 = vmatpush3.bf16.msra.mxu0 %v4067_v33  ;;  %v146_v5 = vld [vmem:[%s7714_s1 + $0x3a8] sm:$0xff]  ;;  %v4143_v7 = vpack.c.bf16 %v128_v1, %v127_v63  ;;  %v97_v9 = vld [vmem:[%s7714_s1 + $0x220] sm:$0xff]  ;;  %v115_v15 = vld [vmem:[%s7714_s1 + $0x2b0] sm:$0xff] }
  0x1e   :  { %4070 = vmatprep.subr.bf16.mxu0 %v4069_v35  ;;  %v98_v11 = vld [vmem:[%s7714_s1 + $0x228] sm:$0xff]  ;;  %v129_v12 = vld [vmem:[%s7714_s1 + $0x320] sm:$0xff]  ;;  %v4145_v13 = vpack.c.bf16 %v146_v5, %v145_v4  ;;  %v116_v16 = vld [vmem:[%s7714_s1 + $0x2b8] sm:$0xff] }
  0x1f   :  { %4100 = vmatpush3.bf16.msra.mxu1 %v4099_v34  ;;  %v130_v14 = vld [vmem:[%s7714_s1 + $0x328] sm:$0xff]  ;;  %v147_v17 = vld [vmem:[%s7714_s1 + $0x3b0] sm:$0xff]  ;;  %v148_v18 = vld [vmem:[%s7714_s1 + $0x3b8] sm:$0xff]  ;;  %v4115_v19 = vpack.c.bf16 %v98_v11, %v97_v9  ;;  %v4117_v22 = vpack.c.bf16 %v116_v16, %v115_v15 }
  0x20   :  { %4102 = vmatprep.subr.bf16.mxu1 %v4101_v40  ;;  %v99_v20 = vld [vmem:[%s7714_s1 + $0x230] sm:$0xff]  ;;  %v4147_v21 = vpack.c.bf16 %v130_v14, %v129_v12  ;;  %v132_v25 = vld [vmem:[%s7714_s1 + $0x338] sm:$0xff]  ;;  %v4149_v26 = vpack.c.bf16 %v148_v18, %v147_v17  ;;  %v117_v27 = vld [vmem:[%s7714_s1 + $0x2c0] sm:$0xff] }
  0x21   :  { %4072 = vmatpush3.bf16.msra.mxu0 %v4071_v46  ;;  %v131_v24 = vld [vmem:[%s7714_s1 + $0x330] sm:$0xff]  ;;  %v118_v28 = vld [vmem:[%s7714_s1 + $0x2c8] sm:$0xff]  ;;  %v149_v30 = vld [vmem:[%s7714_s1 + $0x3c0] sm:$0xff] }
  0x22   :  { %4106 = vmatprep.subr.bf16.mxu0 %v4105_v48  ;;  %v16_v29 = vld [vmem:[%s7713_s0 + $0x8] sm:$0xff]  ;;  %v4151_v35 = vpack.c.bf16 %v132_v25, %v131_v24  ;;  %v4121_v36 = vpack.c.bf16 %v118_v28, %v117_v27  ;;  %v101_v37 = vld [vmem:[%s7714_s1 + $0x240] sm:$0xff]  ;;  %v119_v44 = vld [vmem:[%s7714_s1 + $0x2d0] sm:$0xff] }
  0x23   :  { %4104 = vmatpush3.bf16.msra.mxu1 %v4103_v47  ;;  %v150_v31 = vld [vmem:[%s7714_s1 + $0x3c8] sm:$0xff]  ;;  %v911_v33 = vcombine.high %v16_v29, %v16_v29  ;;  %v133_v39 = vld [vmem:[%s7714_s1 + $0x340] sm:$0xff]  ;;  %v120_v45 = vld [vmem:[%s7714_s1 + $0x2d8] sm:$0xff] }
  0x24   :  { %4138 = vmatprep.subr.bf16.mxu1 %v4137_v52  ;;  %1246 = vmatmul.mubr.f32.vlgmr.msra.gmra.mrb[0].mxu0 %v901_v23  ;;  %v100_v23 = vld [vmem:[%s7714_s1 + $0x238] sm:$0xff]  ;;  %v102_v38 = vld [vmem:[%s7714_s1 + $0x248] sm:$0xff]  ;;  %v4153_v42 = vpack.c.bf16 %v150_v31, %v149_v30  ;;  %v151_v46 = vld [vmem:[%s7714_s1 + $0x3d0] sm:$0xff]  ;;  %v4125_v51 = vpack.c.bf16 %v120_v45, %v119_v44 }
  0x25   :  { %4108 = vmatpush3.bf16.msra.mxu0 %v4107_v58  ;;  %v4119_v34 = vpack.c.bf16 %v100_v23, %v99_v20  ;;  %v5286_v41 = vrot.slane %v911_v33, %v5105_v10  ;;  %v134_v43 = vld [vmem:[%s7714_s1 + $0x348] sm:$0xff]  ;;  %v152_v47 = vld [vmem:[%s7714_s1 + $0x3d8] sm:$0xff]  ;;  %v4123_v49 = vpack.c.bf16 %v102_v38, %v101_v37  ;;  %v103_v52 = vld [vmem:[%s7714_s1 + $0x250] sm:$0xff] }
  0x26   :  { %1316 = vmatmul.mubr.f32.vlgmr.msra.gmra.mrb[0].mxu1 %v908_v32  ;;  %4110 = vmatprep.subr.bf16.mxu0 %v4109_v60  ;;  %v5272_v32 = vrot.slane %v16_v29, %v5105_v10  ;;  %v4155_v50 = vpack.c.bf16 %v134_v43, %v133_v39  ;;  %v104_v53 = vld [vmem:[%s7714_s1 + $0x258] sm:$0xff]  ;;  %v135_v54 = vld [vmem:[%s7714_s1 + $0x350] sm:$0xff]  ;;  %v4157_v55 = vpack.c.bf16 %v152_v47, %v151_v46  ;;  %v121_v57 = vld [vmem:[%s7714_s1 + $0x2e0] sm:$0xff] }
  0x27   :  { %4140 = vmatpush3.bf16.msra.mxu1 %v4139_v59  ;;  %v927_v48 = vcombine.high %v5286_v41, %v5286_v41  ;;  %v136_v56 = vld [vmem:[%s7714_s1 + $0x358] sm:$0xff]  ;;  %v122_v58 = vld [vmem:[%s7714_s1 + $0x2e8] sm:$0xff]  ;;  %v153_v59 = vld [vmem:[%s7714_s1 + $0x3e0] sm:$0xff]  ;;  %v4127_v61 = vpack.c.bf16 %v104_v53, %v103_v52 }
  0x28   :  { %4142 = vmatprep.subr.bf16.mxu1 %v4141_v0  ;;  %v926_v40 = vcombine.high %v5272_v32, %v5272_v32  ;;  %v154_v60 = vld [vmem:[%s7714_s1 + $0x3e8] sm:$0xff]  ;;  %v4159_v62 = vpack.c.bf16 %v136_v56, %v135_v54  ;;  %v4129_v63 = vpack.c.bf16 %v122_v58, %v121_v57  ;;  %v105_v0 = vld [vmem:[%s7714_s1 + $0x260] sm:$0xff]  ;;  %v123_v5 = vld [vmem:[%s7714_s1 + $0x2f0] sm:$0xff] }
  0x29   :  { %4112 = vmatpush3.bf16.msra.mxu0 %v4111_v6  ;;  %1455 = vmatprep.mubr.f32.mxu1 %v927_v48  ;;  %v106_v1 = vld [vmem:[%s7714_s1 + $0x268] sm:$0xff]  ;;  %v137_v2 = vld [vmem:[%s7714_s1 + $0x360] sm:$0xff]  ;;  %v4161_v3 = vpack.c.bf16 %v154_v60, %v153_v59  ;;  %v124_v6 = vld [vmem:[%s7714_s1 + $0x2f8] sm:$0xff] }
  0x2a   :  { %4114 = vmatprep.subr.bf16.mxu0 %v4113_v8  ;;  %1385 = vmatprep.mubr.f32.mxu0 %v926_v40  ;;  %v138_v4 = vld [vmem:[%s7714_s1 + $0x368] sm:$0xff]  ;;  %v156_v8 = vld [vmem:[%s7714_s1 + $0x3f8] sm:$0xff]  ;;  %v4131_v9 = vpack.c.bf16 %v106_v1, %v105_v0  ;;  %v4133_v12 = vpack.c.bf16 %v124_v6, %v123_v5  ;;  %v139_v15 = vld [vmem:[%s7714_s1 + $0x370] sm:$0xff] }
  0x2b   :  { %4144 = vmatpush3.bf16.msra.mxu1 %v4143_v7  ;;  %v155_v7 = vld [vmem:[%s7714_s1 + $0x3f0] sm:$0xff]  ;;  %v4163_v11 = vpack.c.bf16 %v138_v4, %v137_v2  ;;  %v108_v14 = vld [vmem:[%s7714_s1 + $0x278] sm:$0xff]  ;;  %v173_v18 = vld [vmem:[%s7714_s1 + $0x480] sm:$0xff] }
  0x2c   :  { %4146 = vmatprep.subr.bf16.mxu1 %v4145_v13  ;;  %v107_v13 = vld [vmem:[%s7714_s1 + $0x270] sm:$0xff]  ;;  %v4165_v16 = vpack.c.bf16 %v156_v8, %v155_v7  ;;  %v140_v17 = vld [vmem:[%s7714_s1 + $0x378] sm:$0xff]  ;;  %v205_v20 = vld [vmem:[%s7714_s1 + $0x580] sm:$0xff] }
  0x2d   :  { %4116 = vmatpush3.bf16.msra.mxu0 %v4115_v19  ;;  %v174_v19 = vld [vmem:[%s7714_s1 + $0x488] sm:$0xff]  ;;  %v157_v23 = vld [vmem:[%s7714_s1 + $0x400] sm:$0xff]  ;;  %v4167_v24 = vpack.c.bf16 %v140_v17, %v139_v15  ;;  %v175_v30 = vld [vmem:[%s7714_s1 + $0x490] sm:$0xff] }
  0x2e   :  { %4118 = vmatprep.subr.bf16.mxu0 %v4117_v22  ;;  %v4135_v22 = vpack.c.bf16 %v108_v14, %v107_v13  ;;  %v4169_v25 = vpack.c.bf16 %v174_v19, %v173_v18  ;;  %v189_v27 = vld [vmem:[%s7714_s1 + $0x500] sm:$0xff]  ;;  %v190_v28 = vld [vmem:[%s7714_s1 + $0x508] sm:$0xff]  ;;  %v176_v31 = vld [vmem:[%s7714_s1 + $0x498] sm:$0xff] }
  0x2f   :  { %4148 = vmatpush3.bf16.msra.mxu1 %v4147_v21  ;;  %v206_v21 = vld [vmem:[%s7714_s1 + $0x588] sm:$0xff]  ;;  %v207_v33 = vld [vmem:[%s7714_s1 + $0x590] sm:$0xff]  ;;  %v4173_v38 = vpack.c.bf16 %v176_v31, %v175_v30  ;;  %v160_v40 = vld [vmem:[%s7714_s1 + $0x418] sm:$0xff] }
  0x30   :  { %4150 = vmatprep.subr.bf16.mxu1 %v4149_v26  ;;  %v158_v26 = vld [vmem:[%s7714_s1 + $0x408] sm:$0xff]  ;;  %v4201_v29 = vpack.c.bf16 %v206_v21, %v205_v20  ;;  %v17_v37 = vld [vmem:[%s7713_s0 + $0x10] sm:$0xff]  ;;  %v192_v46 = vld [vmem:[%s7714_s1 + $0x518] sm:$0xff] }
  0x31   :  { %4120 = vmatpush3.bf16.msra.mxu0 %v4119_v34  ;;  %v208_v34 = vld [vmem:[%s7714_s1 + $0x598] sm:$0xff]  ;;  %v159_v39 = vld [vmem:[%s7714_s1 + $0x410] sm:$0xff]  ;;  %v5414_v43 = vrot.slane %v17_v37, %v5105_v10  ;;  %v928_v44 = vcombine.high %v17_v37, %v17_v37  ;;  %v177_v47 = vld [vmem:[%s7714_s1 + $0x4a0] sm:$0xff] }
  0x32   :  { %4122 = vmatprep.subr.bf16.mxu0 %v4121_v36  ;;  %v4203_v36 = vpack.c.bf16 %v190_v28, %v189_v27  ;;  %v4205_v45 = vpack.c.bf16 %v208_v34, %v207_v33  ;;  %v178_v48 = vld [vmem:[%s7714_s1 + $0x4a8] sm:$0xff]  ;;  %v4175_v53 = vpack.c.bf16 %v160_v40, %v159_v39  ;;  %v193_v57 = vld [vmem:[%s7714_s1 + $0x520] sm:$0xff]  ;;  %v179_v60 = vld [vmem:[%s7714_s1 + $0x4b0] sm:$0xff] }
  0x33   :  { %4152 = vmatpush3.bf16.msra.mxu1 %v4151_v35  ;;  %v4171_v35 = vpack.c.bf16 %v158_v26, %v157_v23  ;;  %v5435_v52 = vrot.slane %v928_v44, %v5105_v10  ;;  %v4177_v54 = vpack.c.bf16 %v178_v48, %v177_v47  ;;  %v162_v56 = vld [vmem:[%s7714_s1 + $0x428] sm:$0xff]  ;;  %v164_v4 = vld [vmem:[%s7714_s1 + $0x438] sm:$0xff]  ;;  %v195_v5 = vld [vmem:[%s7714_s1 + $0x530] sm:$0xff] }
  0x34   :  { %4154 = vmatprep.subr.bf16.mxu1 %v4153_v42  ;;  %v191_v42 = vld [vmem:[%s7714_s1 + $0x510] sm:$0xff]  ;;  %v194_v59 = vld [vmem:[%s7714_s1 + $0x528] sm:$0xff]  ;;  %v196_v7 = vld [vmem:[%s7714_s1 + $0x538] sm:$0xff] }
  0x35   :  { %4124 = vmatpush3.bf16.msra.mxu0 %v4123_v49  ;;  %v209_v49 = vld [vmem:[%s7714_s1 + $0x5a0] sm:$0xff]  ;;  %v4211_v1 = vpack.c.bf16 %v194_v59, %v193_v57  ;;  %v4215_v14 = vpack.c.bf16 %v196_v7, %v195_v5  ;;  %v166_v17 = vld [vmem:[%s7714_s1 + $0x448] sm:$0xff]  ;;  %v183_v21 = vld [vmem:[%s7714_s1 + $0x4d0] sm:$0xff] }
  0x36   :  { %4126 = vmatprep.subr.bf16.mxu0 %v4125_v51  ;;  %v943_v51 = vcombine.high %v5414_v43, %v5414_v43  ;;  %v181_v8 = vld [vmem:[%s7714_s1 + $0x4c0] sm:$0xff]  ;;  %v198_v20 = vld [vmem:[%s7714_s1 + $0x548] sm:$0xff]  ;;  %v215_v23 = vld [vmem:[%s7714_s1 + $0x5d0] sm:$0xff] }
  0x37   :  { %4156 = vmatpush3.bf16.msra.mxu1 %v4155_v50  ;;  %v210_v50 = vld [vmem:[%s7714_s1 + $0x5a8] sm:$0xff]  ;;  %v197_v18 = vld [vmem:[%s7714_s1 + $0x540] sm:$0xff]  ;;  %v167_v28 = vld [vmem:[%s7714_s1 + $0x450] sm:$0xff] }
  0x38   :  { %4158 = vmatprep.subr.bf16.mxu1 %v4157_v55  ;;  %v161_v55 = vld [vmem:[%s7714_s1 + $0x420] sm:$0xff]  ;;  %v4209_v58 = vpack.c.bf16 %v210_v50, %v209_v49  ;;  %v4219_v26 = vpack.c.bf16 %v198_v20, %v197_v18  ;;  %v199_v30 = vld [vmem:[%s7714_s1 + $0x550] sm:$0xff]  ;;  %v200_v33 = vld [vmem:[%s7714_s1 + $0x558] sm:$0xff] }
  0x39   :  { %4128 = vmatpush3.bf16.msra.mxu0 %v4127_v61  ;;  %v180_v61 = vld [vmem:[%s7714_s1 + $0x4b8] sm:$0xff]  ;;  %v4179_v0 = vpack.c.bf16 %v162_v56, %v161_v55  ;;  %v185_v34 = vld [vmem:[%s7714_s1 + $0x4e0] sm:$0xff]  ;;  %v218_v37 = vld [vmem:[%s7714_s1 + $0x5e8] sm:$0xff]  ;;  %v4223_v39 = vpack.c.bf16 %v200_v33, %v199_v30 }
  0x3a   :  { %4130 = vmatprep.subr.bf16.mxu0 %v4129_v63  ;;  %v212_v63 = vld [vmem:[%s7714_s1 + $0x5b8] sm:$0xff]  ;;  %v4181_v2 = vpack.c.bf16 %v180_v61, %v179_v60  ;;  %v170_v44 = vld [vmem:[%s7714_s1 + $0x468] sm:$0xff]  ;;  %v187_v48 = vld [vmem:[%s7714_s1 + $0x4f0] sm:$0xff] }
  0x3b   :  { %4160 = vmatpush3.bf16.msra.mxu1 %v4159_v62  ;;  %v211_v62 = vld [vmem:[%s7714_s1 + $0x5b0] sm:$0xff]  ;;  %v202_v47 = vld [vmem:[%s7714_s1 + $0x568] sm:$0xff]  ;;  %v188_v49 = vld [vmem:[%s7714_s1 + $0x4f8] sm:$0xff] }
  0x3c   :  { %4162 = vmatprep.subr.bf16.mxu1 %v4161_v3  ;;  %v163_v3 = vld [vmem:[%s7714_s1 + $0x430] sm:$0xff]  ;;  %v4213_v6 = vpack.c.bf16 %v212_v63, %v211_v62  ;;  %v4197_v55 = vpack.c.bf16 %v188_v49, %v187_v48  ;;  %v172_v57 = vld [vmem:[%s7714_s1 + $0x478] sm:$0xff]  ;;  %v237_v60 = vld [vmem:[%s7714_s1 + $0x680] sm:$0xff] }
  0x3d   :  { %4132 = vmatpush3.bf16.msra.mxu0 %v4131_v9  ;;  %v182_v9 = vld [vmem:[%s7714_s1 + $0x4c8] sm:$0xff]  ;;  %v4183_v13 = vpack.c.bf16 %v164_v4, %v163_v3  ;;  %v219_v50 = vld [vmem:[%s7714_s1 + $0x5f0] sm:$0xff]  ;;  %v204_v59 = vld [vmem:[%s7714_s1 + $0x578] sm:$0xff] }
  0x3e   :  { %4134 = vmatprep.subr.bf16.mxu0 %v4133_v12  ;;  %v214_v12 = vld [vmem:[%s7714_s1 + $0x5c8] sm:$0xff]  ;;  %v4185_v15 = vpack.c.bf16 %v182_v9, %v181_v8  ;;  %v171_v56 = vld [vmem:[%s7714_s1 + $0x470] sm:$0xff]  ;;  %v269_v62 = vld [vmem:[%s7714_s1 + $0x780] sm:$0xff] }
  0x3f   :  { %4164 = vmatpush3.bf16.msra.mxu1 %v4163_v11  ;;  %v213_v11 = vld [vmem:[%s7714_s1 + $0x5c0] sm:$0xff]  ;;  %v238_v61 = vld [vmem:[%s7714_s1 + $0x688] sm:$0xff]  ;;  %v239_v9 = vld [vmem:[%s7714_s1 + $0x690] sm:$0xff] }
  0x40   :  { %4166 = vmatprep.subr.bf16.mxu1 %v4165_v16  ;;  %v165_v16 = vld [vmem:[%s7714_s1 + $0x440] sm:$0xff]  ;;  %v4217_v19 = vpack.c.bf16 %v214_v12, %v213_v11  ;;  %v270_v63 = vld [vmem:[%s7714_s1 + $0x788] sm:$0xff]  ;;  %v4233_v3 = vpack.c.bf16 %v238_v61, %v237_v60  ;;  %v240_v11 = vld [vmem:[%s7714_s1 + $0x698] sm:$0xff] }
  0x41   :  { %4136 = vmatpush3.bf16.msra.mxu0 %v4135_v22  ;;  %v184_v22 = vld [vmem:[%s7714_s1 + $0x4d8] sm:$0xff]  ;;  %v221_v4 = vld [vmem:[%s7714_s1 + $0x600] sm:$0xff]  ;;  %v222_v5 = vld [vmem:[%s7714_s1 + $0x608] sm:$0xff]  ;;  %v4265_v7 = vpack.c.bf16 %v270_v63, %v269_v62  ;;  %v4237_v18 = vpack.c.bf16 %v240_v11, %v239_v9 }
  0x42   :  { %4170 = vmatprep.subr.bf16.mxu0 %v4169_v25  ;;  %v4187_v25 = vpack.c.bf16 %v166_v17, %v165_v16  ;;  %v4189_v27 = vpack.c.bf16 %v184_v22, %v183_v21  ;;  %v254_v8 = vld [vmem:[%s7714_s1 + $0x708] sm:$0xff]  ;;  %v4235_v16 = vpack.c.bf16 %v222_v5, %v221_v4  ;;  %v224_v20 = vld [vmem:[%s7714_s1 + $0x618] sm:$0xff]  ;;  %v255_v21 = vld [vmem:[%s7714_s1 + $0x710] sm:$0xff] }
  0x43   :  { %4168 = vmatpush3.bf16.msra.mxu1 %v4167_v24  ;;  %v216_v24 = vld [vmem:[%s7714_s1 + $0x5d8] sm:$0xff]  ;;  %v259_v48 = vld [vmem:[%s7714_s1 + $0x730] sm:$0xff]  ;;  %v262_v61 = vld [vmem:[%s7714_s1 + $0x748] sm:$0xff] }
  0x44   :  { %4202 = vmatprep.subr.bf16.mxu1 %v4201_v29  ;;  %1386 = vmatmul.mubr.f32.vlgmr.msra.gmra.mrb[2].mxu0 %v5272_v32  ;;  %v4207_v32 = vpack.c.bf16 %v192_v46, %v191_v42  ;;  %v168_v29 = vld [vmem:[%s7714_s1 + $0x458] sm:$0xff]  ;;  %v4221_v31 = vpack.c.bf16 %v216_v24, %v215_v23  ;;  %v169_v42 = vld [vmem:[%s7714_s1 + $0x460] sm:$0xff]  ;;  %v247_v62 = vld [vmem:[%s7714_s1 + $0x6d0] sm:$0xff] }
  0x45   :  { %4172 = vmatpush3.bf16.msra.mxu0 %v4171_v35  ;;  %1525 = vmatprep.mubr.f32.mxu0 %v943_v51  ;;  %v186_v35 = vld [vmem:[%s7714_s1 + $0x4e8] sm:$0xff]  ;;  %v220_v51 = vld [vmem:[%s7714_s1 + $0x5f8] sm:$0xff]  ;;  %v241_v24 = vld [vmem:[%s7714_s1 + $0x6a0] sm:$0xff] }
  0x46   :  { %1456 = vmatmul.mubr.f32.vlgmr.msra.gmra.mrb[2].mxu1 %v5286_v41  ;;  %4174 = vmatprep.subr.bf16.mxu0 %v4173_v38  ;;  %v944_v41 = vcombine.high %v5435_v52, %v5435_v52  ;;  %v4191_v38 = vpack.c.bf16 %v168_v29, %v167_v28  ;;  %v4193_v40 = vpack.c.bf16 %v186_v35, %v185_v34  ;;  %v256_v23 = vld [vmem:[%s7714_s1 + $0x718] sm:$0xff]  ;;  %v274_v28 = vld [vmem:[%s7714_s1 + $0x7a8] sm:$0xff]  ;;  %v257_v35 = vld [vmem:[%s7714_s1 + $0x720] sm:$0xff] }
  0x47   :  { %4204 = vmatpush3.bf16.msra.mxu1 %v4203_v36  ;;  %v217_v36 = vld [vmem:[%s7714_s1 + $0x5e0] sm:$0xff]  ;;  %v226_v34 = vld [vmem:[%s7714_s1 + $0x628] sm:$0xff]  ;;  %v248_v63 = vld [vmem:[%s7714_s1 + $0x6d8] sm:$0xff] }
  0x48   :  { %4206 = vmatprep.subr.bf16.mxu1 %v4205_v45  ;;  %1595 = vmatprep.mubr.f32.mxu1 %v944_v41  ;;  %v201_v45 = vld [vmem:[%s7714_s1 + $0x560] sm:$0xff]  ;;  %v4225_v46 = vpack.c.bf16 %v218_v37, %v217_v36  ;;  %v203_v41 = vld [vmem:[%s7714_s1 + $0x570] sm:$0xff]  ;;  %v4253_v4 = vpack.c.bf16 %v248_v63, %v247_v62  ;;  %v264_v9 = vld [vmem:[%s7714_s1 + $0x758] sm:$0xff] }
  0x49   :  { %4176 = vmatpush3.bf16.msra.mxu0 %v4175_v53  ;;  %v4195_v53 = vpack.c.bf16 %v170_v44, %v169_v42  ;;  %v243_v37 = vld [vmem:[%s7714_s1 + $0x6b0] sm:$0xff]  ;;  %v249_v11 = vld [vmem:[%s7714_s1 + $0x6e0] sm:$0xff] }
  0x4a   :  { %4178 = vmatprep.subr.bf16.mxu0 %v4177_v54  ;;  %v4227_v54 = vpack.c.bf16 %v202_v47, %v201_v45  ;;  %v228_v47 = vld [vmem:[%s7714_s1 + $0x638] sm:$0xff]  ;;  %v231_v5 = vld [vmem:[%s7714_s1 + $0x650] sm:$0xff] }
  0x4b   :  { %4208 = vmatpush3.bf16.msra.mxu1 %v4207_v32  ;;  %v18_v32 = vld [vmem:[%s7713_s0 + $0x18] sm:$0xff]  ;;  %v319_v62 = vld [vmem:[%s7714_s1 + $0x910] sm:$0xff] }
  0x4c   :  { %4210 = vmatprep.subr.bf16.mxu1 %v4209_v58  ;;  %v4229_v58 = vpack.c.bf16 %v220_v51, %v219_v50  ;;  %v5606_v12 = vrot.slane %v18_v32, %v5105_v10  ;;  %v260_v50 = vld [vmem:[%s7714_s1 + $0x738] sm:$0xff]  ;;  %v245_v51 = vld [vmem:[%s7714_s1 + $0x6c0] sm:$0xff] }
  0x4d   :  { %4180 = vmatpush3.bf16.msra.mxu0 %v4179_v0  ;;  %v945_v0 = vcombine.high %v18_v32, %v18_v32  ;;  %v277_v32 = vld [vmem:[%s7714_s1 + $0x7c0] sm:$0xff] }
  0x4e   :  { %4182 = vmatprep.subr.bf16.mxu0 %v4181_v2  ;;  %v4231_v2 = vpack.c.bf16 %v204_v59, %v203_v41  ;;  %v229_v41 = vld [vmem:[%s7714_s1 + $0x640] sm:$0xff] }
  0x4f   :  { %4212 = vmatpush3.bf16.msra.mxu1 %v4211_v1  ;;  %v4199_v1 = vpack.c.bf16 %v172_v57, %v171_v56  ;;  %v4279_v56 = vpack.c.bf16 %v260_v50, %v259_v48  ;;  %v261_v59 = vld [vmem:[%s7714_s1 + $0x740] sm:$0xff]  ;;  %v286_v48 = vld [vmem:[%s7714_s1 + $0x808] sm:$0xff] }
  0x50   :  { %4214 = vmatprep.subr.bf16.mxu1 %v4213_v6  ;;  %v253_v6 = vld [vmem:[%s7714_s1 + $0x700] sm:$0xff] }
  0x51   :  { %4184 = vmatpush3.bf16.msra.mxu0 %v4183_v13  ;;  %v271_v13 = vld [vmem:[%s7714_s1 + $0x790] sm:$0xff]  ;;  %v4267_v17 = vpack.c.bf16 %v254_v8, %v253_v6  ;;  %v232_v6 = vld [vmem:[%s7714_s1 + $0x658] sm:$0xff] }
  0x52   :  { %4186 = vmatprep.subr.bf16.mxu0 %v4185_v15  ;;  %v5615_v15 = vrot.slane %v945_v0, %v5105_v10  ;;  %v279_v0 = vld [vmem:[%s7714_s1 + $0x7d0] sm:$0xff] }
  0x53   :  { %4216 = vmatpush3.bf16.msra.mxu1 %v4215_v14  ;;  %v272_v14 = vld [vmem:[%s7714_s1 + $0x798] sm:$0xff] }
  0x54   :  { %4218 = vmatprep.subr.bf16.mxu1 %v4217_v19  ;;  %v223_v19 = vld [vmem:[%s7714_s1 + $0x610] sm:$0xff]  ;;  %v4269_v22 = vpack.c.bf16 %v272_v14, %v271_v13  ;;  %v961_v29 = vcombine.high %v5615_v15, %v5615_v15  ;;  %v250_v13 = vld [vmem:[%s7714_s1 + $0x6e8] sm:$0xff]  ;;  %v281_v14 = vld [vmem:[%s7714_s1 + $0x7e0] sm:$0xff] }
  0x55   :  { %4188 = vmatpush3.bf16.msra.mxu0 %v4187_v25  ;;  %v242_v25 = vld [vmem:[%s7714_s1 + $0x6a8] sm:$0xff]  ;;  %v4239_v30 = vpack.c.bf16 %v224_v20, %v223_v19  ;;  %v4257_v19 = vpack.c.bf16 %v250_v13, %v249_v11  ;;  %v233_v20 = vld [vmem:[%s7714_s1 + $0x660] sm:$0xff] }
  0x56   :  { %4190 = vmatprep.subr.bf16.mxu0 %v4189_v27  ;;  %v273_v27 = vld [vmem:[%s7714_s1 + $0x7a0] sm:$0xff]  ;;  %v4241_v33 = vpack.c.bf16 %v242_v25, %v241_v24  ;;  %v266_v24 = vld [vmem:[%s7714_s1 + $0x768] sm:$0xff]  ;;  %v251_v25 = vld [vmem:[%s7714_s1 + $0x6f0] sm:$0xff] }
  0x57   :  { %4220 = vmatpush3.bf16.msra.mxu1 %v4219_v26  ;;  %v960_v26 = vcombine.high %v5606_v12, %v5606_v12  ;;  %v4273_v36 = vpack.c.bf16 %v274_v28, %v273_v27  ;;  %v283_v27 = vld [vmem:[%s7714_s1 + $0x7f0] sm:$0xff]  ;;  %v284_v28 = vld [vmem:[%s7714_s1 + $0x7f8] sm:$0xff]  ;;  %v290_v11 = vld [vmem:[%s7714_s1 + $0x828] sm:$0xff] }
  0x58   :  { %4222 = vmatprep.subr.bf16.mxu1 %v4221_v31  ;;  %v4271_v31 = vpack.c.bf16 %v256_v23, %v255_v21  ;;  %v234_v21 = vld [vmem:[%s7714_s1 + $0x668] sm:$0xff]  ;;  %v321_v13 = vld [vmem:[%s7714_s1 + $0x920] sm:$0xff] }
  0x59   :  { %4192 = vmatpush3.bf16.msra.mxu0 %v4191_v38  ;;  %v244_v38 = vld [vmem:[%s7714_s1 + $0x6b8] sm:$0xff] }
  0x5a   :  { %4194 = vmatprep.subr.bf16.mxu0 %v4193_v40  ;;  %v276_v40 = vld [vmem:[%s7714_s1 + $0x7b8] sm:$0xff]  ;;  %v4245_v45 = vpack.c.bf16 %v244_v38, %v243_v37  ;;  %v301_v37 = vld [vmem:[%s7714_s1 + $0x880] sm:$0xff]  ;;  %v302_v38 = vld [vmem:[%s7714_s1 + $0x888] sm:$0xff] }
  0x5b   :  { %4224 = vmatpush3.bf16.msra.mxu1 %v4223_v39  ;;  %v275_v39 = vld [vmem:[%s7714_s1 + $0x7b0] sm:$0xff] }
  0x5c   :  { %4226 = vmatprep.subr.bf16.mxu1 %v4225_v46  ;;  %v227_v46 = vld [vmem:[%s7714_s1 + $0x630] sm:$0xff]  ;;  %v4277_v49 = vpack.c.bf16 %v276_v40, %v275_v39  ;;  %v333_v39 = vld [vmem:[%s7714_s1 + $0x980] sm:$0xff]  ;;  %v334_v40 = vld [vmem:[%s7714_s1 + $0x988] sm:$0xff] }
  0x5d   :  { %4196 = vmatpush3.bf16.msra.mxu0 %v4195_v53  ;;  %v246_v53 = vld [vmem:[%s7714_s1 + $0x6c8] sm:$0xff]  ;;  %v4329_v50 = vpack.c.bf16 %v334_v40, %v333_v39  ;;  %v311_v39 = vld [vmem:[%s7714_s1 + $0x8d0] sm:$0xff]  ;;  %v312_v40 = vld [vmem:[%s7714_s1 + $0x8d8] sm:$0xff] }
  0x5e   :  { %4198 = vmatprep.subr.bf16.mxu0 %v4197_v55  ;;  %v4247_v55 = vpack.c.bf16 %v228_v47, %v227_v46  ;;  %v4249_v57 = vpack.c.bf16 %v246_v53, %v245_v51  ;;  %v4297_v46 = vpack.c.bf16 %v302_v38, %v301_v37  ;;  %v285_v47 = vld [vmem:[%s7714_s1 + $0x800] sm:$0xff]  ;;  %v318_v51 = vld [vmem:[%s7714_s1 + $0x908] sm:$0xff]  ;;  %v303_v53 = vld [vmem:[%s7714_s1 + $0x890] sm:$0xff] }
  0x5f   :  { %4228 = vmatpush3.bf16.msra.mxu1 %v4227_v54  ;;  %v278_v54 = vld [vmem:[%s7714_s1 + $0x7c8] sm:$0xff] }
  0x60   :  { %4230 = vmatprep.subr.bf16.mxu1 %v4229_v58  ;;  %v230_v58 = vld [vmem:[%s7714_s1 + $0x648] sm:$0xff]  ;;  %v4281_v60 = vpack.c.bf16 %v278_v54, %v277_v32  ;;  %v304_v32 = vld [vmem:[%s7714_s1 + $0x898] sm:$0xff] }
  0x61   :  { %4200 = vmatpush3.bf16.msra.mxu0 %v4199_v1  ;;  %v280_v1 = vld [vmem:[%s7714_s1 + $0x7d8] sm:$0xff]  ;;  %v326_v38 = vld [vmem:[%s7714_s1 + $0x948] sm:$0xff] }
  0x62   :  { %4234 = vmatprep.subr.bf16.mxu0 %v4233_v3  ;;  %v4283_v3 = vpack.c.bf16 %v262_v61, %v261_v59  ;;  %v4285_v8 = vpack.c.bf16 %v280_v1, %v279_v0  ;;  %v4301_v59 = vpack.c.bf16 %v304_v32, %v303_v53  ;;  %v288_v61 = vld [vmem:[%s7714_s1 + $0x818] sm:$0xff]  ;;  %v305_v1 = vld [vmem:[%s7714_s1 + $0x8a0] sm:$0xff] }
  0x63   :  { %4232 = vmatpush3.bf16.msra.mxu1 %v4231_v2  ;;  %v4251_v2 = vpack.c.bf16 %v230_v58, %v229_v41  ;;  %v4299_v41 = vpack.c.bf16 %v286_v48, %v285_v47  ;;  %v320_v0 = vld [vmem:[%s7714_s1 + $0x918] sm:$0xff]  ;;  %v4317_v47 = vpack.c.bf16 %v312_v40, %v311_v39  ;;  %v295_v48 = vld [vmem:[%s7714_s1 + $0x850] sm:$0xff]  ;;  %v313_v32 = vld [vmem:[%s7714_s1 + $0x8e0] sm:$0xff] }
  0x64   :  { %4266 = vmatprep.subr.bf16.mxu1 %v4265_v7  ;;  %1526 = vmatmul.mubr.f32.vlgmr.msra.gmra.mrb[4].mxu0 %v5414_v43  ;;  %v225_v43 = vld [vmem:[%s7714_s1 + $0x620] sm:$0xff]  ;;  %v263_v7 = vld [vmem:[%s7714_s1 + $0x750] sm:$0xff]  ;;  %v328_v53 = vld [vmem:[%s7714_s1 + $0x958] sm:$0xff] }
  0x65   :  { %4236 = vmatpush3.bf16.msra.mxu0 %v4235_v16  ;;  %1665 = vmatprep.mubr.f32.mxu0 %v960_v26  ;;  %v4243_v42 = vpack.c.bf16 %v226_v34, %v225_v43  ;;  %v282_v16 = vld [vmem:[%s7714_s1 + $0x7e8] sm:$0xff]  ;;  %v252_v26 = vld [vmem:[%s7714_s1 + $0x6f8] sm:$0xff]  ;;  %v235_v43 = vld [vmem:[%s7714_s1 + $0x670] sm:$0xff] }
  0x66   :  { %1596 = vmatmul.mubr.f32.vlgmr.msra.gmra.mrb[4].mxu1 %v5435_v52  ;;  %4238 = vmatprep.subr.bf16.mxu0 %v4237_v18  ;;  %v258_v52 = vld [vmem:[%s7714_s1 + $0x728] sm:$0xff]  ;;  %v4287_v18 = vpack.c.bf16 %v264_v9, %v263_v7  ;;  %v4289_v23 = vpack.c.bf16 %v282_v16, %v281_v14  ;;  %v236_v34 = vld [vmem:[%s7714_s1 + $0x678] sm:$0xff]  ;;  %v307_v16 = vld [vmem:[%s7714_s1 + $0x8b0] sm:$0xff] }
  0x67   :  { %4268 = vmatpush3.bf16.msra.mxu1 %v4267_v17  ;;  %1735 = vmatprep.mubr.f32.mxu1 %v961_v29  ;;  %v4275_v44 = vpack.c.bf16 %v258_v52, %v257_v35  ;;  %v4255_v17 = vpack.c.bf16 %v232_v6, %v231_v5  ;;  %v4259_v29 = vpack.c.bf16 %v234_v21, %v233_v20  ;;  %v267_v35 = vld [vmem:[%s7714_s1 + $0x770] sm:$0xff]  ;;  %v268_v52 = vld [vmem:[%s7714_s1 + $0x778] sm:$0xff]  ;;  %v338_v5 = vld [vmem:[%s7714_s1 + $0x9a8] sm:$0xff] }
  0x68   :  { %4270 = vmatprep.subr.bf16.mxu1 %v4269_v22  ;;  %v265_v22 = vld [vmem:[%s7714_s1 + $0x760] sm:$0xff]  ;;  %v383_v39 = vld [vmem:[%s7714_s1 + $0xb10] sm:$0xff] }
  0x69   :  { %4240 = vmatpush3.bf16.msra.mxu0 %v4239_v30  ;;  %v19_v30 = vld [vmem:[%s7713_s0 + $0x20] sm:$0xff] }
  0x6a   :  { %4242 = vmatprep.subr.bf16.mxu0 %v4241_v33  ;;  %v4261_v33 = vpack.c.bf16 %v252_v26, %v251_v25  ;;  %v5813_v54 = vrot.slane %v19_v30, %v5105_v10  ;;  %v323_v25 = vld [vmem:[%s7714_s1 + $0x930] sm:$0xff] }
  0x6b   :  { %4272 = vmatpush3.bf16.msra.mxu1 %v4271_v31  ;;  %v4291_v31 = vpack.c.bf16 %v266_v24, %v265_v22  ;;  %v292_v24 = vld [vmem:[%s7714_s1 + $0x838] sm:$0xff] }
  0x6c   :  { %4274 = vmatprep.subr.bf16.mxu1 %v4273_v36  ;;  %v4293_v36 = vpack.c.bf16 %v284_v28, %v283_v27  ;;  %v324_v27 = vld [vmem:[%s7714_s1 + $0x938] sm:$0xff]  ;;  %v309_v28 = vld [vmem:[%s7714_s1 + $0x8c0] sm:$0xff] }
  0x6d   :  { %4244 = vmatpush3.bf16.msra.mxu0 %v4243_v42  ;;  %v962_v42 = vcombine.high %v19_v30, %v19_v30  ;;  %v341_v30 = vld [vmem:[%s7714_s1 + $0x9c0] sm:$0xff] }
  0x6e   :  { %4246 = vmatprep.subr.bf16.mxu0 %v4245_v45  ;;  %v4295_v45 = vpack.c.bf16 %v268_v52, %v267_v35  ;;  %v293_v35 = vld [vmem:[%s7714_s1 + $0x840] sm:$0xff] }
  0x6f   :  { %4276 = vmatpush3.bf16.msra.mxu1 %v4275_v44  ;;  %v4263_v44 = vpack.c.bf16 %v236_v34, %v235_v43  ;;  %v4343_v43 = vpack.c.bf16 %v324_v27, %v323_v25  ;;  %v325_v52 = vld [vmem:[%s7714_s1 + $0x940] sm:$0xff]  ;;  %v350_v25 = vld [vmem:[%s7714_s1 + $0xa08] sm:$0xff] }
  0x70   :  { %4278 = vmatprep.subr.bf16.mxu1 %v4277_v49  ;;  %v317_v49 = vld [vmem:[%s7714_s1 + $0x900] sm:$0xff] }
  0x71   :  { %4248 = vmatpush3.bf16.msra.mxu0 %v4247_v55  ;;  %v335_v55 = vld [vmem:[%s7714_s1 + $0x990] sm:$0xff]  ;;  %v4331_v58 = vpack.c.bf16 %v318_v51, %v317_v49  ;;  %v296_v49 = vld [vmem:[%s7714_s1 + $0x858] sm:$0xff] }
  0x72   :  { %4250 = vmatprep.subr.bf16.mxu0 %v4249_v57  ;;  %v5822_v57 = vrot.slane %v962_v42, %v5105_v10  ;;  %v343_v42 = vld [vmem:[%s7714_s1 + $0x9d0] sm:$0xff] }
  0x73   :  { %4280 = vmatpush3.bf16.msra.mxu1 %v4279_v56  ;;  %v336_v56 = vld [vmem:[%s7714_s1 + $0x998] sm:$0xff] }
  0x74   :  { %4282 = vmatprep.subr.bf16.mxu1 %v4281_v60  ;;  %v287_v60 = vld [vmem:[%s7714_s1 + $0x810] sm:$0xff]  ;;  %v4333_v63 = vpack.c.bf16 %v336_v56, %v335_v55  ;;  %v978_v6 = vcombine.high %v5822_v57, %v5822_v57  ;;  %v314_v55 = vld [vmem:[%s7714_s1 + $0x8e8] sm:$0xff]  ;;  %v345_v56 = vld [vmem:[%s7714_s1 + $0x9e0] sm:$0xff] }
  0x75   :  { %4252 = vmatpush3.bf16.msra.mxu0 %v4251_v2  ;;  %v306_v2 = vld [vmem:[%s7714_s1 + $0x8a8] sm:$0xff]  ;;  %v4303_v7 = vpack.c.bf16 %v288_v61, %v287_v60  ;;  %v4321_v60 = vpack.c.bf16 %v314_v55, %v313_v32  ;;  %v297_v61 = vld [vmem:[%s7714_s1 + $0x860] sm:$0xff] }
  0x76   :  { %4254 = vmatprep.subr.bf16.mxu0 %v4253_v4  ;;  %v337_v4 = vld [vmem:[%s7714_s1 + $0x9a0] sm:$0xff]  ;;  %v4305_v9 = vpack.c.bf16 %v306_v2, %v305_v1  ;;  %v330_v1 = vld [vmem:[%s7714_s1 + $0x968] sm:$0xff]  ;;  %v315_v2 = vld [vmem:[%s7714_s1 + $0x8f0] sm:$0xff] }
  0x77   :  { %4284 = vmatpush3.bf16.msra.mxu1 %v4283_v3  ;;  %v977_v3 = vcombine.high %v5813_v54, %v5813_v54  ;;  %v4337_v14 = vpack.c.bf16 %v338_v5, %v337_v4  ;;  %v347_v4 = vld [vmem:[%s7714_s1 + $0x9f0] sm:$0xff]  ;;  %v348_v5 = vld [vmem:[%s7714_s1 + $0x9f8] sm:$0xff]  ;;  %v354_v32 = vld [vmem:[%s7714_s1 + $0xa28] sm:$0xff] }
  0x78   :  { %4286 = vmatprep.subr.bf16.mxu1 %v4285_v8  ;;  %v4335_v8 = vpack.c.bf16 %v320_v0, %v319_v62  ;;  %v298_v62 = vld [vmem:[%s7714_s1 + $0x868] sm:$0xff]  ;;  %v385_v55 = vld [vmem:[%s7714_s1 + $0xb20] sm:$0xff] }
  0x79   :  { %4256 = vmatpush3.bf16.msra.mxu0 %v4255_v17  ;;  %v308_v17 = vld [vmem:[%s7714_s1 + $0x8b8] sm:$0xff] }
  0x7a   :  { %4258 = vmatprep.subr.bf16.mxu0 %v4257_v19  ;;  %v340_v19 = vld [vmem:[%s7714_s1 + $0x9b8] sm:$0xff]  ;;  %v4309_v22 = vpack.c.bf16 %v308_v17, %v307_v16  ;;  %v365_v16 = vld [vmem:[%s7714_s1 + $0xa80] sm:$0xff]  ;;  %v366_v17 = vld [vmem:[%s7714_s1 + $0xa88] sm:$0xff] }
  0x7b   :  { %4288 = vmatpush3.bf16.msra.mxu1 %v4287_v18  ;;  %v339_v18 = vld [vmem:[%s7714_s1 + $0x9b0] sm:$0xff] }
  0x7c   :  { %4290 = vmatprep.subr.bf16.mxu1 %v4289_v23  ;;  %v291_v23 = vld [vmem:[%s7714_s1 + $0x830] sm:$0xff]  ;;  %v4341_v26 = vpack.c.bf16 %v340_v19, %v339_v18  ;;  %v397_v18 = vld [vmem:[%s7714_s1 + $0xb80] sm:$0xff]  ;;  %v398_v19 = vld [vmem:[%s7714_s1 + $0xb88] sm:$0xff] }
  0x7d   :  { %4260 = vmatpush3.bf16.msra.mxu0 %v4259_v29  ;;  %v310_v29 = vld [vmem:[%s7714_s1 + $0x8c8] sm:$0xff]  ;;  %v4393_v27 = vpack.c.bf16 %v398_v19, %v397_v18  ;;  %v375_v18 = vld [vmem:[%s7714_s1 + $0xad0] sm:$0xff]  ;;  %v376_v19 = vld [vmem:[%s7714_s1 + $0xad8] sm:$0xff] }
  0x7e   :  { %4262 = vmatprep.subr.bf16.mxu0 %v4261_v33  ;;  %v4311_v33 = vpack.c.bf16 %v292_v24, %v291_v23  ;;  %v4313_v34 = vpack.c.bf16 %v310_v29, %v309_v28  ;;  %v4361_v23 = vpack.c.bf16 %v366_v17, %v365_v16  ;;  %v349_v24 = vld [vmem:[%s7714_s1 + $0xa00] sm:$0xff]  ;;  %v382_v28 = vld [vmem:[%s7714_s1 + $0xb08] sm:$0xff]  ;;  %v367_v29 = vld [vmem:[%s7714_s1 + $0xa90] sm:$0xff] }
  0x7f   :  { %4292 = vmatpush3.bf16.msra.mxu1 %v4291_v31  ;;  %v342_v31 = vld [vmem:[%s7714_s1 + $0x9c8] sm:$0xff] }
  0x80   :  { %4294 = vmatprep.subr.bf16.mxu1 %v4293_v36  ;;  %v294_v36 = vld [vmem:[%s7714_s1 + $0x848] sm:$0xff]  ;;  %v4345_v37 = vpack.c.bf16 %v342_v31, %v341_v30  ;;  %v368_v30 = vld [vmem:[%s7714_s1 + $0xa98] sm:$0xff] }
  0x81   :  { %4264 = vmatpush3.bf16.msra.mxu0 %v4263_v44  ;;  %v344_v44 = vld [vmem:[%s7714_s1 + $0x9d8] sm:$0xff]  ;;  %v390_v17 = vld [vmem:[%s7714_s1 + $0xb48] sm:$0xff] }
  0x82   :  { %4298 = vmatprep.subr.bf16.mxu0 %v4297_v46  ;;  %v4347_v46 = vpack.c.bf16 %v326_v38, %v325_v52  ;;  %v4349_v51 = vpack.c.bf16 %v344_v44, %v343_v42  ;;  %v4365_v52 = vpack.c.bf16 %v368_v30, %v367_v29  ;;  %v352_v38 = vld [vmem:[%s7714_s1 + $0xa18] sm:$0xff]  ;;  %v369_v44 = vld [vmem:[%s7714_s1 + $0xaa0] sm:$0xff] }
  0x83   :  { %4296 = vmatpush3.bf16.msra.mxu1 %v4295_v45  ;;  %v4315_v45 = vpack.c.bf16 %v294_v36, %v293_v35  ;;  %v4363_v35 = vpack.c.bf16 %v350_v25, %v349_v24  ;;  %v384_v42 = vld [vmem:[%s7714_s1 + $0xb18] sm:$0xff]  ;;  %v4381_v24 = vpack.c.bf16 %v376_v19, %v375_v18  ;;  %v359_v25 = vld [vmem:[%s7714_s1 + $0xa50] sm:$0xff]  ;;  %v377_v30 = vld [vmem:[%s7714_s1 + $0xae0] sm:$0xff] }
  0x84   :  { %4330 = vmatprep.subr.bf16.mxu1 %v4329_v50  ;;  %1666 = vmatmul.mubr.f32.vlgmr.msra.gmra.mrb[6].mxu0 %v5606_v12  ;;  %v289_v12 = vld [vmem:[%s7714_s1 + $0x820] sm:$0xff]  ;;  %v327_v50 = vld [vmem:[%s7714_s1 + $0x950] sm:$0xff]  ;;  %v392_v29 = vld [vmem:[%s7714_s1 + $0xb58] sm:$0xff] }
  0x85   :  { %4300 = vmatpush3.bf16.msra.mxu0 %v4299_v41  ;;  %1805 = vmatprep.mubr.f32.mxu0 %v977_v3  ;;  %v4307_v20 = vpack.c.bf16 %v290_v11, %v289_v12  ;;  %v346_v41 = vld [vmem:[%s7714_s1 + $0x9e8] sm:$0xff]  ;;  %v316_v3 = vld [vmem:[%s7714_s1 + $0x8f8] sm:$0xff]  ;;  %v299_v12 = vld [vmem:[%s7714_s1 + $0x870] sm:$0xff] }
  0x86   :  { %1736 = vmatmul.mubr.f32.vlgmr.msra.gmra.mrb[6].mxu1 %v5615_v15  ;;  %4302 = vmatprep.subr.bf16.mxu0 %v4301_v59  ;;  %v322_v15 = vld [vmem:[%s7714_s1 + $0x928] sm:$0xff]  ;;  %v4351_v59 = vpack.c.bf16 %v328_v53, %v327_v50  ;;  %v4353_v0 = vpack.c.bf16 %v346_v41, %v345_v56  ;;  %v300_v11 = vld [vmem:[%s7714_s1 + $0x878] sm:$0xff]  ;;  %v371_v41 = vld [vmem:[%s7714_s1 + $0xab0] sm:$0xff] }
  0x87   :  { %4332 = vmatpush3.bf16.msra.mxu1 %v4331_v58  ;;  %1875 = vmatprep.mubr.f32.mxu1 %v978_v6  ;;  %v4339_v21 = vpack.c.bf16 %v322_v15, %v321_v13  ;;  %v4319_v58 = vpack.c.bf16 %v296_v49, %v295_v48  ;;  %v4323_v6 = vpack.c.bf16 %v298_v62, %v297_v61  ;;  %v331_v13 = vld [vmem:[%s7714_s1 + $0x970] sm:$0xff]  ;;  %v332_v15 = vld [vmem:[%s7714_s1 + $0x978] sm:$0xff]  ;;  %v402_v48 = vld [vmem:[%s7714_s1 + $0xba8] sm:$0xff] }
  0x88   :  { %4334 = vmatprep.subr.bf16.mxu1 %v4333_v63  ;;  %v329_v63 = vld [vmem:[%s7714_s1 + $0x960] sm:$0xff]  ;;  %v447_v18 = vld [vmem:[%s7714_s1 + $0xd10] sm:$0xff] }
  0x89   :  { %4304 = vmatpush3.bf16.msra.mxu0 %v4303_v7  ;;  %v20_v7 = vld [vmem:[%s7713_s0 + $0x28] sm:$0xff] }
  0x8a   :  { %4306 = vmatprep.subr.bf16.mxu0 %v4305_v9  ;;  %v4325_v9 = vpack.c.bf16 %v316_v3, %v315_v2  ;;  %v6020_v31 = vrot.slane %v20_v7, %v5105_v10  ;;  %v387_v2 = vld [vmem:[%s7714_s1 + $0xb30] sm:$0xff] }
  0x8b   :  { %4336 = vmatpush3.bf16.msra.mxu1 %v4335_v8  ;;  %v4355_v8 = vpack.c.bf16 %v330_v1, %v329_v63  ;;  %v356_v1 = vld [vmem:[%s7714_s1 + $0xa38] sm:$0xff] }
  0x8c   :  { %4338 = vmatprep.subr.bf16.mxu1 %v4337_v14  ;;  %v4357_v14 = vpack.c.bf16 %v348_v5, %v347_v4  ;;  %v388_v4 = vld [vmem:[%s7714_s1 + $0xb38] sm:$0xff]  ;;  %v373_v5 = vld [vmem:[%s7714_s1 + $0xac0] sm:$0xff] }
  0x8d   :  { %4308 = vmatpush3.bf16.msra.mxu0 %v4307_v20  ;;  %v979_v20 = vcombine.high %v20_v7, %v20_v7  ;;  %v405_v7 = vld [vmem:[%s7714_s1 + $0xbc0] sm:$0xff] }
  0x8e   :  { %4310 = vmatprep.subr.bf16.mxu0 %v4309_v22  ;;  %v4359_v22 = vpack.c.bf16 %v332_v15, %v331_v13  ;;  %v357_v13 = vld [vmem:[%s7714_s1 + $0xa40] sm:$0xff] }
  0x8f   :  { %4340 = vmatpush3.bf16.msra.mxu1 %v4339_v21  ;;  %v4327_v21 = vpack.c.bf16 %v300_v11, %v299_v12  ;;  %v4407_v12 = vpack.c.bf16 %v388_v4, %v387_v2  ;;  %v389_v15 = vld [vmem:[%s7714_s1 + $0xb40] sm:$0xff]  ;;  %v414_v2 = vld [vmem:[%s7714_s1 + $0xc08] sm:$0xff] }
  0x90   :  { %4342 = vmatprep.subr.bf16.mxu1 %v4341_v26  ;;  %v381_v26 = vld [vmem:[%s7714_s1 + $0xb00] sm:$0xff] }
  0x91   :  { %4312 = vmatpush3.bf16.msra.mxu0 %v4311_v33  ;;  %v399_v33 = vld [vmem:[%s7714_s1 + $0xb90] sm:$0xff]  ;;  %v4395_v36 = vpack.c.bf16 %v382_v28, %v381_v26  ;;  %v360_v26 = vld [vmem:[%s7714_s1 + $0xa58] sm:$0xff] }
  0x92   :  { %4314 = vmatprep.subr.bf16.mxu0 %v4313_v34  ;;  %v6029_v34 = vrot.slane %v979_v20, %v5105_v10  ;;  %v407_v20 = vld [vmem:[%s7714_s1 + $0xbd0] sm:$0xff] }
  0x93   :  { %4344 = vmatpush3.bf16.msra.mxu1 %v4343_v43  ;;  %v400_v43 = vld [vmem:[%s7714_s1 + $0xb98] sm:$0xff] }
  0x94   :  { %4346 = vmatprep.subr.bf16.mxu1 %v4345_v37  ;;  %v351_v37 = vld [vmem:[%s7714_s1 + $0xa10] sm:$0xff]  ;;  %v4397_v40 = vpack.c.bf16 %v400_v43, %v399_v33  ;;  %v995_v49 = vcombine.high %v6029_v34, %v6029_v34  ;;  %v378_v33 = vld [vmem:[%s7714_s1 + $0xae8] sm:$0xff]  ;;  %v409_v43 = vld [vmem:[%s7714_s1 + $0xbe0] sm:$0xff] }
  0x95   :  { %4316 = vmatpush3.bf16.msra.mxu0 %v4315_v45  ;;  %v370_v45 = vld [vmem:[%s7714_s1 + $0xaa8] sm:$0xff]  ;;  %v4367_v50 = vpack.c.bf16 %v352_v38, %v351_v37  ;;  %v4385_v37 = vpack.c.bf16 %v378_v33, %v377_v30  ;;  %v361_v38 = vld [vmem:[%s7714_s1 + $0xa60] sm:$0xff] }
  0x96   :  { %4318 = vmatprep.subr.bf16.mxu0 %v4317_v47  ;;  %v401_v47 = vld [vmem:[%s7714_s1 + $0xba0] sm:$0xff]  ;;  %v4369_v53 = vpack.c.bf16 %v370_v45, %v369_v44  ;;  %v394_v44 = vld [vmem:[%s7714_s1 + $0xb68] sm:$0xff]  ;;  %v379_v45 = vld [vmem:[%s7714_s1 + $0xaf0] sm:$0xff] }
  0x97   :  { %4348 = vmatpush3.bf16.msra.mxu1 %v4347_v46  ;;  %v994_v46 = vcombine.high %v6020_v31, %v6020_v31  ;;  %v4401_v56 = vpack.c.bf16 %v402_v48, %v401_v47  ;;  %v411_v47 = vld [vmem:[%s7714_s1 + $0xbf0] sm:$0xff]  ;;  %v412_v48 = vld [vmem:[%s7714_s1 + $0xbf8] sm:$0xff]  ;;  %v418_v30 = vld [vmem:[%s7714_s1 + $0xc28] sm:$0xff] }
  0x98   :  { %4350 = vmatprep.subr.bf16.mxu1 %v4349_v51  ;;  %v4399_v51 = vpack.c.bf16 %v384_v42, %v383_v39  ;;  %v362_v39 = vld [vmem:[%s7714_s1 + $0xa68] sm:$0xff]  ;;  %v449_v33 = vld [vmem:[%s7714_s1 + $0xd20] sm:$0xff] }
  0x99   :  { %4320 = vmatpush3.bf16.msra.mxu0 %v4319_v58  ;;  %v372_v58 = vld [vmem:[%s7714_s1 + $0xab8] sm:$0xff] }
  0x9a   :  { %4322 = vmatprep.subr.bf16.mxu0 %v4321_v60  ;;  %v404_v60 = vld [vmem:[%s7714_s1 + $0xbb8] sm:$0xff]  ;;  %v4373_v63 = vpack.c.bf16 %v372_v58, %v371_v41  ;;  %v429_v41 = vld [vmem:[%s7714_s1 + $0xc80] sm:$0xff]  ;;  %v430_v58 = vld [vmem:[%s7714_s1 + $0xc88] sm:$0xff] }
  0x9b   :  { %4352 = vmatpush3.bf16.msra.mxu1 %v4351_v59  ;;  %v403_v59 = vld [vmem:[%s7714_s1 + $0xbb0] sm:$0xff] }
  0x9c   :  { %4354 = vmatprep.subr.bf16.mxu1 %v4353_v0  ;;  %v355_v0 = vld [vmem:[%s7714_s1 + $0xa30] sm:$0xff]  ;;  %v4405_v3 = vpack.c.bf16 %v404_v60, %v403_v59  ;;  %v461_v59 = vld [vmem:[%s7714_s1 + $0xd80] sm:$0xff]  ;;  %v462_v60 = vld [vmem:[%s7714_s1 + $0xd88] sm:$0xff] }
  0x9d   :  { %4324 = vmatpush3.bf16.msra.mxu0 %v4323_v6  ;;  %v374_v6 = vld [vmem:[%s7714_s1 + $0xac8] sm:$0xff]  ;;  %v4457_v4 = vpack.c.bf16 %v462_v60, %v461_v59  ;;  %v439_v59 = vld [vmem:[%s7714_s1 + $0xcd0] sm:$0xff]  ;;  %v440_v60 = vld [vmem:[%s7714_s1 + $0xcd8] sm:$0xff] }
  0x9e   :  { %4326 = vmatprep.subr.bf16.mxu0 %v4325_v9  ;;  %v4375_v9 = vpack.c.bf16 %v356_v1, %v355_v0  ;;  %v4377_v11 = vpack.c.bf16 %v374_v6, %v373_v5  ;;  %v4425_v0 = vpack.c.bf16 %v430_v58, %v429_v41  ;;  %v413_v1 = vld [vmem:[%s7714_s1 + $0xc00] sm:$0xff]  ;;  %v446_v5 = vld [vmem:[%s7714_s1 + $0xd08] sm:$0xff]  ;;  %v431_v6 = vld [vmem:[%s7714_s1 + $0xc90] sm:$0xff] }
  0x9f   :  { %4356 = vmatpush3.bf16.msra.mxu1 %v4355_v8  ;;  %v406_v8 = vld [vmem:[%s7714_s1 + $0xbc8] sm:$0xff] }
  0xa0   :  { %4358 = vmatprep.subr.bf16.mxu1 %v4357_v14  ;;  %v358_v14 = vld [vmem:[%s7714_s1 + $0xa48] sm:$0xff]  ;;  %v4409_v16 = vpack.c.bf16 %v406_v8, %v405_v7  ;;  %v432_v7 = vld [vmem:[%s7714_s1 + $0xc98] sm:$0xff] }
  0xa1   :  { %4328 = vmatpush3.bf16.msra.mxu0 %v4327_v21  ;;  %v408_v21 = vld [vmem:[%s7714_s1 + $0xbd8] sm:$0xff]  ;;  %v454_v58 = vld [vmem:[%s7714_s1 + $0xd48] sm:$0xff] }
  0xa2   :  { %4362 = vmatprep.subr.bf16.mxu0 %v4361_v23  ;;  %v4411_v23 = vpack.c.bf16 %v390_v17, %v389_v15  ;;  %v4413_v28 = vpack.c.bf16 %v408_v21, %v407_v20  ;;  %v4429_v15 = vpack.c.bf16 %v432_v7, %v431_v6  ;;  %v416_v17 = vld [vmem:[%s7714_s1 + $0xc18] sm:$0xff]  ;;  %v433_v21 = vld [vmem:[%s7714_s1 + $0xca0] sm:$0xff] }
  0xa3   :  { %4360 = vmatpush3.bf16.msra.mxu1 %v4359_v22  ;;  %v4379_v22 = vpack.c.bf16 %v358_v14, %v357_v13  ;;  %v4427_v13 = vpack.c.bf16 %v414_v2, %v413_v1  ;;  %v448_v20 = vld [vmem:[%s7714_s1 + $0xd18] sm:$0xff]  ;;  %v4445_v1 = vpack.c.bf16 %v440_v60, %v439_v59  ;;  %v423_v2 = vld [vmem:[%s7714_s1 + $0xc50] sm:$0xff]  ;;  %v441_v7 = vld [vmem:[%s7714_s1 + $0xce0] sm:$0xff] }
  0xa4   :  { %4394 = vmatprep.subr.bf16.mxu1 %v4393_v27  ;;  %1806 = vmatmul.mubr.f32.vlgmr.msra.gmra.mrb[8].mxu0 %v5813_v54  ;;  %v353_v54 = vld [vmem:[%s7714_s1 + $0xa20] sm:$0xff]  ;;  %v391_v27 = vld [vmem:[%s7714_s1 + $0xb50] sm:$0xff]  ;;  %v456_v6 = vld [vmem:[%s7714_s1 + $0xd58] sm:$0xff] }
  0xa5   :  { %4364 = vmatpush3.bf16.msra.mxu0 %v4363_v35  ;;  %1945 = vmatprep.mubr.f32.mxu0 %v994_v46  ;;  %v4371_v61 = vpack.c.bf16 %v354_v32, %v353_v54  ;;  %v410_v35 = vld [vmem:[%s7714_s1 + $0xbe8] sm:$0xff]  ;;  %v380_v46 = vld [vmem:[%s7714_s1 + $0xaf8] sm:$0xff]  ;;  %v363_v54 = vld [vmem:[%s7714_s1 + $0xa70] sm:$0xff] }
  0xa6   :  { %1876 = vmatmul.mubr.f32.vlgmr.msra.gmra.mrb[8].mxu1 %v5822_v57  ;;  %4366 = vmatprep.subr.bf16.mxu0 %v4365_v52  ;;  %v386_v57 = vld [vmem:[%s7714_s1 + $0xb28] sm:$0xff]  ;;  %v4415_v52 = vpack.c.bf16 %v392_v29, %v391_v27  ;;  %v4417_v42 = vpack.c.bf16 %v410_v35, %v409_v43  ;;  %v364_v32 = vld [vmem:[%s7714_s1 + $0xa78] sm:$0xff]  ;;  %v435_v35 = vld [vmem:[%s7714_s1 + $0xcb0] sm:$0xff] }
  0xa7   :  { %4396 = vmatpush3.bf16.msra.mxu1 %v4395_v36  ;;  %2015 = vmatprep.mubr.f32.mxu1 %v995_v49  ;;  %v4403_v62 = vpack.c.bf16 %v386_v57, %v385_v55  ;;  %v4383_v36 = vpack.c.bf16 %v360_v26, %v359_v25  ;;  %v4387_v49 = vpack.c.bf16 %v362_v39, %v361_v38  ;;  %v395_v55 = vld [vmem:[%s7714_s1 + $0xb70] sm:$0xff]  ;;  %v396_v57 = vld [vmem:[%s7714_s1 + $0xb78] sm:$0xff]  ;;  %v466_v25 = vld [vmem:[%s7714_s1 + $0xda8] sm:$0xff] }
  0xa8   :  { %4398 = vmatprep.subr.bf16.mxu1 %v4397_v40  ;;  %v393_v40 = vld [vmem:[%s7714_s1 + $0xb60] sm:$0xff]  ;;  %v511_v59 = vld [vmem:[%s7714_s1 + $0xf10] sm:$0xff] }
  0xa9   :  { %4368 = vmatpush3.bf16.msra.mxu0 %v4367_v50  ;;  %v21_v50 = vld [vmem:[%s7713_s0 + $0x30] sm:$0xff] }
  0xaa   :  { %4370 = vmatprep.subr.bf16.mxu0 %v4369_v53  ;;  %v4389_v53 = vpack.c.bf16 %v380_v46, %v379_v45  ;;  %v6227_v8 = vrot.slane %v21_v50, %v5105_v10  ;;  %v451_v45 = vld [vmem:[%s7714_s1 + $0xd30] sm:$0xff] }
  0xab   :  { %4400 = vmatpush3.bf16.msra.mxu1 %v4399_v51  ;;  %v4419_v51 = vpack.c.bf16 %v394_v44, %v393_v40  ;;  %v420_v44 = vld [vmem:[%s7714_s1 + $0xc38] sm:$0xff] }
  0xac   :  { %4402 = vmatprep.subr.bf16.mxu1 %v4401_v56  ;;  %v4421_v56 = vpack.c.bf16 %v412_v48, %v411_v47  ;;  %v452_v47 = vld [vmem:[%s7714_s1 + $0xd38] sm:$0xff]  ;;  %v437_v48 = vld [vmem:[%s7714_s1 + $0xcc0] sm:$0xff] }
  0xad   :  { %4372 = vmatpush3.bf16.msra.mxu0 %v4371_v61  ;;  %v996_v61 = vcombine.high %v21_v50, %v21_v50  ;;  %v469_v50 = vld [vmem:[%s7714_s1 + $0xdc0] sm:$0xff] }
  0xae   :  { %4374 = vmatprep.subr.bf16.mxu0 %v4373_v63  ;;  %v4423_v63 = vpack.c.bf16 %v396_v57, %v395_v55  ;;  %v421_v55 = vld [vmem:[%s7714_s1 + $0xc40] sm:$0xff] }
  0xaf   :  { %4404 = vmatpush3.bf16.msra.mxu1 %v4403_v62  ;;  %v4391_v62 = vpack.c.bf16 %v364_v32, %v363_v54  ;;  %v4471_v54 = vpack.c.bf16 %v452_v47, %v451_v45  ;;  %v453_v57 = vld [vmem:[%s7714_s1 + $0xd40] sm:$0xff]  ;;  %v478_v45 = vld [vmem:[%s7714_s1 + $0xe08] sm:$0xff] }
  0xb0   :  { %4406 = vmatprep.subr.bf16.mxu1 %v4405_v3  ;;  %v445_v3 = vld [vmem:[%s7714_s1 + $0xd00] sm:$0xff] }
  0xb1   :  { %4376 = vmatpush3.bf16.msra.mxu0 %v4375_v9  ;;  %v463_v9 = vld [vmem:[%s7714_s1 + $0xd90] sm:$0xff]  ;;  %v4459_v14 = vpack.c.bf16 %v446_v5, %v445_v3  ;;  %v424_v3 = vld [vmem:[%s7714_s1 + $0xc58] sm:$0xff] }
  0xb2   :  { %4378 = vmatprep.subr.bf16.mxu0 %v4377_v11  ;;  %v6236_v11 = vrot.slane %v996_v61, %v5105_v10  ;;  %v471_v61 = vld [vmem:[%s7714_s1 + $0xdd0] sm:$0xff] }
  0xb3   :  { %4408 = vmatpush3.bf16.msra.mxu1 %v4407_v12  ;;  %v464_v12 = vld [vmem:[%s7714_s1 + $0xd98] sm:$0xff] }
  0xb4   :  { %4410 = vmatprep.subr.bf16.mxu1 %v4409_v16  ;;  %v415_v16 = vld [vmem:[%s7714_s1 + $0xc10] sm:$0xff]  ;;  %v4461_v19 = vpack.c.bf16 %v464_v12, %v463_v9  ;;  %v1012_v26 = vcombine.high %v6236_v11, %v6236_v11  ;;  %v442_v9 = vld [vmem:[%s7714_s1 + $0xce8] sm:$0xff]  ;;  %v473_v12 = vld [vmem:[%s7714_s1 + $0xde0] sm:$0xff] }
  0xb5   :  { %4380 = vmatpush3.bf16.msra.mxu0 %v4379_v22  ;;  %v434_v22 = vld [vmem:[%s7714_s1 + $0xca8] sm:$0xff]  ;;  %v4431_v27 = vpack.c.bf16 %v416_v17, %v415_v16  ;;  %v4449_v16 = vpack.c.bf16 %v442_v9, %v441_v7  ;;  %v425_v17 = vld [vmem:[%s7714_s1 + $0xc60] sm:$0xff] }
  0xb6   :  { %4382 = vmatprep.subr.bf16.mxu0 %v4381_v24  ;;  %v465_v24 = vld [vmem:[%s7714_s1 + $0xda0] sm:$0xff]  ;;  %v4433_v29 = vpack.c.bf16 %v434_v22, %v433_v21  ;;  %v458_v21 = vld [vmem:[%s7714_s1 + $0xd68] sm:$0xff]  ;;  %v443_v22 = vld [vmem:[%s7714_s1 + $0xcf0] sm:$0xff] }
  0xb7   :  { %4412 = vmatpush3.bf16.msra.mxu1 %v4411_v23  ;;  %v1011_v23 = vcombine.high %v6227_v8, %v6227_v8  ;;  %v4465_v43 = vpack.c.bf16 %v466_v25, %v465_v24  ;;  %v475_v24 = vld [vmem:[%s7714_s1 + $0xdf0] sm:$0xff]  ;;  %v476_v25 = vld [vmem:[%s7714_s1 + $0xdf8] sm:$0xff]  ;;  %v482_v7 = vld [vmem:[%s7714_s1 + $0xe28] sm:$0xff] }
  0xb8   :  { %4414 = vmatprep.subr.bf16.mxu1 %v4413_v28  ;;  %v4463_v28 = vpack.c.bf16 %v448_v20, %v447_v18  ;;  %v426_v18 = vld [vmem:[%s7714_s1 + $0xc68] sm:$0xff]  ;;  %v513_v9 = vld [vmem:[%s7714_s1 + $0xf20] sm:$0xff] }
  0xb9   :  { %4384 = vmatpush3.bf16.msra.mxu0 %v4383_v36  ;;  %v436_v36 = vld [vmem:[%s7714_s1 + $0xcb8] sm:$0xff] }
  0xba   :  { %4386 = vmatprep.subr.bf16.mxu0 %v4385_v37  ;;  %v468_v37 = vld [vmem:[%s7714_s1 + $0xdb8] sm:$0xff]  ;;  %v4437_v40 = vpack.c.bf16 %v436_v36, %v435_v35  ;;  %v493_v35 = vld [vmem:[%s7714_s1 + $0xe80] sm:$0xff]  ;;  %v494_v36 = vld [vmem:[%s7714_s1 + $0xe88] sm:$0xff] }
  0xbb   :  { %4416 = vmatpush3.bf16.msra.mxu1 %v4415_v52  ;;  %v467_v52 = vld [vmem:[%s7714_s1 + $0xdb0] sm:$0xff] }
  0xbc   :  { %4418 = vmatprep.subr.bf16.mxu1 %v4417_v42  ;;  %v419_v42 = vld [vmem:[%s7714_s1 + $0xc30] sm:$0xff]  ;;  %v4469_v46 = vpack.c.bf16 %v468_v37, %v467_v52  ;;  %v525_v52 = vld [vmem:[%s7714_s1 + $0xf80] sm:$0xff]  ;;  %v526_v37 = vld [vmem:[%s7714_s1 + $0xf88] sm:$0xff] }
  0xbd   :  { %4388 = vmatpush3.bf16.msra.mxu0 %v4387_v49  ;;  %v438_v49 = vld [vmem:[%s7714_s1 + $0xcc8] sm:$0xff]  ;;  %v4521_v47 = vpack.c.bf16 %v526_v37, %v525_v52  ;;  %v503_v52 = vld [vmem:[%s7714_s1 + $0xed0] sm:$0xff]  ;;  %v504_v37 = vld [vmem:[%s7714_s1 + $0xed8] sm:$0xff] }
  0xbe   :  { %4390 = vmatprep.subr.bf16.mxu0 %v4389_v53  ;;  %v4439_v53 = vpack.c.bf16 %v420_v44, %v419_v42  ;;  %v4441_v32 = vpack.c.bf16 %v438_v49, %v437_v48  ;;  %v4489_v42 = vpack.c.bf16 %v494_v36, %v493_v35  ;;  %v477_v44 = vld [vmem:[%s7714_s1 + $0xe00] sm:$0xff]  ;;  %v510_v48 = vld [vmem:[%s7714_s1 + $0xf08] sm:$0xff]  ;;  %v495_v49 = vld [vmem:[%s7714_s1 + $0xe90] sm:$0xff] }
  0xbf   :  { %4420 = vmatpush3.bf16.msra.mxu1 %v4419_v51  ;;  %v470_v51 = vld [vmem:[%s7714_s1 + $0xdc8] sm:$0xff] }
  0xc0   :  { %4422 = vmatprep.subr.bf16.mxu1 %v4421_v56  ;;  %v422_v56 = vld [vmem:[%s7714_s1 + $0xc48] sm:$0xff]  ;;  %v4473_v41 = vpack.c.bf16 %v470_v51, %v469_v50  ;;  %v496_v50 = vld [vmem:[%s7714_s1 + $0xe98] sm:$0xff] }
  0xc1   :  { %4392 = vmatpush3.bf16.msra.mxu0 %v4391_v62  ;;  %v472_v62 = vld [vmem:[%s7714_s1 + $0xdd8] sm:$0xff]  ;;  %v518_v36 = vld [vmem:[%s7714_s1 + $0xf48] sm:$0xff] }
  0xc2   :  { %4426 = vmatprep.subr.bf16.mxu0 %v4425_v0  ;;  %v4475_v0 = vpack.c.bf16 %v454_v58, %v453_v57  ;;  %v4477_v5 = vpack.c.bf16 %v472_v62, %v471_v61  ;;  %v4493_v57 = vpack.c.bf16 %v496_v50, %v495_v49  ;;  %v480_v58 = vld [vmem:[%s7714_s1 + $0xe18] sm:$0xff]  ;;  %v497_v62 = vld [vmem:[%s7714_s1 + $0xea0] sm:$0xff] }
  0xc3   :  { %4424 = vmatpush3.bf16.msra.mxu1 %v4423_v63  ;;  %v4443_v63 = vpack.c.bf16 %v422_v56, %v421_v55  ;;  %v4491_v55 = vpack.c.bf16 %v478_v45, %v477_v44  ;;  %v512_v61 = vld [vmem:[%s7714_s1 + $0xf18] sm:$0xff]  ;;  %v4509_v44 = vpack.c.bf16 %v504_v37, %v503_v52  ;;  %v487_v45 = vld [vmem:[%s7714_s1 + $0xe50] sm:$0xff]  ;;  %v505_v50 = vld [vmem:[%s7714_s1 + $0xee0] sm:$0xff] }
  0xc4   :  { %4458 = vmatprep.subr.bf16.mxu1 %v4457_v4  ;;  %1946 = vmatmul.mubr.f32.vlgmr.msra.gmra.mrb[10].mxu0 %v6020_v31  ;;  %v417_v31 = vld [vmem:[%s7714_s1 + $0xc20] sm:$0xff]  ;;  %v455_v4 = vld [vmem:[%s7714_s1 + $0xd50] sm:$0xff]  ;;  %v520_v49 = vld [vmem:[%s7714_s1 + $0xf58] sm:$0xff] }
  0xc5   :  { %4428 = vmatpush3.bf16.msra.mxu0 %v4427_v13  ;;  %2085 = vmatprep.mubr.f32.mxu0 %v1011_v23  ;;  %v4435_v38 = vpack.c.bf16 %v418_v30, %v417_v31  ;;  %v474_v13 = vld [vmem:[%s7714_s1 + $0xde8] sm:$0xff]  ;;  %v444_v23 = vld [vmem:[%s7714_s1 + $0xcf8] sm:$0xff]  ;;  %v427_v31 = vld [vmem:[%s7714_s1 + $0xc70] sm:$0xff] }
  0xc6   :  { %2016 = vmatmul.mubr.f32.vlgmr.msra.gmra.mrb[10].mxu1 %v6029_v34  ;;  %4430 = vmatprep.subr.bf16.mxu0 %v4429_v15  ;;  %v450_v34 = vld [vmem:[%s7714_s1 + $0xd28] sm:$0xff]  ;;  %v4479_v15 = vpack.c.bf16 %v456_v6, %v455_v4  ;;  %v4481_v20 = vpack.c.bf16 %v474_v13, %v473_v12  ;;  %v428_v30 = vld [vmem:[%s7714_s1 + $0xc78] sm:$0xff]  ;;  %v499_v13 = vld [vmem:[%s7714_s1 + $0xeb0] sm:$0xff] }
  0xc7   :  { %4460 = vmatpush3.bf16.msra.mxu1 %v4459_v14  ;;  %2155 = vmatprep.mubr.f32.mxu1 %v1012_v26  ;;  %v4467_v39 = vpack.c.bf16 %v450_v34, %v449_v33  ;;  %v4447_v14 = vpack.c.bf16 %v424_v3, %v423_v2  ;;  %v4451_v26 = vpack.c.bf16 %v426_v18, %v425_v17  ;;  %v459_v33 = vld [vmem:[%s7714_s1 + $0xd70] sm:$0xff]  ;;  %v460_v34 = vld [vmem:[%s7714_s1 + $0xd78] sm:$0xff]  ;;  %v530_v2 = vld [vmem:[%s7714_s1 + $0xfa8] sm:$0xff] }
  0xc8   :  { %4462 = vmatprep.subr.bf16.mxu1 %v4461_v19  ;;  %v457_v19 = vld [vmem:[%s7714_s1 + $0xd60] sm:$0xff]  ;;  %v591_v37 = vld [vmem:[%s7714_s1 + $0x1190] sm:$0xff] }
  0xc9   :  { %4432 = vmatpush3.bf16.msra.mxu0 %v4431_v27  ;;  %v22_v27 = vld [vmem:[%s7713_s0 + $0x38] sm:$0xff] }
  0xca   :  { %4434 = vmatprep.subr.bf16.mxu0 %v4433_v29  ;;  %v4453_v29 = vpack.c.bf16 %v444_v23, %v443_v22  ;;  %v6434_v51 = vrot.slane %v22_v27, %v5105_v10  ;;  %v515_v22 = vld [vmem:[%s7714_s1 + $0xf30] sm:$0xff] }
  0xcb   :  { %4464 = vmatpush3.bf16.msra.mxu1 %v4463_v28  ;;  %v4483_v28 = vpack.c.bf16 %v458_v21, %v457_v19  ;;  %v484_v21 = vld [vmem:[%s7714_s1 + $0xe38] sm:$0xff] }
  0xcc   :  { %4466 = vmatprep.subr.bf16.mxu1 %v4465_v43  ;;  %v4485_v43 = vpack.c.bf16 %v476_v25, %v475_v24  ;;  %v516_v24 = vld [vmem:[%s7714_s1 + $0xf38] sm:$0xff]  ;;  %v501_v25 = vld [vmem:[%s7714_s1 + $0xec0] sm:$0xff] }
  0xcd   :  { %4436 = vmatpush3.bf16.msra.mxu0 %v4435_v38  ;;  %v1013_v38 = vcombine.high %v22_v27, %v22_v27  ;;  %v533_v27 = vld [vmem:[%s7714_s1 + $0xfc0] sm:$0xff] }
  0xce   :  { %4438 = vmatprep.subr.bf16.mxu0 %v4437_v40  ;;  %v4487_v40 = vpack.c.bf16 %v460_v34, %v459_v33  ;;  %v485_v33 = vld [vmem:[%s7714_s1 + $0xe40] sm:$0xff] }
  0xcf   :  { %4468 = vmatpush3.bf16.msra.mxu1 %v4467_v39  ;;  %v4455_v39 = vpack.c.bf16 %v428_v30, %v427_v31  ;;  %v4535_v31 = vpack.c.bf16 %v516_v24, %v515_v22  ;;  %v517_v34 = vld [vmem:[%s7714_s1 + $0xf40] sm:$0xff]  ;;  %v558_v22 = vld [vmem:[%s7714_s1 + $0x1088] sm:$0xff] }
  0xd0   :  { %4470 = vmatprep.subr.bf16.mxu1 %v4469_v46  ;;  %v509_v46 = vld [vmem:[%s7714_s1 + $0xf00] sm:$0xff]  ;;  %v590_v24 = vld [vmem:[%s7714_s1 + $0x1188] sm:$0xff] }
  0xd1   :  { %4440 = vmatpush3.bf16.msra.mxu0 %v4439_v53  ;;  %v527_v53 = vld [vmem:[%s7714_s1 + $0xf90] sm:$0xff]  ;;  %v4523_v56 = vpack.c.bf16 %v510_v48, %v509_v46  ;;  %v488_v46 = vld [vmem:[%s7714_s1 + $0xe58] sm:$0xff] }
  0xd2   :  { %4442 = vmatprep.subr.bf16.mxu0 %v4441_v32  ;;  %v6443_v32 = vrot.slane %v1013_v38, %v5105_v10  ;;  %v535_v38 = vld [vmem:[%s7714_s1 + $0xfd0] sm:$0xff] }
  0xd3   :  { %4472 = vmatpush3.bf16.msra.mxu1 %v4471_v54  ;;  %v528_v54 = vld [vmem:[%s7714_s1 + $0xf98] sm:$0xff] }
  0xd4   :  { %4474 = vmatprep.subr.bf16.mxu1 %v4473_v41  ;;  %v479_v41 = vld [vmem:[%s7714_s1 + $0xe10] sm:$0xff]  ;;  %v4525_v60 = vpack.c.bf16 %v528_v54, %v527_v53  ;;  %v1029_v3 = vcombine.high %v6443_v32, %v6443_v32  ;;  %v506_v53 = vld [vmem:[%s7714_s1 + $0xee8] sm:$0xff]  ;;  %v537_v54 = vld [vmem:[%s7714_s1 + $0xfe0] sm:$0xff] }
  0xd5   :  { %4444 = vmatpush3.bf16.msra.mxu0 %v4443_v63  ;;  %v498_v63 = vld [vmem:[%s7714_s1 + $0xea8] sm:$0xff]  ;;  %v4495_v4 = vpack.c.bf16 %v480_v58, %v479_v41  ;;  %v4513_v41 = vpack.c.bf16 %v506_v53, %v505_v50  ;;  %v489_v58 = vld [vmem:[%s7714_s1 + $0xe60] sm:$0xff] }
  0xd6   :  { %4446 = vmatprep.subr.bf16.mxu0 %v4445_v1  ;;  %v529_v1 = vld [vmem:[%s7714_s1 + $0xfa0] sm:$0xff]  ;;  %v4497_v6 = vpack.c.bf16 %v498_v63, %v497_v62  ;;  %v522_v63 = vld [vmem:[%s7714_s1 + $0xf68] sm:$0xff] }
  0xd7   :  { %4476 = vmatpush3.bf16.msra.mxu1 %v4475_v0  ;;  %v1028_v0 = vcombine.high %v6434_v51, %v6434_v51  ;;  %v4529_v12 = vpack.c.bf16 %v530_v2, %v529_v1  ;;  %v508_v1 = vld [vmem:[%s7714_s1 + $0xef8] sm:$0xff]  ;;  %v3087_v2 = vld [vmem:[%s7715_s2] ss:$0 sm:$0xff]  ;;  %v562_v53 = vld [vmem:[%s7714_s1 + $0x10a8] sm:$0xff] }
  0xd8   :  { %4478 = vmatprep.subr.bf16.mxu1 %v4477_v5  ;;  %v4527_v5 = vpack.c.bf16 %v512_v61, %v511_v59  ;;  %v490_v59 = vld [vmem:[%s7714_s1 + $0xe68] sm:$0xff]  ;;  %v561_v50 = vld [vmem:[%s7714_s1 + $0x10a0] sm:$0xff] }
  0xd9   :  { %4448 = vmatpush3.bf16.msra.mxu0 %v4447_v14  ;;  %v500_v14 = vld [vmem:[%s7714_s1 + $0xeb8] sm:$0xff] }
  0xda   :  { %4450 = vmatprep.subr.bf16.mxu0 %v4449_v16  ;;  %v532_v16 = vld [vmem:[%s7714_s1 + $0xfb8] sm:$0xff]  ;;  %v4501_v19 = vpack.c.bf16 %v500_v14, %v499_v13 }
  0xdb   :  { %4480 = vmatpush3.bf16.msra.mxu1 %v4479_v15  ;;  %v531_v15 = vld [vmem:[%s7714_s1 + $0xfb0] sm:$0xff] }
  0xdc   :  { %4482 = vmatprep.subr.bf16.mxu1 %v4481_v20  ;;  %v483_v20 = vld [vmem:[%s7714_s1 + $0xe30] sm:$0xff]  ;;  %v4533_v23 = vpack.c.bf16 %v532_v16, %v531_v15  ;;  %v492_v16 = vld [vmem:[%s7714_s1 + $0xe78] sm:$0xff] }
  0xdd   :  { %4452 = vmatpush3.bf16.msra.mxu0 %v4451_v26  ;;  %v502_v26 = vld [vmem:[%s7714_s1 + $0xec8] sm:$0xff]  ;;  %v491_v15 = vld [vmem:[%s7714_s1 + $0xe70] sm:$0xff] }
  0xde   :  { %4454 = vmatprep.subr.bf16.mxu0 %v4453_v29  ;;  %v4503_v29 = vpack.c.bf16 %v484_v21, %v483_v20  ;;  %v4505_v30 = vpack.c.bf16 %v502_v26, %v501_v25  ;;  %v524_v20 = vld [vmem:[%s7714_s1 + $0xf78] sm:$0xff]  ;;  %v557_v21 = vld [vmem:[%s7714_s1 + $0x1080] sm:$0xff] }
  0xdf   :  { %4484 = vmatpush3.bf16.msra.mxu1 %v4483_v28  ;;  %v534_v28 = vld [vmem:[%s7714_s1 + $0xfc8] sm:$0xff] }
  0xe0   :  { %4486 = vmatprep.subr.bf16.mxu1 %v4485_v43  ;;  %v486_v43 = vld [vmem:[%s7714_s1 + $0xe48] sm:$0xff]  ;;  %v4537_v35 = vpack.c.bf16 %v534_v28, %v533_v27  ;;  %v4519_v27 = vpack.c.bf16 %v492_v16, %v491_v15 }
  0xe1   :  { %4456 = vmatpush3.bf16.msra.mxu0 %v4455_v39  ;;  %v536_v39 = vld [vmem:[%s7714_s1 + $0xfd8] sm:$0xff]  ;;  %v598_v15 = vld [vmem:[%s7714_s1 + $0x11c8] sm:$0xff] }
  0xe2   :  { %4490 = vmatprep.subr.bf16.mxu0 %v4489_v42  ;;  %v4539_v42 = vpack.c.bf16 %v518_v36, %v517_v34  ;;  %v4541_v48 = vpack.c.bf16 %v536_v39, %v535_v38  ;;  %v574_v34 = vld [vmem:[%s7714_s1 + $0x1108] sm:$0xff]  ;;  %v560_v36 = vld [vmem:[%s7714_s1 + $0x1098] sm:$0xff] }
  0xe3   :  { %4488 = vmatpush3.bf16.msra.mxu1 %v4487_v40  ;;  %v4507_v40 = vpack.c.bf16 %v486_v43, %v485_v33  ;;  %v573_v33 = vld [vmem:[%s7714_s1 + $0x1100] sm:$0xff]  ;;  %v592_v38 = vld [vmem:[%s7714_s1 + $0x1198] sm:$0xff] }
  0xe4   :  { %4522 = vmatprep.subr.bf16.mxu1 %v4521_v47  ;;  %2086 = vmatmul.mubr.f32.vlgmr.msra.gmra.mrb[12].mxu0 %v6227_v8  ;;  %v481_v8 = vld [vmem:[%s7714_s1 + $0xe20] sm:$0xff]  ;;  %v519_v47 = vld [vmem:[%s7714_s1 + $0xf50] sm:$0xff] }
  0xe5   :  { %4492 = vmatpush3.bf16.msra.mxu0 %v4491_v55  ;;  %2225 = vmatprep.mubr.f32.mxu0 %v1028_v0  ;;  %v4499_v17 = vpack.c.bf16 %v482_v7, %v481_v8  ;;  %v538_v55 = vld [vmem:[%s7714_s1 + $0xfe8] sm:$0xff]  ;;  %v507_v0 = vld [vmem:[%s7714_s1 + $0xef0] sm:$0xff] }
  0xe6   :  { %2156 = vmatmul.mubr.f32.vlgmr.msra.gmra.mrb[12].mxu1 %v6236_v11  ;;  %4494 = vmatprep.subr.bf16.mxu0 %v4493_v57  ;;  %v514_v11 = vld [vmem:[%s7714_s1 + $0xf28] sm:$0xff]  ;;  %v4543_v57 = vpack.c.bf16 %v520_v49, %v519_v47  ;;  %v4545_v62 = vpack.c.bf16 %v538_v55, %v537_v54  ;;  %v4517_v14 = vpack.c.bf16 %v508_v1, %v507_v0  ;;  %v575_v47 = vld [vmem:[%s7714_s1 + $0x1110] sm:$0xff]  ;;  %v576_v49 = vld [vmem:[%s7714_s1 + $0x1118] sm:$0xff] }
  0xe7   :  { %4524 = vmatpush3.bf16.msra.mxu1 %v4523_v56  ;;  %2295 = vmatprep.mubr.f32.mxu1 %v1029_v3  ;;  %v4531_v18 = vpack.c.bf16 %v514_v11, %v513_v9  ;;  %v4511_v56 = vpack.c.bf16 %v488_v46, %v487_v45  ;;  %v4515_v9 = vpack.c.bf16 %v490_v59, %v489_v58  ;;  %v543_v45 = vld [vmem:[%s7714_s1 + $0x1010] sm:$0xff]  ;;  %v544_v46 = vld [vmem:[%s7714_s1 + $0x1018] sm:$0xff]  ;;  %v593_v55 = vld [vmem:[%s7714_s1 + $0x11a0] sm:$0xff] }
  0xe8   :  { %4526 = vmatprep.subr.bf16.mxu1 %v4525_v60  ;;  %v521_v60 = vld [vmem:[%s7714_s1 + $0xf60] sm:$0xff]  ;;  %v4591_v58 = vpack.c.bf16 %v576_v49, %v575_v47  ;;  %v4561_v59 = vpack.c.bf16 %v562_v53, %v561_v50  ;;  %v564_v0 = vld [vmem:[%s7714_s1 + $0x10b8] sm:$0xff]  ;;  %v595_v1 = vld [vmem:[%s7714_s1 + $0x11b0] sm:$0xff] }
  0xe9   :  { %4496 = vmatpush3.bf16.msra.mxu0 %v4495_v4  ;;  %v4547_v13 = vpack.c.bf16 %v522_v63, %v521_v60  ;;  %v546_v60 = vld [vmem:[%s7714_s1 + $0x1028] sm:$0xff]  ;;  %v563_v63 = vld [vmem:[%s7714_s1 + $0x10b0] sm:$0xff] }
  0xea   :  { %4498 = vmatprep.subr.bf16.mxu0 %v4497_v6  ;;  %v540_v6 = vld [vmem:[%s7714_s1 + $0xff8] sm:$0xff] }
  0xeb   :  { %4528 = vmatpush3.bf16.msra.mxu1 %v4527_v5  ;;  %v539_v5 = vld [vmem:[%s7714_s1 + $0xff0] sm:$0xff] }
  0xec   :  { %4530 = vmatprep.subr.bf16.mxu1 %v4529_v12  ;;  %v23_v12 = vld [vmem:[%s7713_s0 + $0x40] sm:$0xff] }
  0xed   :  { %4500 = vmatpush3.bf16.msra.mxu0 %v4499_v17  ;;  %v523_v17 = vld [vmem:[%s7714_s1 + $0xf70] sm:$0xff]  ;;  %v1030_v25 = vcombine.high %v23_v12, %v23_v12  ;;  %v6646_v52 = vrot.slane %v23_v12, %v5105_v10  ;;  %v580_v12 = vld [vmem:[%s7714_s1 + $0x1138] sm:$0xff] }
  0xee   :  { %4502 = vmatprep.subr.bf16.mxu0 %v4501_v19  ;;  %v4549_v19 = vpack.c.bf16 %v540_v6, %v539_v5  ;;  %v4551_v28 = vpack.c.bf16 %v524_v20, %v523_v17  ;;  %v4565_v5 = vpack.c.bf16 %v564_v0, %v563_v63  ;;  %v547_v6 = vld [vmem:[%s7714_s1 + $0x1030] sm:$0xff]  ;;  %v549_v17 = vld [vmem:[%s7714_s1 + $0x1040] sm:$0xff]  ;;  %v550_v20 = vld [vmem:[%s7714_s1 + $0x1048] sm:$0xff] }
  0xef   :  { %4532 = vmatpush3.bf16.msra.mxu1 %v4531_v18  ;;  %v6655_v39 = vrot.slane %v1030_v25, %v5105_v10  ;;  %v1045_v54 = vcombine.high %v6646_v52, %v6646_v52 }
  0xf0   :  { %4534 = vmatprep.subr.bf16.mxu1 %v4533_v23  ;;  %v589_v23 = vld [vmem:[%s7714_s1 + $0x1180] sm:$0xff] }
  0xf1   :  { %4504 = vmatpush3.bf16.msra.mxu0 %v4503_v29  ;;  %v4553_v29 = vpack.c.bf16 %v558_v22, %v557_v21  ;;  %v4585_v43 = vpack.c.bf16 %v590_v24, %v589_v23  ;;  %v581_v21 = vld [vmem:[%s7714_s1 + $0x1140] sm:$0xff] }
  0xf2   :  { %4506 = vmatprep.subr.bf16.mxu0 %v4505_v30  ;;  %v542_v30 = vld [vmem:[%s7714_s1 + $0x1008] sm:$0xff] }
  0xf3   :  { %4536 = vmatpush3.bf16.msra.mxu1 %v4535_v31  ;;  %v541_v31 = vld [vmem:[%s7714_s1 + $0x1000] sm:$0xff] }
  0xf4   :  { %4538 = vmatprep.subr.bf16.mxu1 %v4537_v35  ;;  %v559_v35 = vld [vmem:[%s7714_s1 + $0x1090] sm:$0xff] }
  0xf5   :  { %4508 = vmatpush3.bf16.msra.mxu0 %v4507_v40  ;;  %v4555_v40 = vpack.c.bf16 %v542_v30, %v541_v31 }
  0xf6   :  { %4510 = vmatprep.subr.bf16.mxu0 %v4509_v44  ;;  %v4557_v44 = vpack.c.bf16 %v560_v36, %v559_v35 }
  0xf7   :  { %4540 = vmatpush3.bf16.msra.mxu1 %v4539_v42  ;;  %v3123_v61 = vpop.f32.mrb[0].mxu0  ;;  %v4587_v42 = vpack.c.bf16 %v574_v34, %v573_v33 }
  0xf8   :  { %4542 = vmatprep.subr.bf16.mxu1 %v4541_v48  ;;  %v3124_v3 = vpop.f32.mrb[1].mxu0  ;;  %v4589_v48 = vpack.c.bf16 %v592_v38, %v591_v37 }
  0xf9   :  { %v3158_v4 = vpop.f32.mrb[0].mxu1  ;;  %v3125_v8 = vadd.f32 %v3124_v3, %v3123_v61  ;;  %4512 = vmatpush3.bf16.msra.mxu0 %v4511_v56  ;;  %v594_v56 = vld [vmem:[%s7714_s1 + $0x11a8] sm:$0xff]  ;;  %v577_v61 = vld [vmem:[%s7714_s1 + $0x1120] sm:$0xff] }
  0xfa   :  { %v3159_v7 = vpop.f32.mrb[1].mxu1  ;;  %4514 = vmatprep.subr.bf16.mxu0 %v4513_v41  ;;  %v4559_v41 = vpack.c.bf16 %v544_v46, %v543_v45 }
  0xfb   :  { %v3160_v11 = vadd.f32 %v3159_v7, %v3158_v4  ;;  %4544 = vmatpush3.bf16.msra.mxu1 %v4543_v57  ;;  %v1248_v18 = vadd.f32 %v3125_v8, %v3087_v2  ;;  %v1046_v57 = vcombine.high %v6655_v39, %v6655_v39  ;;  %v596_v2 = vld [vmem:[%s7714_s1 + $0x11b8] sm:$0xff]  ;;  %v579_v7 = vld [vmem:[%s7714_s1 + $0x1130] sm:$0xff] }
  0xfc   :  { %4546 = vmatprep.subr.bf16.mxu1 %v4545_v62  ;;  %v4593_v62 = vpack.c.bf16 %v594_v56, %v593_v55  ;;  %v548_v8 = vld [vmem:[%s7714_s1 + $0x1038] sm:$0xff] }
  0xfd   :  { %v6625_v26 = vadd.f32 %v3160_v11, %v1248_v18  ;;  %4516 = vmatpush3.bf16.msra.mxu0 %v4515_v9  ;;  %v4597_v9 = vpack.c.bf16 %v596_v2, %v595_v1  ;;  %v565_v11 = vld [vmem:[%s7714_s1 + $0x10c0] sm:$0xff]  ;;  %v4567_v16 = vpack.c.bf16 %v548_v8, %v547_v6  ;;  %v4599_v18 = vpack.c.bf16 %v580_v12, %v579_v7 }
  0xfe   :  { %4518 = vmatprep.subr.bf16.mxu0 %v4517_v14  ;;  %v597_v14 = vld [vmem:[%s7714_s1 + $0x11c0] sm:$0xff] }
  0xff   :  { %4548 = vmatpush3.bf16.msra.mxu1 %v4547_v13  ;;  %v566_v13 = vld [vmem:[%s7714_s1 + $0x10c8] sm:$0xff] }
 0x100   :  { %4550 = vmatprep.subr.bf16.mxu1 %v4549_v19  ;;  %v4569_v19 = vpack.c.bf16 %v566_v13, %v565_v11 }
 0x101   :  { %4520 = vmatpush3.bf16.msra.mxu0 %v4519_v27 }
 0x102   :  { %4554 = vmatprep.subr.bf16.mxu0 %v4553_v29 }
 0x103   :  { %4552 = vmatpush3.bf16.msra.mxu1 %v4551_v28 }
 0x104   :  { %4586 = vmatprep.subr.bf16.mxu1 %v4585_v43  ;;  %2226 = vmatmul.mubr.f32.vlgmr.msra.gmra.mrb[14].mxu0 %v6434_v51  ;;  %v545_v51 = vld [vmem:[%s7714_s1 + $0x1020] sm:$0xff] }
 0x105   :  { %4556 = vmatpush3.bf16.msra.mxu0 %v4555_v40  ;;  %2365 = vmatprep.mubr.f32.mxu0 %v1045_v54  ;;  %v4563_v3 = vpack.c.bf16 %v546_v60, %v545_v51 }
 0x106   :  { %2296 = vmatmul.mubr.f32.vlgmr.msra.gmra.mrb[14].mxu1 %v6443_v32  ;;  %4558 = vmatprep.subr.bf16.mxu0 %v4557_v44  ;;  %v578_v32 = vld [vmem:[%s7714_s1 + $0x1128] sm:$0xff] }
 0x107   :  { %4588 = vmatpush3.bf16.msra.mxu1 %v4587_v42  ;;  %2435 = vmatprep.mubr.f32.mxu1 %v1046_v57  ;;  %v4595_v4 = vpack.c.bf16 %v578_v32, %v577_v61 }
 0x108   :  { %4590 = vmatprep.subr.bf16.mxu1 %v4589_v48 }
 0x109   :  { %4560 = vmatpush3.bf16.msra.mxu0 %v4559_v41 }
 0x10a   :  { %4562 = vmatprep.subr.bf16.mxu0 %v4561_v59 }
 0x10b   :  { %4592 = vmatpush3.bf16.msra.mxu1 %v4591_v58 }
 0x10c   :  { %4594 = vmatprep.subr.bf16.mxu1 %v4593_v62 }
 0x10d   :  { %4564 = vmatpush3.bf16.msra.mxu0 %v4563_v3 }
 0x10e   :  { %4566 = vmatprep.subr.bf16.mxu0 %v4565_v5 }
 0x10f   :  { %4596 = vmatpush3.bf16.msra.mxu1 %v4595_v4 }
 0x110   :  { %8 = vsyncpa [#allocation3], 0  ;;  %4598 = vmatprep.subr.bf16.mxu1 %v4597_v9  ;;  %v4601_v22 = vpack.c.bf16 %v598_v15, %v597_v14  ;;  %v582_v23 = vld [vmem:[%s7714_s1 + $0x1148] sm:$0xff]  ;;  %v567_v24 = vld [vmem:[%s7714_s1 + $0x10d0] sm:$0xff]  ;;  %v4571_v29 = vpack.c.bf16 %v550_v20, %v549_v17  ;;  %vm4937_vm0 = vmmov 0   ;;  %vm1177_vm1 = vcmask 1042432  }
 0x111   :  { %v568_v25 = vld [vmem:[%s7714_s1 + $0x10d8] sm:$0xff]  ;;  %v599_v27 = vld [vmem:[%s7714_s1 + $0x11d0] sm:$0xff]  ;;  %4568 = vmatpush3.bf16.msra.mxu0 %v4567_v16  ;;  %v4603_v31 = vpack.c.bf16 %v582_v23, %v581_v21  ;;  %v569_v37 = vld [vmem:[%s7714_s1 + $0x10e0] sm:$0xff]  ;;  %vm4939_vm2 = vmmov 1   ;;  %vm1174_vm4 = vcmask 744448   ;;  %vm3071_vm5 = vcmask 50176  }
 0x112   :  { %v600_v28 = vld [vmem:[%s7714_s1 + $0x11d8] sm:$0xff]  ;;  %4570 = vmatprep.subr.bf16.mxu0 %v4569_v19  ;;  %v4573_v30 = vpack.c.bf16 %v568_v25, %v567_v24  ;;  %v551_v33 = vld [vmem:[%s7714_s1 + $0x1050] sm:$0xff]  ;;  %v570_v38 = vld [vmem:[%s7714_s1 + $0x10e8] sm:$0xff] }
 0x113   :  { %4600 = vmatpush3.bf16.msra.mxu1 %v4599_v18  ;;  %v552_v43 = vld [vmem:[%s7714_s1 + $0x1058] sm:$0xff]  ;;  %v583_v34 = vld [vmem:[%s7714_s1 + $0x1150] sm:$0xff]  ;;  %v4605_v35 = vpack.c.bf16 %v600_v28, %v599_v27  ;;  %v601_v40 = vld [vmem:[%s7714_s1 + $0x11e0] sm:$0xff]  ;;  %v4577_v46 = vpack.c.bf16 %v570_v38, %v569_v37 }
 0x114   :  { %4602 = vmatprep.subr.bf16.mxu1 %v4601_v22  ;;  %v584_v36 = vld [vmem:[%s7714_s1 + $0x1158] sm:$0xff]  ;;  %v602_v42 = vld [vmem:[%s7714_s1 + $0x11e8] sm:$0xff]  ;;  %v4575_v44 = vpack.c.bf16 %v552_v43, %v551_v33  ;;  %v553_v47 = vld [vmem:[%s7714_s1 + $0x1060] sm:$0xff] }
 0x115   :  { %4572 = vmatpush3.bf16.msra.mxu0 %v4571_v29  ;;  %v4607_v45 = vpack.c.bf16 %v584_v36, %v583_v34  ;;  %v554_v48 = vld [vmem:[%s7714_s1 + $0x1068] sm:$0xff]  ;;  %v585_v49 = vld [vmem:[%s7714_s1 + $0x1160] sm:$0xff]  ;;  %v4609_v53 = vpack.c.bf16 %v602_v42, %v601_v40  ;;  %v571_v55 = vld [vmem:[%s7714_s1 + $0x10f0] sm:$0xff] }
 0x116   :  { %4574 = vmatprep.subr.bf16.mxu0 %v4573_v30  ;;  %v586_v54 = vld [vmem:[%s7714_s1 + $0x1168] sm:$0xff]  ;;  %v572_v56 = vld [vmem:[%s7714_s1 + $0x10f8] sm:$0xff]  ;;  %v603_v58 = vld [vmem:[%s7714_s1 + $0x11f0] sm:$0xff]  ;;  %v4579_v61 = vpack.c.bf16 %v554_v48, %v553_v47 }
 0x117   :  { %4604 = vmatpush3.bf16.msra.mxu1 %v4603_v31  ;;  %v3193_v50 = vpop.f32.mrb[2].mxu0  ;;  %v604_v59 = vld [vmem:[%s7714_s1 + $0x11f8] sm:$0xff]  ;;  %v24_v62 = vld [vmem:[%s7713_s0 + $0x48] sm:$0xff]  ;;  %v4611_v63 = vpack.c.bf16 %v586_v54, %v585_v49  ;;  %v4581_v0 = vpack.c.bf16 %v572_v56, %v571_v55  ;;  %v555_v1 = vld [vmem:[%s7714_s1 + $0x1070] sm:$0xff] }
 0x118   :  { %4606 = vmatprep.subr.bf16.mxu1 %v4605_v35  ;;  %v3194_v57 = vpop.f32.mrb[3].mxu0  ;;  %v556_v2 = vld [vmem:[%s7714_s1 + $0x1078] sm:$0xff]  ;;  %v587_v3 = vld [vmem:[%s7714_s1 + $0x1170] sm:$0xff]  ;;  %v4613_v5 = vpack.c.bf16 %v604_v59, %v603_v58  ;;  %v621_v8 = vld [vmem:[%s7714_s1 + $0x1280] sm:$0xff]  ;;  %v1047_v12 = vcombine.high %v24_v62, %v24_v62  ;;  %v6856_v23 = vrot.slane %v24_v62, %v5105_v10 }
 0x119   :  { %v3228_v41 = vpop.f32.mrb[2].mxu1  ;;  %v3195_v51 = vadd.f32 %v3194_v57, %v3193_v50  ;;  %4576 = vmatpush3.bf16.msra.mxu0 %v4575_v44  ;;  %v588_v6 = vld [vmem:[%s7714_s1 + $0x1178] sm:$0xff]  ;;  %v622_v7 = vld [vmem:[%s7714_s1 + $0x1288] sm:$0xff]  ;;  %v653_v9 = vld [vmem:[%s7714_s1 + $0x1380] sm:$0xff]  ;;  %v4583_v13 = vpack.c.bf16 %v556_v2, %v555_v1 }
 0x11a   :  { %v3229_v60 = vpop.f32.mrb[3].mxu1  ;;  %4578 = vmatprep.subr.bf16.mxu0 %v4577_v46  ;;  %v4615_v14 = vpack.c.bf16 %v588_v6, %v587_v3  ;;  %v4617_v15 = vpack.c.bf16 %v622_v7, %v621_v8  ;;  %v605_v16 = vld [vmem:[%s7714_s1 + $0x1200] sm:$0xff]  ;;  %v606_v17 = vld [vmem:[%s7714_s1 + $0x1208] sm:$0xff]  ;;  %v623_v21 = vld [vmem:[%s7714_s1 + $0x1290] sm:$0xff]  ;;  %v6865_v27 = vrot.slane %v1047_v12, %v5105_v10  ;;  %v1062_v38 = vcombine.high %v6856_v23, %v6856_v23 }
 0x11b   :  { %v3230_v32 = vadd.f32 %v3229_v60, %v3228_v41  ;;  %4608 = vmatpush3.bf16.msra.mxu1 %v4607_v45  ;;  %v1388_v4 = vadd.f32 %v3195_v51, %v6625_v26  ;;  %v654_v26 = vld [vmem:[%s7714_s1 + $0x1388] sm:$0xff]  ;;  %v637_v18 = vld [vmem:[%s7714_s1 + $0x1300] sm:$0xff]  ;;  %v624_v22 = vld [vmem:[%s7714_s1 + $0x1298] sm:$0xff]  ;;  %v4619_v28 = vpack.c.bf16 %v606_v17, %v605_v16 }
 0x11c   :  { %4610 = vmatprep.subr.bf16.mxu1 %v4609_v53  ;;  %v4649_v19 = vpack.c.bf16 %v654_v26, %v653_v9  ;;  %v638_v20 = vld [vmem:[%s7714_s1 + $0x1308] sm:$0xff]  ;;  %v655_v24 = vld [vmem:[%s7714_s1 + $0x1390] sm:$0xff]  ;;  %v656_v25 = vld [vmem:[%s7714_s1 + $0x1398] sm:$0xff]  ;;  %v4621_v31 = vpack.c.bf16 %v624_v22, %v623_v21  ;;  %v1063_v44 = vcombine.high %v6865_v27, %v6865_v27 }
 0x11d   :  { %v6835_v11 = vadd.f32 %v3230_v32, %v1388_v4  ;;  %4580 = vmatpush3.bf16.msra.mxu0 %v4579_v61  ;;  %v4651_v29 = vpack.c.bf16 %v638_v20, %v637_v18  ;;  %v607_v30 = vld [vmem:[%s7714_s1 + $0x1210] sm:$0xff]  ;;  %v608_v33 = vld [vmem:[%s7714_s1 + $0x1218] sm:$0xff]  ;;  %v4653_v34 = vpack.c.bf16 %v656_v25, %v655_v24  ;;  %v625_v36 = vld [vmem:[%s7714_s1 + $0x12a0] sm:$0xff] }
 0x11e   :  { %4582 = vmatprep.subr.bf16.mxu0 %v4581_v0  ;;  %v639_v43 = vld [vmem:[%s7714_s1 + $0x1310] sm:$0xff]  ;;  %v640_v35 = vld [vmem:[%s7714_s1 + $0x1318] sm:$0xff]  ;;  %v626_v37 = vld [vmem:[%s7714_s1 + $0x12a8] sm:$0xff]  ;;  %v4623_v45 = vpack.c.bf16 %v608_v33, %v607_v30 }
 0x11f   :  { %4612 = vmatpush3.bf16.msra.mxu1 %v4611_v63  ;;  %v657_v40 = vld [vmem:[%s7714_s1 + $0x13a0] sm:$0xff]  ;;  %v658_v42 = vld [vmem:[%s7714_s1 + $0x13a8] sm:$0xff]  ;;  %v4655_v46 = vpack.c.bf16 %v640_v35, %v639_v43  ;;  %v4625_v47 = vpack.c.bf16 %v626_v37, %v625_v36  ;;  %v627_v53 = vld [vmem:[%s7714_s1 + $0x12b0] sm:$0xff] }
 0x120   :  { %4614 = vmatprep.subr.bf16.mxu1 %v4613_v5  ;;  %v610_v48 = vld [vmem:[%s7714_s1 + $0x1228] sm:$0xff]  ;;  %v641_v49 = vld [vmem:[%s7714_s1 + $0x1320] sm:$0xff]  ;;  %v4657_v50 = vpack.c.bf16 %v658_v42, %v657_v40  ;;  %v628_v54 = vld [vmem:[%s7714_s1 + $0x12b8] sm:$0xff] }
 0x121   :  { %4584 = vmatpush3.bf16.msra.mxu0 %v4583_v13  ;;  %v659_v55 = vld [vmem:[%s7714_s1 + $0x13b0] sm:$0xff]  ;;  %v660_v56 = vld [vmem:[%s7714_s1 + $0x13b8] sm:$0xff]  ;;  %v4629_v58 = vpack.c.bf16 %v628_v54, %v627_v53  ;;  %v629_v32 = vld [vmem:[%s7714_s1 + $0x12c0] sm:$0xff] }
 0x122   :  { %4618 = vmatprep.subr.bf16.mxu0 %v4617_v15  ;;  %v611_v59 = vld [vmem:[%s7714_s1 + $0x1230] sm:$0xff]  ;;  %v612_v51 = vld [vmem:[%s7714_s1 + $0x1238] sm:$0xff]  ;;  %v4661_v61 = vpack.c.bf16 %v660_v56, %v659_v55  ;;  %v630_v63 = vld [vmem:[%s7714_s1 + $0x12c8] sm:$0xff] }
 0x123   :  { %4616 = vmatpush3.bf16.msra.mxu1 %v4615_v14  ;;  %v643_v60 = vld [vmem:[%s7714_s1 + $0x1330] sm:$0xff]  ;;  %v644_v62 = vld [vmem:[%s7714_s1 + $0x1338] sm:$0xff]  ;;  %v661_v0 = vld [vmem:[%s7714_s1 + $0x13c0] sm:$0xff]  ;;  %v4631_v2 = vpack.c.bf16 %v612_v51, %v611_v59  ;;  %v4633_v4 = vpack.c.bf16 %v630_v63, %v629_v32 }
 0x124   :  { %4650 = vmatprep.subr.bf16.mxu1 %v4649_v19  ;;  %2366 = vmatmul.mubr.f32.vlgmr.msra.gmra.mrb[16].mxu0 %v6646_v52  ;;  %v609_v52 = vld [vmem:[%s7714_s1 + $0x1220] sm:$0xff]  ;;  %v662_v1 = vld [vmem:[%s7714_s1 + $0x13c8] sm:$0xff]  ;;  %v4663_v3 = vpack.c.bf16 %v644_v62, %v643_v60  ;;  %v631_v26 = vld [vmem:[%s7714_s1 + $0x12d0] sm:$0xff] }
 0x125   :  { %4620 = vmatpush3.bf16.msra.mxu0 %v4619_v28  ;;  %2505 = vmatprep.mubr.f32.mxu0 %v1062_v38  ;;  %v4627_v57 = vpack.c.bf16 %v610_v48, %v609_v52  ;;  %v613_v5 = vld [vmem:[%s7714_s1 + $0x1240] sm:$0xff]  ;;  %v614_v6 = vld [vmem:[%s7714_s1 + $0x1248] sm:$0xff]  ;;  %v4665_v7 = vpack.c.bf16 %v662_v1, %v661_v0  ;;  %v632_v12 = vld [vmem:[%s7714_s1 + $0x12d8] sm:$0xff] }
 0x126   :  { %2436 = vmatmul.mubr.f32.vlgmr.msra.gmra.mrb[16].mxu1 %v6655_v39  ;;  %4622 = vmatprep.subr.bf16.mxu0 %v4621_v31  ;;  %v642_v39 = vld [vmem:[%s7714_s1 + $0x1328] sm:$0xff]  ;;  %v645_v8 = vld [vmem:[%s7714_s1 + $0x1340] sm:$0xff]  ;;  %v663_v13 = vld [vmem:[%s7714_s1 + $0x13d0] sm:$0xff]  ;;  %v4635_v15 = vpack.c.bf16 %v614_v6, %v613_v5  ;;  %v4637_v17 = vpack.c.bf16 %v632_v12, %v631_v26 }
 0x127   :  { %4652 = vmatpush3.bf16.msra.mxu1 %v4651_v29  ;;  %2575 = vmatprep.mubr.f32.mxu1 %v1063_v44  ;;  %v4659_v41 = vpack.c.bf16 %v642_v39, %v641_v49  ;;  %v646_v9 = vld [vmem:[%s7714_s1 + $0x1348] sm:$0xff]  ;;  %v664_v14 = vld [vmem:[%s7714_s1 + $0x13d8] sm:$0xff]  ;;  %v615_v18 = vld [vmem:[%s7714_s1 + $0x1250] sm:$0xff] }
 0x128   :  { %4654 = vmatprep.subr.bf16.mxu1 %v4653_v34  ;;  %v4667_v16 = vpack.c.bf16 %v646_v9, %v645_v8  ;;  %v616_v19 = vld [vmem:[%s7714_s1 + $0x1258] sm:$0xff]  ;;  %v647_v20 = vld [vmem:[%s7714_s1 + $0x1350] sm:$0xff]  ;;  %v4669_v21 = vpack.c.bf16 %v664_v14, %v663_v13  ;;  %v633_v24 = vld [vmem:[%s7714_s1 + $0x12e0] sm:$0xff] }
 0x129   :  { %4624 = vmatpush3.bf16.msra.mxu0 %v4623_v45  ;;  %v648_v22 = vld [vmem:[%s7714_s1 + $0x1358] sm:$0xff]  ;;  %v634_v25 = vld [vmem:[%s7714_s1 + $0x12e8] sm:$0xff]  ;;  %v665_v28 = vld [vmem:[%s7714_s1 + $0x13e0] sm:$0xff]  ;;  %v4639_v31 = vpack.c.bf16 %v616_v19, %v615_v18 }
 0x12a   :  { %4626 = vmatprep.subr.bf16.mxu0 %v4625_v47  ;;  %v666_v29 = vld [vmem:[%s7714_s1 + $0x13e8] sm:$0xff]  ;;  %v4671_v30 = vpack.c.bf16 %v648_v22, %v647_v20  ;;  %v4641_v33 = vpack.c.bf16 %v634_v25, %v633_v24  ;;  %v617_v43 = vld [vmem:[%s7714_s1 + $0x1260] sm:$0xff]  ;;  %v635_v40 = vld [vmem:[%s7714_s1 + $0x12f0] sm:$0xff] }
 0x12b   :  { %4656 = vmatpush3.bf16.msra.mxu1 %v4655_v46  ;;  %v618_v34 = vld [vmem:[%s7714_s1 + $0x1268] sm:$0xff]  ;;  %v649_v35 = vld [vmem:[%s7714_s1 + $0x1360] sm:$0xff]  ;;  %v4673_v37 = vpack.c.bf16 %v666_v29, %v665_v28  ;;  %v636_v42 = vld [vmem:[%s7714_s1 + $0x12f8] sm:$0xff] }
 0x12c   :  { %4658 = vmatprep.subr.bf16.mxu1 %v4657_v50  ;;  %v650_v38 = vld [vmem:[%s7714_s1 + $0x1368] sm:$0xff]  ;;  %v667_v46 = vld [vmem:[%s7714_s1 + $0x13f0] sm:$0xff]  ;;  %v668_v47 = vld [vmem:[%s7714_s1 + $0x13f8] sm:$0xff]  ;;  %v4643_v49 = vpack.c.bf16 %v618_v34, %v617_v43  ;;  %v4645_v54 = vpack.c.bf16 %v636_v42, %v635_v40 }
 0x12d   :  { %4628 = vmatpush3.bf16.msra.mxu0 %v4627_v57  ;;  %v25_v50 = vld [vmem:[%s7713_s0 + $0x50] sm:$0xff]  ;;  %v4675_v53 = vpack.c.bf16 %v650_v38, %v649_v35  ;;  %v620_v56 = vld [vmem:[%s7714_s1 + $0x1278] sm:$0xff]  ;;  %v685_v51 = vld [vmem:[%s7714_s1 + $0x1480] sm:$0xff] }
 0x12e   :  { %4630 = vmatprep.subr.bf16.mxu0 %v4629_v58  ;;  %v619_v55 = vld [vmem:[%s7714_s1 + $0x1270] sm:$0xff]  ;;  %v4677_v58 = vpack.c.bf16 %v668_v47, %v667_v46  ;;  %v652_v59 = vld [vmem:[%s7714_s1 + $0x1378] sm:$0xff]  ;;  %v686_v60 = vld [vmem:[%s7714_s1 + $0x1488] sm:$0xff]  ;;  %v1064_v62 = vcombine.high %v25_v50, %v25_v50  ;;  %v7066_v9 = vrot.slane %v25_v50, %v5105_v10 }
 0x12f   :  { %4660 = vmatpush3.bf16.msra.mxu1 %v4659_v41  ;;  %v651_v57 = vld [vmem:[%s7714_s1 + $0x1370] sm:$0xff]  ;;  %v4647_v63 = vpack.c.bf16 %v620_v56, %v619_v55  ;;  %v4681_v1 = vpack.c.bf16 %v686_v60, %v685_v51  ;;  %v702_v6 = vld [vmem:[%s7714_s1 + $0x1508] sm:$0xff]  ;;  %v720_v12 = vld [vmem:[%s7714_s1 + $0x1598] sm:$0xff] }
 0x130   :  { %4662 = vmatprep.subr.bf16.mxu1 %v4661_v61  ;;  %v717_v61 = vld [vmem:[%s7714_s1 + $0x1580] sm:$0xff]  ;;  %v4679_v0 = vpack.c.bf16 %v652_v59, %v651_v57  ;;  %v687_v8 = vld [vmem:[%s7714_s1 + $0x1490] sm:$0xff]  ;;  %v7075_v13 = vrot.slane %v1064_v62, %v5105_v10  ;;  %v672_v18 = vld [vmem:[%s7714_s1 + $0x1418] sm:$0xff]  ;;  %v1079_v25 = vcombine.high %v7066_v9, %v7066_v9 }
 0x131   :  { %4632 = vmatpush3.bf16.msra.mxu0 %v4631_v2  ;;  %v669_v2 = vld [vmem:[%s7714_s1 + $0x1400] sm:$0xff]  ;;  %v719_v26 = vld [vmem:[%s7714_s1 + $0x1590] sm:$0xff]  ;;  %v690_v24 = vld [vmem:[%s7714_s1 + $0x14a8] sm:$0xff] }
 0x132   :  { %4634 = vmatprep.subr.bf16.mxu0 %v4633_v4  ;;  %v701_v4 = vld [vmem:[%s7714_s1 + $0x1500] sm:$0xff]  ;;  %v703_v19 = vld [vmem:[%s7714_s1 + $0x1510] sm:$0xff]  ;;  %v4717_v20 = vpack.c.bf16 %v720_v12, %v719_v26  ;;  %v722_v29 = vld [vmem:[%s7714_s1 + $0x15a8] sm:$0xff] }
 0x133   :  { %4664 = vmatpush3.bf16.msra.mxu1 %v4663_v3  ;;  %v670_v3 = vld [vmem:[%s7714_s1 + $0x1408] sm:$0xff]  ;;  %v689_v22 = vld [vmem:[%s7714_s1 + $0x14a0] sm:$0xff]  ;;  %v692_v38 = vld [vmem:[%s7714_s1 + $0x14b8] sm:$0xff] }
 0x134   :  { %4666 = vmatprep.subr.bf16.mxu1 %v4665_v7  ;;  %v688_v7 = vld [vmem:[%s7714_s1 + $0x1498] sm:$0xff]  ;;  %v4683_v14 = vpack.c.bf16 %v670_v3, %v669_v2  ;;  %v721_v28 = vld [vmem:[%s7714_s1 + $0x15a0] sm:$0xff]  ;;  %v4689_v43 = vpack.c.bf16 %v690_v24, %v689_v22  ;;  %v674_v34 = vld [vmem:[%s7714_s1 + $0x1428] sm:$0xff] }
 0x135   :  { %4636 = vmatpush3.bf16.msra.mxu0 %v4635_v15  ;;  %v4715_v15 = vpack.c.bf16 %v702_v6, %v701_v4  ;;  %v705_v35 = vld [vmem:[%s7714_s1 + $0x1520] sm:$0xff]  ;;  %v723_v40 = vld [vmem:[%s7714_s1 + $0x15b0] sm:$0xff]  ;;  %v724_v42 = vld [vmem:[%s7714_s1 + $0x15b8] sm:$0xff] }
 0x136   :  { %4638 = vmatprep.subr.bf16.mxu0 %v4637_v17  ;;  %v671_v17 = vld [vmem:[%s7714_s1 + $0x1410] sm:$0xff]  ;;  %v708_v50 = vld [vmem:[%s7714_s1 + $0x1538] sm:$0xff]  ;;  %v726_v55 = vld [vmem:[%s7714_s1 + $0x15c8] sm:$0xff] }
 0x137   :  { %4668 = vmatpush3.bf16.msra.mxu1 %v4667_v16  ;;  %v3263_v36 = vpop.f32.mrb[4].mxu0  ;;  %v4685_v16 = vpack.c.bf16 %v688_v7, %v687_v8  ;;  %v675_v47 = vld [vmem:[%s7714_s1 + $0x1430] sm:$0xff]  ;;  %v678_v59 = vld [vmem:[%s7714_s1 + $0x1448] sm:$0xff]  ;;  %v709_v51 = vld [vmem:[%s7714_s1 + $0x1540] sm:$0xff] }
 0x138   :  { %4670 = vmatprep.subr.bf16.mxu1 %v4669_v21  ;;  %v3264_v44 = vpop.f32.mrb[5].mxu0  ;;  %v704_v21 = vld [vmem:[%s7714_s1 + $0x1518] sm:$0xff]  ;;  %v679_v4 = vld [vmem:[%s7714_s1 + $0x1450] sm:$0xff]  ;;  %v697_v26 = vld [vmem:[%s7714_s1 + $0x14e0] sm:$0xff] }
 0x139   :  { %v3298_v45 = vpop.f32.mrb[4].mxu1  ;;  %v3265_v52 = vadd.f32 %v3264_v44, %v3263_v36  ;;  %4640 = vmatpush3.bf16.msra.mxu0 %v4639_v31  ;;  %v1080_v31 = vcombine.high %v7075_v13, %v7075_v13  ;;  %v4721_v36 = vpack.c.bf16 %v722_v29, %v721_v28  ;;  %v696_v62 = vld [vmem:[%s7714_s1 + $0x14d8] sm:$0xff]  ;;  %v711_v6 = vld [vmem:[%s7714_s1 + $0x1550] sm:$0xff]  ;;  %v698_v12 = vld [vmem:[%s7714_s1 + $0x14e8] sm:$0xff] }
 0x13a   :  { %v3299_v48 = vpop.f32.mrb[5].mxu1  ;;  %4642 = vmatprep.subr.bf16.mxu0 %v4641_v33  ;;  %v4719_v33 = vpack.c.bf16 %v704_v21, %v703_v19  ;;  %v712_v7 = vld [vmem:[%s7714_s1 + $0x1558] sm:$0xff]  ;;  %v681_v19 = vld [vmem:[%s7714_s1 + $0x1460] sm:$0xff]  ;;  %v699_v28 = vld [vmem:[%s7714_s1 + $0x14f0] sm:$0xff] }
 0x13b   :  { %v3300_v39 = vadd.f32 %v3299_v48, %v3298_v45  ;;  %4672 = vmatpush3.bf16.msra.mxu1 %v4671_v30  ;;  %v1528_v41 = vadd.f32 %v3265_v52, %v6835_v11  ;;  %v718_v11 = vld [vmem:[%s7714_s1 + $0x1588] sm:$0xff]  ;;  %v4687_v30 = vpack.c.bf16 %v672_v18, %v671_v17  ;;  %v676_v52 = vld [vmem:[%s7714_s1 + $0x1438] sm:$0xff]  ;;  %v707_v48 = vld [vmem:[%s7714_s1 + $0x1530] sm:$0xff]  ;;  %v4735_v17 = vpack.c.bf16 %v712_v7, %v711_v6 }
 0x13c   :  { %4674 = vmatprep.subr.bf16.mxu1 %v4673_v37  ;;  %v4713_v5 = vpack.c.bf16 %v718_v11, %v717_v61  ;;  %v691_v37 = vld [vmem:[%s7714_s1 + $0x14b0] sm:$0xff]  ;;  %v4695_v56 = vpack.c.bf16 %v676_v52, %v675_v47  ;;  %v4727_v57 = vpack.c.bf16 %v708_v50, %v707_v48  ;;  %v710_v61 = vld [vmem:[%s7714_s1 + $0x1548] sm:$0xff]  ;;  %v4705_v18 = vpack.c.bf16 %v698_v12, %v697_v26  ;;  %v713_v21 = vld [vmem:[%s7714_s1 + $0x1560] sm:$0xff] }
 0x13d   :  { %v7045_v32 = vadd.f32 %v3300_v39, %v1528_v41  ;;  %4644 = vmatpush3.bf16.msra.mxu0 %v4643_v49  ;;  %v4693_v46 = vpack.c.bf16 %v692_v38, %v691_v37  ;;  %v4725_v49 = vpack.c.bf16 %v724_v42, %v723_v40  ;;  %v693_v39 = vld [vmem:[%s7714_s1 + $0x14c0] sm:$0xff]  ;;  %v695_v11 = vld [vmem:[%s7714_s1 + $0x14d0] sm:$0xff]  ;;  %v4731_v2 = vpack.c.bf16 %v710_v61, %v709_v51  ;;  %v700_v29 = vld [vmem:[%s7714_s1 + $0x14f8] sm:$0xff] }
 0x13e   :  { %4646 = vmatprep.subr.bf16.mxu0 %v4645_v54  ;;  %v725_v54 = vld [vmem:[%s7714_s1 + $0x15c0] sm:$0xff]  ;;  %v4701_v3 = vpack.c.bf16 %v696_v62, %v695_v11  ;;  %v4709_v38 = vpack.c.bf16 %v700_v29, %v699_v28  ;;  %v683_v40 = vld [vmem:[%s7714_s1 + $0x1470] sm:$0xff]  ;;  %v684_v42 = vld [vmem:[%s7714_s1 + $0x1478] sm:$0xff] }
 0x13f   :  { %4676 = vmatpush3.bf16.msra.mxu1 %v4675_v53  ;;  %v694_v53 = vld [vmem:[%s7714_s1 + $0x14c8] sm:$0xff]  ;;  %v4729_v60 = vpack.c.bf16 %v726_v55, %v725_v54  ;;  %v716_v47 = vld [vmem:[%s7714_s1 + $0x1578] sm:$0xff]  ;;  %v749_v52 = vld [vmem:[%s7714_s1 + $0x1680] sm:$0xff] }
 0x140   :  { %4678 = vmatprep.subr.bf16.mxu1 %v4677_v58  ;;  %v4697_v41 = vpack.c.bf16 %v694_v53, %v693_v39  ;;  %v677_v58 = vld [vmem:[%s7714_s1 + $0x1440] sm:$0xff]  ;;  %v750_v48 = vld [vmem:[%s7714_s1 + $0x1688] sm:$0xff]  ;;  %v4711_v53 = vpack.c.bf16 %v684_v42, %v683_v40  ;;  %v751_v51 = vld [vmem:[%s7714_s1 + $0x1690] sm:$0xff] }
 0x141   :  { %4648 = vmatpush3.bf16.msra.mxu0 %v4647_v63  ;;  %v727_v63 = vld [vmem:[%s7714_s1 + $0x15d0] sm:$0xff]  ;;  %v4745_v55 = vpack.c.bf16 %v750_v48, %v749_v52  ;;  %v784_v62 = vld [vmem:[%s7714_s1 + $0x1798] sm:$0xff]  ;;  %v753_v7 = vld [vmem:[%s7714_s1 + $0x16a0] sm:$0xff] }
 0x142   :  { %4682 = vmatprep.subr.bf16.mxu0 %v4681_v1  ;;  %v4699_v1 = vpack.c.bf16 %v678_v59, %v677_v58  ;;  %v766_v59 = vld [vmem:[%s7714_s1 + $0x1708] sm:$0xff]  ;;  %v783_v11 = vld [vmem:[%s7714_s1 + $0x1790] sm:$0xff]  ;;  %v788_v29 = vld [vmem:[%s7714_s1 + $0x17b8] sm:$0xff] }
 0x143   :  { %4680 = vmatpush3.bf16.msra.mxu1 %v4679_v0  ;;  %v728_v0 = vld [vmem:[%s7714_s1 + $0x15d8] sm:$0xff]  ;;  %v4781_v6 = vpack.c.bf16 %v784_v62, %v783_v11  ;;  %v754_v26 = vld [vmem:[%s7714_s1 + $0x16a8] sm:$0xff]  ;;  %v787_v28 = vld [vmem:[%s7714_s1 + $0x17b0] sm:$0xff] }
 0x144   :  { %4714 = vmatprep.subr.bf16.mxu1 %v4713_v5  ;;  %2506 = vmatmul.mubr.f32.vlgmr.msra.gmra.mrb[18].mxu0 %v6856_v23  ;;  %v673_v23 = vld [vmem:[%s7714_s1 + $0x1420] sm:$0xff]  ;;  %v680_v5 = vld [vmem:[%s7714_s1 + $0x1458] sm:$0xff]  ;;  %v4733_v8 = vpack.c.bf16 %v728_v0, %v727_v63  ;;  %v790_v40 = vld [vmem:[%s7714_s1 + $0x17c8] sm:$0xff] }
 0x145   :  { %4684 = vmatpush3.bf16.msra.mxu0 %v4683_v14  ;;  %2645 = vmatprep.mubr.f32.mxu0 %v1079_v25  ;;  %v4691_v44 = vpack.c.bf16 %v674_v34, %v673_v23  ;;  %v729_v14 = vld [vmem:[%s7714_s1 + $0x15e0] sm:$0xff]  ;;  %v714_v25 = vld [vmem:[%s7714_s1 + $0x1568] sm:$0xff]  ;;  %vm4890_vm3 = vmpackc.low %vm1177_vm1, %vm4939_vm2 }
 0x146   :  { %2576 = vmatmul.mubr.f32.vlgmr.msra.gmra.mrb[18].mxu1 %v6865_v27  ;;  %4686 = vmatprep.subr.bf16.mxu0 %v4685_v16  ;;  %v706_v27 = vld [vmem:[%s7714_s1 + $0x1528] sm:$0xff]  ;;  %v4703_v16 = vpack.c.bf16 %v680_v5, %v679_v4  ;;  %v4739_v37 = vpack.c.bf16 %v714_v25, %v713_v21  ;;  %v736_v4 = vld [vmem:[%s7714_s1 + $0x1618] sm:$0xff]  ;;  %v767_v5 = vld [vmem:[%s7714_s1 + $0x1710] sm:$0xff] }
 0x147   :  { %4716 = vmatpush3.bf16.msra.mxu1 %v4715_v15  ;;  %2715 = vmatprep.mubr.f32.mxu1 %v1080_v31  ;;  %v4723_v45 = vpack.c.bf16 %v706_v27, %v705_v35  ;;  %v730_v15 = vld [vmem:[%s7714_s1 + $0x15e8] sm:$0xff]  ;;  %v769_v21 = vld [vmem:[%s7714_s1 + $0x1720] sm:$0xff]  ;;  %v756_v25 = vld [vmem:[%s7714_s1 + $0x16b8] sm:$0xff] }
 0x148   :  { %4718 = vmatprep.subr.bf16.mxu1 %v4717_v20  ;;  %v682_v20 = vld [vmem:[%s7714_s1 + $0x1468] sm:$0xff]  ;;  %v4737_v24 = vpack.c.bf16 %v730_v15, %v729_v14  ;;  %v785_v14 = vld [vmem:[%s7714_s1 + $0x17a0] sm:$0xff] }
 0x149   :  { %4688 = vmatpush3.bf16.msra.mxu0 %v4687_v30  ;;  %v4707_v35 = vpack.c.bf16 %v682_v20, %v681_v19  ;;  %v786_v15 = vld [vmem:[%s7714_s1 + $0x17a8] sm:$0xff]  ;;  %v4753_v19 = vpack.c.bf16 %v754_v26, %v753_v7  ;;  %v773_v52 = vld [vmem:[%s7714_s1 + $0x1740] sm:$0xff] }
 0x14a   :  { %4690 = vmatprep.subr.bf16.mxu0 %v4689_v43  ;;  %v732_v43 = vld [vmem:[%s7714_s1 + $0x15f8] sm:$0xff]  ;;  %v738_v20 = vld [vmem:[%s7714_s1 + $0x1628] sm:$0xff]  ;;  %v761_v11 = vld [vmem:[%s7714_s1 + $0x16e0] sm:$0xff] }
 0x14b   :  { %4720 = vmatpush3.bf16.msra.mxu1 %v4719_v33  ;;  %v731_v33 = vld [vmem:[%s7714_s1 + $0x15f0] sm:$0xff]  ;;  %v762_v62 = vld [vmem:[%s7714_s1 + $0x16e8] sm:$0xff] }
 0x14c   :  { %4722 = vmatprep.subr.bf16.mxu1 %v4721_v36  ;;  %v26_v36 = vld [vmem:[%s7713_s0 + $0x58] sm:$0xff] }
 0x14d   :  { %4692 = vmatpush3.bf16.msra.mxu0 %v4691_v44  ;;  %v715_v44 = vld [vmem:[%s7714_s1 + $0x1570] sm:$0xff]  ;;  %v1081_v50 = vcombine.high %v26_v36, %v26_v36  ;;  %v7276_v61 = vrot.slane %v26_v36, %v5105_v10  ;;  %v772_v36 = vld [vmem:[%s7714_s1 + $0x1738] sm:$0xff] }
 0x14e   :  { %4694 = vmatprep.subr.bf16.mxu0 %v4693_v46  ;;  %v4741_v46 = vpack.c.bf16 %v732_v43, %v731_v33  ;;  %v4743_v54 = vpack.c.bf16 %v716_v47, %v715_v44  ;;  %v739_v43 = vld [vmem:[%s7714_s1 + $0x1630] sm:$0xff]  ;;  %v742_v47 = vld [vmem:[%s7714_s1 + $0x1648] sm:$0xff] }
 0x14f   :  { %4724 = vmatpush3.bf16.msra.mxu1 %v4723_v45  ;;  %v7285_v63 = vrot.slane %v1081_v50, %v5105_v10  ;;  %v1096_v12 = vcombine.high %v7276_v61, %v7276_v61  ;;  %v760_v50 = vld [vmem:[%s7714_s1 + $0x16d8] sm:$0xff] }
 0x150   :  { %4726 = vmatprep.subr.bf16.mxu1 %v4725_v49  ;;  %v781_v49 = vld [vmem:[%s7714_s1 + $0x1780] sm:$0xff] }
 0x151   :  { %4696 = vmatpush3.bf16.msra.mxu0 %v4695_v56  ;;  %v733_v56 = vld [vmem:[%s7714_s1 + $0x1600] sm:$0xff] }
 0x152   :  { %4698 = vmatprep.subr.bf16.mxu0 %v4697_v41  ;;  %v765_v41 = vld [vmem:[%s7714_s1 + $0x1700] sm:$0xff] }
 0x153   :  { %4728 = vmatpush3.bf16.msra.mxu1 %v4727_v57  ;;  %v734_v57 = vld [vmem:[%s7714_s1 + $0x1608] sm:$0xff] }
 0x154   :  { %4730 = vmatprep.subr.bf16.mxu1 %v4729_v60  ;;  %v752_v60 = vld [vmem:[%s7714_s1 + $0x1698] sm:$0xff]  ;;  %v4747_v0 = vpack.c.bf16 %v734_v57, %v733_v56 }
 0x155   :  { %4700 = vmatpush3.bf16.msra.mxu0 %v4699_v1  ;;  %v4779_v1 = vpack.c.bf16 %v766_v59, %v765_v41  ;;  %v743_v41 = vld [vmem:[%s7714_s1 + $0x1650] sm:$0xff] }
 0x156   :  { %4702 = vmatprep.subr.bf16.mxu0 %v4701_v3  ;;  %v735_v3 = vld [vmem:[%s7714_s1 + $0x1610] sm:$0xff] }
 0x157   :  { %4732 = vmatpush3.bf16.msra.mxu1 %v4731_v2  ;;  %v3333_v22 = vpop.f32.mrb[6].mxu0  ;;  %v4749_v2 = vpack.c.bf16 %v752_v60, %v751_v51  ;;  %v775_v59 = vld [vmem:[%s7714_s1 + $0x1750] sm:$0xff]  ;;  %v776_v60 = vld [vmem:[%s7714_s1 + $0x1758] sm:$0xff] }
 0x158   :  { %4734 = vmatprep.subr.bf16.mxu1 %v4733_v8  ;;  %v3334_v31 = vpop.f32.mrb[7].mxu0  ;;  %v768_v8 = vld [vmem:[%s7714_s1 + $0x1718] sm:$0xff] }
 0x159   :  { %v3368_v30 = vpop.f32.mrb[6].mxu1  ;;  %v3335_v23 = vadd.f32 %v3334_v31, %v3333_v22  ;;  %4704 = vmatpush3.bf16.msra.mxu0 %v4703_v16  ;;  %v1097_v16 = vcombine.high %v7285_v63, %v7285_v63  ;;  %v4785_v22 = vpack.c.bf16 %v786_v15, %v785_v14  ;;  %v763_v14 = vld [vmem:[%s7714_s1 + $0x16f0] sm:$0xff]  ;;  %v764_v15 = vld [vmem:[%s7714_s1 + $0x16f8] sm:$0xff] }
 0x15a   :  { %v3369_v34 = vpop.f32.mrb[7].mxu1  ;;  %4706 = vmatprep.subr.bf16.mxu0 %v4705_v18  ;;  %v4783_v18 = vpack.c.bf16 %v768_v8, %v767_v5  ;;  %v745_v5 = vld [vmem:[%s7714_s1 + $0x1660] sm:$0xff] }
 0x15b   :  { %v3370_v27 = vadd.f32 %v3369_v34, %v3368_v30  ;;  %4736 = vmatpush3.bf16.msra.mxu1 %v4735_v17  ;;  %v1668_v45 = vadd.f32 %v3335_v23, %v7045_v32  ;;  %v782_v32 = vld [vmem:[%s7714_s1 + $0x1788] sm:$0xff]  ;;  %v4751_v17 = vpack.c.bf16 %v736_v4, %v735_v3  ;;  %v740_v23 = vld [vmem:[%s7714_s1 + $0x1638] sm:$0xff]  ;;  %v771_v34 = vld [vmem:[%s7714_s1 + $0x1730] sm:$0xff]  ;;  %v4799_v3 = vpack.c.bf16 %v776_v60, %v775_v59 }
 0x15c   :  { %4738 = vmatprep.subr.bf16.mxu1 %v4737_v24  ;;  %v4777_v58 = vpack.c.bf16 %v782_v32, %v781_v49  ;;  %v755_v24 = vld [vmem:[%s7714_s1 + $0x16b0] sm:$0xff]  ;;  %v4759_v42 = vpack.c.bf16 %v740_v23, %v739_v43  ;;  %v4791_v44 = vpack.c.bf16 %v772_v36, %v771_v34  ;;  %v774_v49 = vld [vmem:[%s7714_s1 + $0x1748] sm:$0xff]  ;;  %v4769_v4 = vpack.c.bf16 %v762_v62, %v761_v11  ;;  %v777_v8 = vld [vmem:[%s7714_s1 + $0x1760] sm:$0xff] }
 0x15d   :  { %v7255_v39 = vadd.f32 %v3370_v27, %v1668_v45  ;;  %4708 = vmatpush3.bf16.msra.mxu0 %v4707_v35  ;;  %v4757_v33 = vpack.c.bf16 %v756_v25, %v755_v24  ;;  %v4789_v35 = vpack.c.bf16 %v788_v29, %v787_v28  ;;  %v757_v27 = vld [vmem:[%s7714_s1 + $0x16c0] sm:$0xff]  ;;  %v759_v32 = vld [vmem:[%s7714_s1 + $0x16d0] sm:$0xff]  ;;  %v4795_v56 = vpack.c.bf16 %v774_v49, %v773_v52  ;;  %v748_v29 = vld [vmem:[%s7714_s1 + $0x1678] sm:$0xff] }
 0x15e   :  { %4710 = vmatprep.subr.bf16.mxu0 %v4709_v38  ;;  %v789_v38 = vld [vmem:[%s7714_s1 + $0x17c0] sm:$0xff]  ;;  %v4765_v57 = vpack.c.bf16 %v760_v50, %v759_v32  ;;  %v4773_v25 = vpack.c.bf16 %v764_v15, %v763_v14  ;;  %v747_v28 = vld [vmem:[%s7714_s1 + $0x1670] sm:$0xff]  ;;  %v780_v43 = vld [vmem:[%s7714_s1 + $0x1778] sm:$0xff] }
 0x15f   :  { %4740 = vmatpush3.bf16.msra.mxu1 %v4739_v37  ;;  %v758_v37 = vld [vmem:[%s7714_s1 + $0x16c8] sm:$0xff]  ;;  %v4793_v48 = vpack.c.bf16 %v790_v40, %v789_v38  ;;  %v813_v23 = vld [vmem:[%s7714_s1 + $0x1880] sm:$0xff]  ;;  %v815_v52 = vld [vmem:[%s7714_s1 + $0x1890] sm:$0xff] }
 0x160   :  { %4742 = vmatprep.subr.bf16.mxu1 %v4741_v46  ;;  %v4761_v45 = vpack.c.bf16 %v758_v37, %v757_v27  ;;  %v741_v46 = vld [vmem:[%s7714_s1 + $0x1640] sm:$0xff]  ;;  %v814_v34 = vld [vmem:[%s7714_s1 + $0x1888] sm:$0xff]  ;;  %v4775_v37 = vpack.c.bf16 %v748_v29, %v747_v28  ;;  %v847_v32 = vld [vmem:[%s7714_s1 + $0x1990] sm:$0xff] }
 0x161   :  { %4712 = vmatpush3.bf16.msra.mxu0 %v4711_v53  ;;  %v791_v53 = vld [vmem:[%s7714_s1 + $0x17d0] sm:$0xff]  ;;  %v4809_v40 = vpack.c.bf16 %v814_v34, %v813_v23  ;;  %v848_v50 = vld [vmem:[%s7714_s1 + $0x1998] sm:$0xff]  ;;  %v818_v60 = vld [vmem:[%s7714_s1 + $0x18a8] sm:$0xff] }
 0x162   :  { %4746 = vmatprep.subr.bf16.mxu0 %v4745_v55  ;;  %v4763_v55 = vpack.c.bf16 %v742_v47, %v741_v46  ;;  %v830_v47 = vld [vmem:[%s7714_s1 + $0x1908] sm:$0xff]  ;;  %v832_v59 = vld [vmem:[%s7714_s1 + $0x1918] sm:$0xff]  ;;  %v849_v62 = vld [vmem:[%s7714_s1 + $0x19a0] sm:$0xff] }
 0x163   :  { %4744 = vmatpush3.bf16.msra.mxu1 %v4743_v54  ;;  %v792_v54 = vld [vmem:[%s7714_s1 + $0x17d8] sm:$0xff]  ;;  %v838_v34 = vld [vmem:[%s7714_s1 + $0x1948] sm:$0xff] }
 0x164   :  { %4778 = vmatprep.subr.bf16.mxu1 %v4777_v58  ;;  %2646 = vmatmul.mubr.f32.vlgmr.msra.gmra.mrb[20].mxu0 %v7066_v9  ;;  %v737_v9 = vld [vmem:[%s7714_s1 + $0x1620] sm:$0xff]  ;;  %v744_v58 = vld [vmem:[%s7714_s1 + $0x1658] sm:$0xff]  ;;  %v4797_v51 = vpack.c.bf16 %v792_v54, %v791_v53 }
 0x165   :  { %4748 = vmatpush3.bf16.msra.mxu0 %v4747_v0  ;;  %2785 = vmatprep.mubr.f32.mxu0 %v1096_v12  ;;  %v4755_v31 = vpack.c.bf16 %v738_v20, %v737_v9  ;;  %v793_v0 = vld [vmem:[%s7714_s1 + $0x17e0] sm:$0xff]  ;;  %v778_v12 = vld [vmem:[%s7714_s1 + $0x1768] sm:$0xff]  ;;  %v852_v14 = vld [vmem:[%s7714_s1 + $0x19b8] sm:$0xff] }
 0x166   :  { %2716 = vmatmul.mubr.f32.vlgmr.msra.gmra.mrb[20].mxu1 %v7075_v13  ;;  %4750 = vmatprep.subr.bf16.mxu0 %v4749_v2  ;;  %v770_v13 = vld [vmem:[%s7714_s1 + $0x1728] sm:$0xff]  ;;  %v4767_v2 = vpack.c.bf16 %v744_v58, %v743_v41  ;;  %v4803_v24 = vpack.c.bf16 %v778_v12, %v777_v8  ;;  %v800_v41 = vld [vmem:[%s7714_s1 + $0x1818] sm:$0xff]  ;;  %v831_v58 = vld [vmem:[%s7714_s1 + $0x1910] sm:$0xff] }
 0x167   :  { %4780 = vmatpush3.bf16.msra.mxu1 %v4779_v1  ;;  %2855 = vmatprep.mubr.f32.mxu1 %v1097_v16  ;;  %v4787_v30 = vpack.c.bf16 %v770_v13, %v769_v21  ;;  %v794_v1 = vld [vmem:[%s7714_s1 + $0x17e8] sm:$0xff]  ;;  %v851_v12 = vld [vmem:[%s7714_s1 + $0x19b0] sm:$0xff] }
 0x168   :  { %4782 = vmatprep.subr.bf16.mxu1 %v4781_v6  ;;  %v746_v6 = vld [vmem:[%s7714_s1 + $0x1668] sm:$0xff]  ;;  %v4801_v26 = vpack.c.bf16 %v794_v1, %v793_v0 }
 0x169   :  { %4752 = vmatpush3.bf16.msra.mxu0 %v4751_v17  ;;  %v4771_v21 = vpack.c.bf16 %v746_v6, %v745_v5  ;;  %v850_v0 = vld [vmem:[%s7714_s1 + $0x19a8] sm:$0xff]  ;;  %v833_v6 = vld [vmem:[%s7714_s1 + $0x1920] sm:$0xff] }
 0x16a   :  { %4754 = vmatprep.subr.bf16.mxu0 %v4753_v19  ;;  %v796_v19 = vld [vmem:[%s7714_s1 + $0x17f8] sm:$0xff]  ;;  %v802_v5 = vld [vmem:[%s7714_s1 + $0x1828] sm:$0xff]  ;;  %v4849_v8 = vpack.c.bf16 %v850_v0, %v849_v62 }
 0x16b   :  { %4784 = vmatpush3.bf16.msra.mxu1 %v4783_v18  ;;  %v795_v18 = vld [vmem:[%s7714_s1 + $0x17f0] sm:$0xff]  ;;  %v828_v62 = vld [vmem:[%s7714_s1 + $0x18f8] sm:$0xff] }
 0x16c   :  { %4786 = vmatprep.subr.bf16.mxu1 %v4785_v22  ;;  %v27_v22 = vld [vmem:[%s7713_s0 + $0x60] sm:$0xff] }
 0x16d   :  { %4756 = vmatpush3.bf16.msra.mxu0 %v4755_v31  ;;  %v779_v31 = vld [vmem:[%s7714_s1 + $0x1770] sm:$0xff]  ;;  %v1098_v36 = vcombine.high %v27_v22, %v27_v22  ;;  %v7486_v49 = vrot.slane %v27_v22, %v5105_v10  ;;  %v821_v22 = vld [vmem:[%s7714_s1 + $0x18c0] sm:$0xff] }
 0x16e   :  { %4758 = vmatprep.subr.bf16.mxu0 %v4757_v33  ;;  %v4805_v33 = vpack.c.bf16 %v796_v19, %v795_v18  ;;  %v4807_v38 = vpack.c.bf16 %v780_v43, %v779_v31  ;;  %v803_v18 = vld [vmem:[%s7714_s1 + $0x1830] sm:$0xff]  ;;  %v804_v19 = vld [vmem:[%s7714_s1 + $0x1838] sm:$0xff]  ;;  %v837_v43 = vld [vmem:[%s7714_s1 + $0x1940] sm:$0xff] }
 0x16f   :  { %4788 = vmatpush3.bf16.msra.mxu1 %v4787_v30  ;;  %v7495_v53 = vrot.slane %v1098_v36, %v5105_v10  ;;  %v4845_v10 = vpack.c.bf16 %v848_v50, %v847_v32  ;;  %v1113_v11 = vcombine.high %v7486_v49, %v7486_v49  ;;  %v4823_v28 = vpack.c.bf16 %v804_v19, %v803_v18  ;;  %v855_v36 = vld [vmem:[%s7714_s1 + $0x19d0] sm:$0xff]  ;;  %v826_v32 = vld [vmem:[%s7714_s1 + $0x18e8] sm:$0xff]  ;;  %v857_v50 = vld [vmem:[%s7714_s1 + $0x19e0] sm:$0xff] }
 0x170   :  { %4790 = vmatprep.subr.bf16.mxu1 %v4789_v35  ;;  %v845_v35 = vld [vmem:[%s7714_s1 + $0x1980] sm:$0xff] }
 0x171   :  { %4760 = vmatpush3.bf16.msra.mxu0 %v4759_v42  ;;  %v797_v42 = vld [vmem:[%s7714_s1 + $0x1800] sm:$0xff]  ;;  %v1114_v1 = vcombine.high %v7495_v53, %v7495_v53 }
 0x172   :  { %4762 = vmatprep.subr.bf16.mxu0 %v4761_v45  ;;  %v829_v45 = vld [vmem:[%s7714_s1 + $0x1900] sm:$0xff] }
 0x173   :  { %4792 = vmatpush3.bf16.msra.mxu1 %v4791_v44  ;;  %v798_v44 = vld [vmem:[%s7714_s1 + $0x1808] sm:$0xff] }
 0x174   :  { %4794 = vmatprep.subr.bf16.mxu1 %v4793_v48  ;;  %v816_v48 = vld [vmem:[%s7714_s1 + $0x1898] sm:$0xff]  ;;  %v4811_v54 = vpack.c.bf16 %v798_v44, %v797_v42  ;;  %v807_v44 = vld [vmem:[%s7714_s1 + $0x1850] sm:$0xff] }
 0x175   :  { %4764 = vmatpush3.bf16.msra.mxu0 %v4763_v55  ;;  %v4843_v55 = vpack.c.bf16 %v830_v47, %v829_v45  ;;  %v808_v45 = vld [vmem:[%s7714_s1 + $0x1858] sm:$0xff] }
 0x176   :  { %4766 = vmatprep.subr.bf16.mxu0 %v4765_v57  ;;  %v799_v57 = vld [vmem:[%s7714_s1 + $0x1810] sm:$0xff] }
 0x177   :  { %4796 = vmatpush3.bf16.msra.mxu1 %v4795_v56  ;;  %v3403_v7 = vpop.f32.mrb[8].mxu0  ;;  %v4813_v56 = vpack.c.bf16 %v816_v48, %v815_v52  ;;  %v840_v52 = vld [vmem:[%s7714_s1 + $0x1958] sm:$0xff]  ;;  %v825_v48 = vld [vmem:[%s7714_s1 + $0x18e0] sm:$0xff] }
 0x178   :  { %4798 = vmatprep.subr.bf16.mxu1 %v4797_v51  ;;  %v3404_v16 = vpop.f32.mrb[9].mxu0  ;;  %v817_v51 = vld [vmem:[%s7714_s1 + $0x18a0] sm:$0xff] }
 0x179   :  { %v3438_v17 = vpop.f32.mrb[8].mxu1  ;;  %v3405_v9 = vadd.f32 %v3404_v16, %v3403_v7  ;;  %4768 = vmatpush3.bf16.msra.mxu0 %v4767_v2  ;;  %v4815_v2 = vpack.c.bf16 %v800_v41, %v799_v57  ;;  %v819_v7 = vld [vmem:[%s7714_s1 + $0x18b0] sm:$0xff]  ;;  %v4833_v57 = vpack.c.bf16 %v826_v32, %v825_v48  ;;  %v809_v41 = vld [vmem:[%s7714_s1 + $0x1860] sm:$0xff] }
 0x17a   :  { %v3439_v20 = vpop.f32.mrb[9].mxu1  ;;  %4770 = vmatprep.subr.bf16.mxu0 %v4769_v4  ;;  %v4817_v4 = vpack.c.bf16 %v818_v60, %v817_v51  ;;  %v842_v60 = vld [vmem:[%s7714_s1 + $0x1968] sm:$0xff] }
 0x17b   :  { %v3440_v13 = vadd.f32 %v3439_v20, %v3438_v17  ;;  %4800 = vmatpush3.bf16.msra.mxu1 %v4799_v3  ;;  %v1808_v30 = vadd.f32 %v3405_v9, %v7255_v39  ;;  %v846_v39 = vld [vmem:[%s7714_s1 + $0x1988] sm:$0xff]  ;;  %v4847_v3 = vpack.c.bf16 %v832_v59, %v831_v58  ;;  %v835_v9 = vld [vmem:[%s7714_s1 + $0x1930] sm:$0xff]  ;;  %v4853_v20 = vpack.c.bf16 %v852_v14, %v851_v12 }
 0x17c   :  { %4802 = vmatprep.subr.bf16.mxu1 %v4801_v26  ;;  %v4841_v46 = vpack.c.bf16 %v846_v39, %v845_v35  ;;  %v820_v26 = vld [vmem:[%s7714_s1 + $0x18b8] sm:$0xff]  ;;  %v823_v35 = vld [vmem:[%s7714_s1 + $0x18d0] sm:$0xff]  ;;  %v810_v58 = vld [vmem:[%s7714_s1 + $0x1868] sm:$0xff] }
 0x17d   :  { %v7465_v27 = vadd.f32 %v3440_v13, %v1808_v30  ;;  %4772 = vmatpush3.bf16.msra.mxu0 %v4771_v21  ;;  %v4821_v17 = vpack.c.bf16 %v820_v26, %v819_v7  ;;  %v836_v21 = vld [vmem:[%s7714_s1 + $0x1938] sm:$0xff]  ;;  %v822_v13 = vld [vmem:[%s7714_s1 + $0x18c8] sm:$0xff]  ;;  %v805_v30 = vld [vmem:[%s7714_s1 + $0x1840] sm:$0xff] }
 0x17e   :  { %4774 = vmatprep.subr.bf16.mxu0 %v4773_v25  ;;  %v854_v25 = vld [vmem:[%s7714_s1 + $0x19c8] sm:$0xff]  ;;  %v4855_v29 = vpack.c.bf16 %v836_v21, %v835_v9  ;;  %v4825_v31 = vpack.c.bf16 %v822_v13, %v821_v22  ;;  %v824_v39 = vld [vmem:[%s7714_s1 + $0x18d8] sm:$0xff]  ;;  %v811_v7 = vld [vmem:[%s7714_s1 + $0x1870] sm:$0xff]  ;;  %v4936_v21 = vmov 0.0|0.0  }
 0x17f   :  { %4804 = vmatpush3.bf16.msra.mxu1 %v4803_v24  ;;  %v853_v24 = vld [vmem:[%s7714_s1 + $0x19c0] sm:$0xff]  ;;  %v4829_v42 = vpack.c.bf16 %v824_v39, %v823_v35  ;;  %v812_v26 = vld [vmem:[%s7714_s1 + $0x1878] sm:$0xff]  ;;  %v862_v9 = vld [vmem:[%s7714_s1 + $0x1a08] sm:$0xff] }
 0x180   :  { %4806 = vmatprep.subr.bf16.mxu1 %v4805_v33  ;;  %v806_v33 = vld [vmem:[%s7714_s1 + $0x1848] sm:$0xff]  ;;  %v4857_v23 = vpack.c.bf16 %v854_v25, %v853_v24  ;;  %v4839_v18 = vpack.c.bf16 %v812_v26, %v811_v7  ;;  %v863_v22 = vld [vmem:[%s7714_s1 + $0x1a10] sm:$0xff]  ;;  %v864_v13 = vld [vmem:[%s7714_s1 + $0x1a18] sm:$0xff] }
 0x181   :  { %4776 = vmatpush3.bf16.msra.mxu0 %v4775_v37  ;;  %v856_v37 = vld [vmem:[%s7714_s1 + $0x19d8] sm:$0xff]  ;;  %v4877_v24 = vpack.c.bf16 %v864_v13, %v863_v22  ;;  %v865_v25 = vld [vmem:[%s7714_s1 + $0x1a20] sm:$0xff] }
 0x182   :  { %4810 = vmatprep.subr.bf16.mxu0 %v4809_v40  ;;  %v4859_v40 = vpack.c.bf16 %v838_v34, %v837_v43  ;;  %v4861_v47 = vpack.c.bf16 %v856_v37, %v855_v36  ;;  %v870_v43 = vld [vmem:[%s7714_s1 + $0x1a48] sm:$0xff]  ;;  %v871_v34 = vld [vmem:[%s7714_s1 + $0x1a50] sm:$0xff]  ;;  %v872_v35 = vld [vmem:[%s7714_s1 + $0x1a58] sm:$0x7] }
 0x183   :  { %4808 = vmatpush3.bf16.msra.mxu1 %v4807_v38  ;;  %v4827_v38 = vpack.c.bf16 %v806_v33, %v805_v30  ;;  %v869_v33 = vld [vmem:[%s7714_s1 + $0x1a40] sm:$0xff]  ;;  %v4889_v39 = vpack.c.bf16 %v872_v35, %v871_v34 }
 0x184   :  { %4842 = vmatprep.subr.bf16.mxu1 %v4841_v46  ;;  %2786 = vmatmul.mubr.f32.vlgmr.msra.gmra.mrb[22].mxu0 %v7276_v61  ;;  %v801_v61 = vld [vmem:[%s7714_s1 + $0x1820] sm:$0xff]  ;;  %v839_v46 = vld [vmem:[%s7714_s1 + $0x1950] sm:$0xff] }
 0x185   :  { %4812 = vmatpush3.bf16.msra.mxu0 %v4811_v54  ;;  %2925 = vmatprep.mubr.f32.mxu0 %v1113_v11  ;;  %v4819_v15 = vpack.c.bf16 %v802_v5, %v801_v61  ;;  %v858_v54 = vld [vmem:[%s7714_s1 + $0x19e8] sm:$0xff]  ;;  %v827_v11 = vld [vmem:[%s7714_s1 + $0x18f0] sm:$0xff]  ;;  %v4835_v5 = vpack.c.bf16 %v810_v58, %v809_v41 }
 0x186   :  { %2856 = vmatmul.mubr.f32.vlgmr.msra.gmra.mrb[22].mxu1 %v7285_v63  ;;  %4814 = vmatprep.subr.bf16.mxu0 %v4813_v56  ;;  %v834_v63 = vld [vmem:[%s7714_s1 + $0x1928] sm:$0xff]  ;;  %v4863_v56 = vpack.c.bf16 %v840_v52, %v839_v46  ;;  %v4865_v51 = vpack.c.bf16 %v858_v54, %v857_v50 }
 0x187   :  { %4844 = vmatpush3.bf16.msra.mxu1 %v4843_v55  ;;  %2995 = vmatprep.mubr.f32.mxu1 %v1114_v1  ;;  %v4851_v16 = vpack.c.bf16 %v834_v63, %v833_v6  ;;  %v4831_v55 = vpack.c.bf16 %v808_v45, %v807_v44  ;;  %v4837_v63 = vpack.c.bf16 %v828_v62, %v827_v11  ;;  %v3088_v44 = vld.sshfl [vmem:[%s7713_s0 + $0x68] sm:$0x3 pattern:$0x76325410]  ;;  %s4940_s0 = smov [#allocation2]  }
 0x188   :  { %4846 = vmatprep.subr.bf16.mxu1 %v4845_v10  ;;  %v841_v10 = vld [vmem:[%s7714_s1 + $0x1960] sm:$0xff] }
 0x189   :  { %4816 = vmatpush3.bf16.msra.mxu0 %v4815_v2  ;;  %v859_v2 = vld [vmem:[%s7714_s1 + $0x19f0] sm:$0xff] }
 0x18a   :  { %4818 = vmatprep.subr.bf16.mxu0 %v4817_v4 }
 0x18b   :  { %4848 = vmatpush3.bf16.msra.mxu1 %v4847_v3  ;;  %v860_v3 = vld [vmem:[%s7714_s1 + $0x19f8] sm:$0xff] }
 0x18c   :  { %4850 = vmatprep.subr.bf16.mxu1 %v4849_v8  ;;  %v4867_v8 = vpack.c.bf16 %v842_v60, %v841_v10  ;;  %v4869_v14 = vpack.c.bf16 %v860_v3, %v859_v2 }
 0x18d   :  { %4820 = vmatpush3.bf16.msra.mxu0 %v4819_v15  ;;  %v843_v15 = vld [vmem:[%s7714_s1 + $0x1970] sm:$0xff] }
 0x18e   :  { %4822 = vmatprep.subr.bf16.mxu0 %v4821_v17 }
 0x18f   :  { %4852 = vmatpush3.bf16.msra.mxu1 %v4851_v16  ;;  %v844_v16 = vld [vmem:[%s7714_s1 + $0x1978] sm:$0xff] }
 0x190   :  { %4854 = vmatprep.subr.bf16.mxu1 %v4853_v20  ;;  %v4871_v19 = vpack.c.bf16 %v844_v16, %v843_v15 }
 0x191   :  { %4824 = vmatpush3.bf16.msra.mxu0 %v4823_v28  ;;  %v866_v28 = vld [vmem:[%s7714_s1 + $0x1a28] sm:$0xff] }
 0x192   :  { %4826 = vmatprep.subr.bf16.mxu0 %v4825_v31  ;;  %v4880_v31 = vpack.c.bf16 %v866_v28, %v865_v25 }
 0x193   :  { %4856 = vmatpush3.bf16.msra.mxu1 %v4855_v29  ;;  %v4938_v29 = vmov 0.0  }
 0x194   :  { %4858 = vmatprep.subr.bf16.mxu1 %v4857_v23  ;;  %v4886_v23 = vpack.c.bf16 %v870_v43, %v869_v33 }
 0x195   :  { %4828 = vmatpush3.bf16.msra.mxu0 %v4827_v38 }
 0x196   :  { %4830 = vmatprep.subr.bf16.mxu0 %v4829_v42 }
 0x197   :  { %4860 = vmatpush3.bf16.msra.mxu1 %v4859_v40  ;;  %v3473_v59 = vpop.f32.mrb[10].mxu0 }
 0x198   :  { %4862 = vmatprep.subr.bf16.mxu1 %v4861_v47  ;;  %v3474_v0 = vpop.f32.mrb[11].mxu0 }
 0x199   :  { %v3508_v1 = vpop.f32.mrb[10].mxu1  ;;  %v3475_v4 = vadd.f32 %v3474_v0, %v3473_v59  ;;  %4832 = vmatpush3.bf16.msra.mxu0 %v4831_v55 }
 0x19a   :  { %v3509_v61 = vpop.f32.mrb[11].mxu1  ;;  %4834 = vmatprep.subr.bf16.mxu0 %v4833_v57 }
 0x19b   :  { %v3510_v6 = vadd.f32 %v3509_v61, %v3508_v1  ;;  %4864 = vmatpush3.bf16.msra.mxu1 %v4863_v56  ;;  %v1948_v12 = vadd.f32 %v3475_v4, %v7465_v27  ;;  %v861_v27 = vld [vmem:[%s7714_s1 + $0x1a00] sm:$0xff] }
 0x19c   :  { %4866 = vmatprep.subr.bf16.mxu1 %v4865_v51  ;;  %v4874_v20 = vpack.c.bf16 %v862_v9, %v861_v27 }
 0x19d   :  { %v2018_v17 = vadd.f32 %v3510_v6, %v1948_v12  ;;  %4836 = vmatpush3.bf16.msra.mxu0 %v4835_v5 }
 0x19e   :  { %4838 = vmatprep.subr.bf16.mxu0 %v4837_v63 }
 0x19f   :  { %4868 = vmatpush3.bf16.msra.mxu1 %v4867_v8 }
 0x1a0   :  { %4870 = vmatprep.subr.bf16.mxu1 %v4869_v14 }
 0x1a1   :  { %4840 = vmatpush3.bf16.msra.mxu0 %v4839_v18 }
 0x1a2   :  { %4873 = vmatprep.subr.bf16.mxu0 %v4936_v21 }
 0x1a3   :  { %4872 = vmatpush3.bf16.msra.mxu1 %v4871_v19 }
 0x1a4   :  { %2926 = vmatmul.mubr.f32.vlgmr.msra.gmra.mrb[24].mxu0 %v7486_v49  ;;  %v867_v49 = vld [vmem:[%s7714_s1 + $0x1a30] sm:$0xff] }
 0x1a5   :  { %4875 = vmatpush3.bf16.msra.mxu0 %v4874_v20  ;;  %4038 = vmatprep.mubr.msk.f32.mxu0 %vm4937_vm0, %v4938_v29 }
 0x1a6   :  { %2996 = vmatmul.mubr.f32.vlgmr.msra.gmra.mrb[24].mxu1 %v7495_v53  ;;  %4876 = vmatprep.subr.bf16.mxu0 %v4936_v21  ;;  %v868_v53 = vld [vmem:[%s7714_s1 + $0x1a38] sm:$0xff]  ;;  %s3079_s1 = sshll.u32 %s4940_s0, 4  ;;  %s3080_s1 = int_to_ptr.vmem [resolvable:$true] %s3079_s1 }
 0x1a7   :  { %v4883_v30 = vpack.c.bf16 %v868_v53, %v867_v49  ;;  %s4911_s4 = scalar_lea.vmem %s3080_s1, 32  ;;  %p4916_p1 = scmp.lt.s32.totalorder %s3080_s1, %s3080_s1 }
 0x1a8   :  { %p4912_p0 = scmp.ne.s32.totalorder %s3080_s1, %s4911_s4  ;;  %p4917_p2 = scmp.lt.s32.totalorder %s4911_s4, %s4911_s4 }
 0x1a9   :  { %4878 = vmatpush3.bf16.msra.mxu0 %v4877_v24 }
 0x1aa   :  { %4879 = vmatprep.subr.bf16.mxu0 %v4936_v21  ;;  %p4918_p3 = por %p4917_p2, %p4916_p1 }
 0x1ac   :  { %p4919_p4 = pnand %p4918_p3, %p4912_p0 }
 0x1ad   :  { %4881 = vmatpush3.bf16.msra.mxu0 %v4880_v31 }
 0x1ae   :  { %4882 = vmatprep.subr.bf16.mxu0 %v4936_v21 }
 0x1b1   :  { %4884 = vmatpush3.bf16.msra.mxu0 %v4883_v30 }
 0x1b2   :  { %4885 = vmatprep.subr.bf16.mxu0 %v4936_v21 }
 0x1b5   :  { %4887 = vmatpush3.bf16.msra.mxu0 %v4886_v23 }
 0x1b6   :  { %4888 = vmatprep.subr.bf16.mxu0 %v4936_v21 }
 0x1b7   :  { %v3543_v36 = vpop.f32.mrb[12].mxu0 }
 0x1b8   :  { %v3544_v37 = vpop.f32.mrb[13].mxu0 }
 0x1b9   :  { %v3578_v38 = vpop.f32.mrb[12].mxu1  ;;  %v3545_v40 = vadd.f32 %v3544_v37, %v3543_v36  ;;  %4891 = vmatpush3.bf16.msk.msra.mxu0 %vm4890_vm3, %v4889_v39 }
 0x1ba   :  { %v3579_v42 = vpop.f32.mrb[13].mxu1 }
 0x1bb   :  { %v3580_v45 = vadd.f32 %v3579_v42, %v3578_v38  ;;  %v2088_v46 = vadd.f32 %v3545_v40, %v2018_v17 }
 0x1bc   :  { %4039 = vmatmul.mubr.msk.f32.vlgmr.msra.gmra.mrb[26].mxu0 %vm1174_vm4, %v3088_v44 }
 0x1bd   :  { %v2158_v47 = vadd.f32 %v3580_v45, %v2088_v46 }
 0x1d7   :  { %v3613_v52 = vpop.f32.mrb[14].mxu0 }
 0x1d8   :  { %v3614_v48 = vpop.f32.mrb[15].mxu0 }
 0x1d9   :  { %v3648_v32 = vpop.f32.mrb[14].mxu1  ;;  %v3615_v50 = vadd.f32 %v3614_v48, %v3613_v52 }
 0x1da   :  { %v3649_v54 = vpop.f32.mrb[15].mxu1 }
 0x1db   :  { %v3650_v55 = vadd.f32 %v3649_v54, %v3648_v32  ;;  %v2228_v56 = vadd.f32 %v3615_v50, %v2158_v47 }
 0x1dd   :  { %v2298_v57 = vadd.f32 %v3650_v55, %v2228_v56 }
 0x1f7   :  { %v3683_v41 = vpop.f32.mrb[16].mxu0 }
 0x1f8   :  { %v3684_v58 = vpop.f32.mrb[17].mxu0 }
 0x1f9   :  { %v3718_v10 = vpop.f32.mrb[16].mxu1  ;;  %v3685_v59 = vadd.f32 %v3684_v58, %v3683_v41 }
 0x1fa   :  { %v3719_v51 = vpop.f32.mrb[17].mxu1 }
 0x1fb   :  { %v3720_v60 = vadd.f32 %v3719_v51, %v3718_v10  ;;  %v2368_v11 = vadd.f32 %v3685_v59, %v2298_v57 }
 0x1fd   :  { %v2438_v62 = vadd.f32 %v3720_v60, %v2368_v11 }
 0x217   :  { %v3753_v0 = vpop.f32.mrb[18].mxu0 }
 0x218   :  { %v3754_v1 = vpop.f32.mrb[19].mxu0 }
 0x219   :  { %v3788_v2 = vpop.f32.mrb[18].mxu1  ;;  %v3755_v3 = vadd.f32 %v3754_v1, %v3753_v0 }
 0x21a   :  { %v3789_v4 = vpop.f32.mrb[19].mxu1 }
 0x21b   :  { %v3790_v61 = vadd.f32 %v3789_v4, %v3788_v2  ;;  %v2508_v5 = vadd.f32 %v3755_v3, %v2438_v62 }
 0x21d   :  { %v2578_v6 = vadd.f32 %v3790_v61, %v2508_v5 }
 0x237   :  { %v3823_v8 = vpop.f32.mrb[20].mxu0 }
 0x238   :  { %v3824_v63 = vpop.f32.mrb[21].mxu0 }
 0x239   :  { %v3858_v7 = vpop.f32.mrb[20].mxu1  ;;  %v3825_v26 = vadd.f32 %v3824_v63, %v3823_v8 }
 0x23a   :  { %v3859_v12 = vpop.f32.mrb[21].mxu1 }
 0x23b   :  { %v3860_v14 = vadd.f32 %v3859_v12, %v3858_v7  ;;  %v2648_v15 = vadd.f32 %v3825_v26, %v2578_v6 }
 0x23d   :  { %v2718_v16 = vadd.f32 %v3860_v14, %v2648_v15 }
 0x257   :  { %v3893_v17 = vpop.f32.mrb[22].mxu0 }
 0x258   :  { %v3894_v18 = vpop.f32.mrb[23].mxu0 }
 0x259   :  { %v3928_v19 = vpop.f32.mrb[22].mxu1  ;;  %v3895_v27 = vadd.f32 %v3894_v18, %v3893_v17 }
 0x25a   :  { %v3929_v9 = vpop.f32.mrb[23].mxu1 }
 0x25b   :  { %v3930_v20 = vadd.f32 %v3929_v9, %v3928_v19  ;;  %v2788_v21 = vadd.f32 %v3895_v27, %v2718_v16 }
 0x25d   :  { %v2858_v22 = vadd.f32 %v3930_v20, %v2788_v21 }
 0x277   :  { %v3963_v13 = vpop.f32.mrb[24].mxu0 }
 0x278   :  { %v3964_v24 = vpop.f32.mrb[25].mxu0 }
 0x279   :  { %v3998_v25 = vpop.f32.mrb[24].mxu1  ;;  %v3965_v28 = vadd.f32 %v3964_v24, %v3963_v13 }
 0x27a   :  { %v3999_v29 = vpop.f32.mrb[25].mxu1 }
 0x27b   :  { %v4000_v31 = vadd.f32 %v3999_v29, %v3998_v25  ;;  %v2928_v49 = vadd.f32 %v3965_v28, %v2858_v22 }
 0x27d   :  { %v2998_v53 = vadd.f32 %v4000_v31, %v2928_v49 }
 0x28f   :  { %v3067_v30 = vpop.f32.mrb[26].mxu0 }
 0x290   :  { %v3068_v33 = vadd.f32 %v3067_v30, %v2998_v53  ;;  %v4040_v43 = vpop.f32.mrb[27].mxu0 }
 0x292   :  { %3072 = vst.msk [vmem:[#allocation2] sm:$0x3] %vm3071_vm5, %v3068_v33 }
 0x293   :  { %4922 = shalt.err (!%p4919_p4)
}
 0x294   :  { %s4923_s7 = scalar_lea.hbm %s7716_s3, 32 }
 0x295   :  { %p4924_p5 = scmp.ne.s32.totalorder %s7716_s3, %s4923_s7  ;;  %p4927_p6 = scmp.lt.u32.totalorder %s4923_s7, %s7716_s3 }
 0x297   :  { %p4929_p7 = pnand %p4927_p6, %p4924_p5 }
 0x299   :  { %4932 = shalt.err (!%p4929_p7)
}
 0x29a   :  { %3082 = dma.vmem_to_hbm [thread:$0]  %s3080_s1, 32, %s7716_s3, [#allocation3]  }
 0x29b   :  { %4933 = dma.done.wait [#allocation3], 32  }
 0x29c   :  { %4934 = vsyncadd [#allocation3], 4294967264 }
 0x29d   :  { %3086 = vsyncpa [#allocation3], 1 }

</bundles_post_ra>
